<compile_context>
chip_gen: v6e
topology: v6e:2x2x1
jax: 0.10.0
libtpu: 0.0.40
codegen_flags: <defaults>
</compile_context>

<pallas_src>
import functools

import jax
import jax.numpy as jnp
from jax import lax
from jax.experimental import pallas as pl
from jax.experimental.pallas import tpu as pltpu


def _round_up(n, m):
    return ((n + m - 1) // m) * m


def _nbytes(shape, dtype):
    n = 1
    for d in shape:
        n *= int(d)
    return n * jnp.dtype(dtype).itemsize


def _tpu_generation_info():
    """(vmem_capacity_bytes, num_tensorcores) with conservative (v7x-safe) fallbacks."""
    vmem_bytes = None
    num_tc = None
    try:
        info = pltpu.get_tpu_info()
        for a in ("vmem_capacity_bytes", "vmem_size_bytes", "vmem_bytes"):
            v = getattr(info, a, None)
            if v:
                vmem_bytes = int(v)
                break
        for a in ("num_tensorcores", "tensorcore_count", "num_cores", "cores_per_chip"):
            v = getattr(info, a, None)
            if v:
                num_tc = int(v)
                break
    except Exception:
        pass
    kind = ""
    try:
        kind = jax.devices()[0].device_kind.lower()
    except Exception:
        pass
    if vmem_bytes is None:
        # v5e / v6e have 128 MiB of VMEM per TensorCore; default to v7x's 64 MiB when unsure.
        vmem_bytes = (128 << 20) if ("v5" in kind or "v6" in kind) else (64 << 20)
    if num_tc is None:
        num_tc = 2 if "7" in kind else 1
    return vmem_bytes, num_tc


_VMEM_CAP_BYTES, _NUM_TC = _tpu_generation_info()
_VMEM_LIMIT_BYTES = (_VMEM_CAP_BYTES * 3) // 4      # ~96 MiB on v5e/v6e, ~48 MiB on v7x
_FUSED_MAX_N = 512 if _NUM_TC > 1 else 2048         # go gridded earlier on v7x (2 TCs/chip)


# --------------------------- in-kernel helpers ---------------------------

def _softmax_rows(logits):
    m = jnp.max(logits, axis=1, keepdims=True)
    e = jnp.exp(logits - m)
    # EUP approx reciprocal keeps the divide off the VPU critical path.
    return e * pl.reciprocal(jnp.sum(e, axis=1, keepdims=True), approx=True)


def _row_normalize(embeds):
    # torch: diag(1/||e_i||_2) @ e.  eps guards an all-zero row (reference would produce NaN).
    sq = jnp.sum(embeds * embeds, axis=1, keepdims=True)
    return embeds * lax.rsqrt(sq + 1e-12)


def _soft_kmeans(data_f32, mut0, *, cluster_temp, total_iters):
    """total_iters mu updates starting from mut0 (mu kept transposed: (nout_p, K)),
    then the final dist / r of the reference cluster().  Matmuls run bf16 on the MXU
    with f32 accumulation."""
    data = data_f32.astype(jnp.bfloat16)

    def step(_, mut):
        dist = jnp.dot(data, mut.astype(jnp.bfloat16),
                       preferred_element_type=jnp.float32)                    # (N, K)
        r = _softmax_rows(cluster_temp * dist)                                # (N, K)
        cluster_r = jnp.sum(r, axis=0, keepdims=True) + 1e-8                  # (1, K)
        # new_mu.T = data.T @ r with columns scaled by 1/cluster_r (no mu/r transposes per iter)
        cmean_t = lax.dot_general(data, r.astype(jnp.bfloat16),
                                  (((0,), (0,)), ((), ())),
                                  preferred_element_type=jnp.float32)         # (nout_p, K)
        return cmean_t * pl.reciprocal(cluster_r, approx=True)

    mut = lax.fori_loop(0, total_iters, step, mut0, unroll=total_iters <= 4)
    dist = jnp.dot(data, mut.astype(jnp.bfloat16), preferred_element_type=jnp.float32)
    r = _softmax_rows(cluster_temp * dist)
    return mut, r, dist


def _adj_to_bf16(adj_raw):
    # int8 (or f32/bf16) adjacency -> bf16 for the MXU.  Two-step cast (int -> f32 -> bf16)
    # is a cheap VPU op fully hidden under the adjacency DMA.
    return adj_raw.astype(jnp.float32).astype(jnp.bfloat16)


# --------------------------- kernels ---------------------------

def _fused_kernel(x_ref, adj_ref, w1_ref, b1_ref, w2_ref, b2_ref, mu0t_ref,
                  mut_ref, r_ref, embeds_ref, dist_ref, *, cluster_temp, total_iters):
    adj = _adj_to_bf16(adj_ref[...])                                          # (N, N) bf16
    # GCN layer 1: relu(adj @ (x @ W1) + b1)
    s1 = jnp.dot(x_ref[...], w1_ref[...], preferred_element_type=jnp.float32)
    h1 = jnp.dot(adj, s1.astype(jnp.bfloat16),
                 preferred_element_type=jnp.float32) + b1_ref[...]
    h1 = jnp.maximum(h1, 0.0)
    # TODO(synk): F.dropout is stochastic; eval semantics (p effectively 0) are used here.
    # GCN layer 2: adj @ (h1 @ W2) + b2
    s2 = jnp.dot(h1, w2_ref[...], preferred_element_type=jnp.float32)
    embeds = jnp.dot(adj, s2.astype(jnp.bfloat16),
                     preferred_element_type=jnp.float32) + b2_ref[...]
    embeds_ref[...] = embeds

    mut, r, dist = _soft_kmeans(_row_normalize(embeds), mu0t_ref[...],
                                cluster_temp=cluster_temp, total_iters=total_iters)
    mut_ref[...] = mut
    r_ref[...] = r
    dist_ref[...] = dist


def _xw1_kernel(x_ref, w1_ref, s1_ref):
    # support1 row tile = x @ W1, stored bf16 (feeds the bf16 adj matmul of stage 1).
    s1_ref[...] = jnp.dot(x_ref[...], w1_ref[...],
                          preferred_element_type=jnp.float32).astype(s1_ref.dtype)


def _support2_kernel(adj_ref, s1_ref, b1_ref, w2_ref, s2_ref):
    # row tile of: relu(adj @ support1 + b1) @ W2   (adj upcast int8 -> bf16 in-kernel)
    adj = _adj_to_bf16(adj_ref[...])
    h1 = jnp.dot(adj, s1_ref[...], preferred_element_type=jnp.float32) + b1_ref[...]
    h1 = jnp.maximum(h1, 0.0)
    # TODO(synk): F.dropout skipped (eval semantics).
    s2_ref[...] = jnp.dot(h1, w2_ref[...],
                          preferred_element_type=jnp.float32).astype(s2_ref.dtype)


def _embed_kernel(adj_ref, s2_ref, b2_ref, embeds_ref):
    # row tile of: embeds = adj @ support2 + b2.  Row-normalization happens in the cluster
    # kernel, saving an N x nout_p f32 HBM round trip.
    adj = _adj_to_bf16(adj_ref[...])
    embeds_ref[...] = jnp.dot(adj, s2_ref[...],
                              preferred_element_type=jnp.float32) + b2_ref[...]


def _cluster_kernel(embeds_ref, mu0t_ref, mut_ref, r_ref, dist_ref, *,
                    cluster_temp, total_iters):
    mut, r, dist = _soft_kmeans(_row_normalize(embeds_ref[...]), mu0t_ref[...],
                                cluster_temp=cluster_temp, total_iters=total_iters)
    mut_ref[...] = mut
    r_ref[...] = r
    dist_ref[...] = dist


# --------------------------- wrappers ---------------------------

def _pick_row_tile(N, nhid_p, nout_p, adj_itemsize, vmem_limit, num_tc):
    """Largest adjacency row tile that keeps stage-1/2 VMEM under the scoped limit:
    double-buffered adj tile + in-kernel upcast temporaries + f32 h1 tile + double-buffered
    output tile + the (pipeline-doubled) resident support/weight operands."""
    resident = (2 * 2 * N * max(nhid_p, nout_p)           # resident support matrix (bf16), x2
                + 2 * (4 * nhid_p * nout_p + 4 * (nhid_p + nout_p)))   # W2, b1, b2, x2
    per_row = (2 * N * adj_itemsize                        # double-buffered adj row tile
               + 6 * N                                     # f32 + bf16 upcast temporaries
               + 4 * nhid_p                                # f32 h1 tile
               + 2 * 2 * nout_p)                           # double-buffered output tile
    budget = max(vmem_limit - resident - (4 << 20), 32 * per_row)      # 4 MiB slack
    tm = budget // per_row
    tm = min(tm, 1024)                                     # >=512 rows already ~85% of roofline
    if num_tc > 1:
        # keep nt >= num_tc so dimension_semantics=('parallel',) feeds every TensorCore
        tm = min(tm, _round_up(pl.cdiv(N, num_tc), 32))
    tm = max(32, (tm // 32) * 32)                          # int8/bf16/f32 sublane-packing safe
    # TODO(synk): for N large enough that even tm=32 (or the resident support matrix) blows
    # VMEM, the contraction axis should be split with a second ('arbitrary') grid axis and an
    # f32 accumulator; not needed at the sizes targeted here.
    return int(min(tm, _round_up(N, 32)))


def _forward_fused(x, adj_c, p, mu0t, *, cluster_temp, num_iter):
    N, nfeat = x.shape
    nhid_p = p["w1"].shape[1]
    nout_p = p["w2"].shape[1]
    K = mu0t.shape[1]
    total_iters = 2 * num_iter

    vmem = pl.BlockSpec(memory_space=pltpu.MemorySpace.VMEM)
    kernel = functools.partial(_fused_kernel, cluster_temp=float(cluster_temp),
                               total_iters=int(total_iters))
    out_shape = (jax.ShapeDtypeStruct((nout_p, K), jnp.float32),   # mu (transposed, padded)
                 jax.ShapeDtypeStruct((N, K), jnp.float32),        # r
                 jax.ShapeDtypeStruct((N, nout_p), jnp.float32),   # embeds (padded)
                 jax.ShapeDtypeStruct((N, K), jnp.float32))        # dist
    flops = (2 * N * nfeat * nhid_p + 2 * N * N * nhid_p + 2 * N * nhid_p * nout_p
             + 2 * N * N * nout_p + (total_iters + 1) * 4 * N * nout_p * K)
    bytes_accessed = (_nbytes((N, nfeat), jnp.float32) + _nbytes((N, N), adj_c.dtype)
                      + _nbytes((nfeat, nhid_p), jnp.float32)
                      + _nbytes((nhid_p, nout_p), jnp.float32)
                      + _nbytes((N, nout_p), jnp.float32) + 2 * _nbytes((N, K), jnp.float32)
                      + 2 * _nbytes((nout_p, K), jnp.float32))

    return pl.pallas_call(
        kernel,
        out_shape=out_shape,
        in_specs=[vmem] * 7,
        out_specs=(vmem,) * 4,
        compiler_params=pltpu.CompilerParams(vmem_limit_bytes=_VMEM_LIMIT_BYTES),
        cost_estimate=pl.CostEstimate(flops=int(flops),
                                      transcendentals=int((total_iters + 1) * N * K + N),
                                      bytes_accessed=int(bytes_accessed)),
    )(x, adj_c, p["w1"], p["b1"], p["w2"], p["b2"], mu0t)


def _forward_gridded(x, adj_c, p, mu0t, *, cluster_temp, num_iter, row_tile):
    N, nfeat = x.shape
    nhid_p = p["w1"].shape[1]
    nout_p = p["w2"].shape[1]
    K = mu0t.shape[1]
    adj_dtype = adj_c.dtype
    tm = int(row_tile)
    assert tm % 32 == 0, "row_tile must be a multiple of 32 (int8/bf16 sublane packing)"
    nt = pl.cdiv(N, tm)

    par = pltpu.CompilerParams(dimension_semantics=("parallel",),
                               vmem_limit_bytes=_VMEM_LIMIT_BYTES)
    seq = pltpu.CompilerParams(vmem_limit_bytes=_VMEM_LIMIT_BYTES)

    # stage 0: support1 = x @ W1  (bf16 output, row-parallel; tiny)
    s1 = pl.pallas_call(
        _xw1_kernel,
        grid=(nt,),
        in_specs=[pl.BlockSpec((tm, nfeat), lambda i: (i, 0)),
                  pl.BlockSpec((nfeat, nhid_p), lambda i: (0, 0))],
        out_specs=pl.BlockSpec((tm, nhid_p), lambda i: (i, 0)),
        out_shape=jax.ShapeDtypeStruct((N, nhid_p), jnp.bfloat16),
        compiler_params=par,
        cost_estimate=pl.CostEstimate(
            flops=int(2 * N * nfeat * nhid_p), transcendentals=0,
            bytes_accessed=int(_nbytes((N, nfeat), jnp.float32)
                               + _nbytes((nfeat, nhid_p), jnp.float32)
                               + _nbytes((N, nhid_p), jnp.bfloat16))),
    )(x, p["w1"])

    # stage 1: support2 = relu(adj @ support1 + b1) @ W2
    #          (adj streamed as int8 row tiles, upcast to bf16 in-kernel)
    s2 = pl.pallas_call(
        _support2_kernel,
        grid=(nt,),
        in_specs=[pl.BlockSpec((tm, N), lambda i: (i, 0)),          # adj row tile (int8)
                  pl.BlockSpec((N, nhid_p), lambda i: (0, 0)),      # support1, resident
                  pl.BlockSpec((1, nhid_p), lambda i: (0, 0)),      # b1
                  pl.BlockSpec((nhid_p, nout_p), lambda i: (0, 0))],
        out_specs=pl.BlockSpec((tm, nout_p), lambda i: (i, 0)),
        out_shape=jax.ShapeDtypeStruct((N, nout_p), jnp.bfloat16),
        compiler_params=par,
        cost_estimate=pl.CostEstimate(
            flops=int(2 * N * N * nhid_p + 2 * N * nhid_p * nout_p), transcendentals=0,
            bytes_accessed=int(_nbytes((N, N), adj_dtype) + _nbytes((N, nhid_p), jnp.bfloat16)
                               + _nbytes((N, nout_p), jnp.bfloat16))),
    )(adj_c, s1, p["b1"], p["w2"])

    # stage 2: embeds = adj @ support2 + b2
    embeds = pl.pallas_call(
        _embed_kernel,
        grid=(nt,),
        in_specs=[pl.BlockSpec((tm, N), lambda i: (i, 0)),
                  pl.BlockSpec((N, nout_p), lambda i: (0, 0)),
                  pl.BlockSpec((1, nout_p), lambda i: (0, 0))],
        out_specs=pl.BlockSpec((tm, nout_p), lambda i: (i, 0)),
        out_shape=jax.ShapeDtypeStruct((N, nout_p), jnp.float32),
        compiler_params=par,
        cost_estimate=pl.CostEstimate(
            flops=int(2 * N * N * nout_p), transcendentals=0,
            bytes_accessed=int(_nbytes((N, N), adj_dtype) + _nbytes((N, nout_p), jnp.bfloat16)
                               + _nbytes((N, nout_p), jnp.float32))),
    )(adj_c, s2, p["b2"])

    # stage 3: two chained cluster() calls == 2*num_iter soft-kmeans updates + final dist/r.
    # TODO(synk): for very large N (>~100k rows) this whole-array stage should be row-tiled
    # with an (nout_p, K) VMEM accumulator per mu update; fine at the sizes targeted here.
    total_iters = 2 * num_iter
    vmem = pl.BlockSpec(memory_space=pltpu.MemorySpace.VMEM)
    mut, r, dist = pl.pallas_call(
        functools.partial(_cluster_kernel, cluster_temp=float(cluster_temp),
                          total_iters=int(total_iters)),
        in_specs=[vmem, vmem],
        out_specs=(vmem,) * 3,
        out_shape=(jax.ShapeDtypeStruct((nout_p, K), jnp.float32),
                   jax.ShapeDtypeStruct((N, K), jnp.float32),
                   jax.ShapeDtypeStruct((N, K), jnp.float32)),
        compiler_params=seq,
        cost_estimate=pl.CostEstimate(
            flops=int((total_iters + 1) * 4 * N * nout_p * K),
            transcendentals=int((total_iters + 1) * N * K + N),
            bytes_accessed=int(_nbytes((N, nout_p), jnp.float32)
                               + 2 * _nbytes((N, K), jnp.float32)
                               + 2 * _nbytes((nout_p, K), jnp.float32))),
    )(embeds, mu0t)
    return mut, r, embeds, dist


def modularity_forward(x, adj, params, mu0, *, cluster_temp, num_iter=1,
                       adj_dtype=jnp.int8, row_tile=None, force_gridded=False):
    """Modularity.forward(x, adj, num_iter, mu=mu0) -> (mu, r, embeds, dist).

    adj_dtype=int8 assumes a 0/1 (or small integer) adjacency, which int8 represents exactly
    and halves the dominant HBM traffic; pass jnp.bfloat16 / jnp.float32 for weighted graphs.
    """
    N, nfeat = x.shape
    nhid = params["w1"].shape[1]
    nout = params["w2"].shape[1]
    K = mu0.shape[0]
    nhid_p = _round_up(nhid, 128)
    nout_p = _round_up(nout, 128)

    x = x.astype(jnp.float32)
    adj_c = adj.astype(adj_dtype)

    # Zero-pad the lane dims to 128 so intermediate stores are lane-dense (unmasked vst).
    # Padded columns stay exactly zero through the whole forward, so results are unchanged.
    w1_p = jnp.zeros((nfeat, nhid_p), jnp.float32).at[:, :nhid].set(
        params["w1"].astype(jnp.float32))
    b1_p = jnp.zeros((1, nhid_p), jnp.float32).at[:, :nhid].set(
        params["b1"].reshape(1, nhid).astype(jnp.float32))
    w2_p = jnp.zeros((nhid_p, nout_p), jnp.float32).at[:nhid, :nout].set(
        params["w2"].astype(jnp.float32))
    b2_p = jnp.zeros((1, nout_p), jnp.float32).at[:, :nout].set(
        params["b2"].reshape(1, nout).astype(jnp.float32))
    mu0t_p = jnp.zeros((nout_p, K), jnp.float32).at[:nout, :].set(
        jnp.transpose(mu0.astype(jnp.float32)))
    padded = {"w1": w1_p, "b1": b1_p, "w2": w2_p, "b2": b2_p}

    if force_gridded or N > _FUSED_MAX_N:
        tm = int(row_tile) if row_tile is not None else _pick_row_tile(
            N, nhid_p, nout_p, jnp.dtype(adj_dtype).itemsize, _VMEM_LIMIT_BYTES, _NUM_TC)
        mut, r, embeds_p, dist = _forward_gridded(
            x, adj_c, padded, mu0t_p, cluster_temp=cluster_temp,
            num_iter=num_iter, row_tile=tm)
    else:
        mut, r, embeds_p, dist = _forward_fused(
            x, adj_c, padded, mu0t_p, cluster_temp=cluster_temp, num_iter=num_iter)

    mu = jnp.transpose(mut)[:, :nout]
    embeds = embeds_p[:, :nout]
    return mu, r, embeds, dist


def init_params(key, nfeat, nhid, nout):
    """Deterministic init mirroring GraphConvolution.reset_parameters (uniform +-stdv)."""
    k1, k2, k3, k4 = jax.random.split(key, 4)
    stdv1 = 1.0 / jnp.sqrt(nhid)
    stdv2 = 1.0 / jnp.sqrt(nout)
    return {
        "w1": jax.random.uniform(k1, (nfeat, nhid), jnp.float32, -stdv1, stdv1),
        "b1": jax.random.uniform(k2, (1, nhid), jnp.float32, -stdv1, stdv1),
        "w2": jax.random.uniform(k3, (nhid, nout), jnp.float32, -stdv2, stdv2),
        "b2": jax.random.uniform(k4, (1, nout), jnp.float32, -stdv2, stdv2),
    }


def _reference_forward(x, adj, params, mu0, *, cluster_temp, num_iter):
    """Pure-JAX f32 mirror of the PyTorch module (for a loose parity check)."""
    def gcn(x_, adj_):
        h = jnp.maximum(adj_ @ (x_ @ params["w1"]) + params["b1"], 0.0)
        return adj_ @ (h @ params["w2"]) + params["b2"]

    def cluster(embeds_, mu, iters):
        data = embeds_ / jnp.linalg.norm(embeds_, axis=1, keepdims=True)
        for _ in range(iters):
            dist = data @ mu.T
            r = jax.nn.softmax(cluster_temp * dist, axis=1)
            cluster_r = r.sum(0) + 1e-8
            mu = (r.T @ data) / cluster_r[:, None]
        dist = data @ mu.T
        r = jax.nn.softmax(cluster_temp * dist, axis=1)
        return mu, r, dist

    embeds = gcn(x, adj)
    mu_init, _, _ = cluster(embeds, mu0, num_iter)
    mu, r, dist = cluster(embeds, mu_init, num_iter)
    return mu, r, embeds, dist


if __name__ == "__main__":
    N, NFEAT, NHID, NOUT, K = 256, 32, 32, 16, 8
    CLUSTER_TEMP, NUM_ITER = 5.0, 1

    key = jax.random.PRNGKey(0)
    kx, kadj, kmu, kparams = jax.random.split(key, 4)

    x = jax.random.normal(kx, (N, NFEAT), jnp.float32)
    # Dense 0/1 symmetric adjacency with self-loops (spmm on dense == dense matmul).
    a = (jax.random.uniform(kadj, (N, N)) < 0.05).astype(jnp.float32)
    adj = jnp.minimum(a + a.T + jnp.eye(N, dtype=jnp.float32), 1.0)
    mu0 = jax.random.uniform(kmu, (K, NOUT), jnp.float32)
    params = init_params(kparams, NFEAT, NHID, NOUT)

    # Small-N path: one fused whole-array VMEM kernel.
    mu_f, r_f, emb_f, dist_f = modularity_forward(
        x, adj, params, mu0, cluster_temp=CLUSTER_TEMP, num_iter=NUM_ITER)
    # Large-N path: row-tiled, megacore-parallel gridded kernels (forced here for coverage).
    mu_g, r_g, emb_g, dist_g = modularity_forward(
        x, adj, params, mu0, cluster_temp=CLUSTER_TEMP, num_iter=NUM_ITER,
        force_gridded=True, row_tile=64)
    jax.block_until_ready((mu_f, r_f, emb_f, dist_f, mu_g, r_g, emb_g, dist_g))

    assert mu_f.shape == (K, NOUT) and mu_g.shape == (K, NOUT)
    assert r_f.shape == (N, K) and dist_f.shape == (N, K)
    assert emb_f.shape == (N, NOUT) and emb_g.shape == (N, NOUT)
    for t in (mu_f, r_f, emb_f, dist_f, mu_g, r_g, emb_g, dist_g):
        assert bool(jnp.all(jnp.isfinite(t)))

    def _check(name, got, want, rtol, atol):
        diff = float(jnp.max(jnp.abs(got - want)))
        scale = float(jnp.max(jnp.abs(want))) + 1e-6
        assert diff <= rtol * scale + atol, f"{name} mismatch: diff={diff} scale={scale}"

    # fused vs gridded path consistency (same math, different tiling -> near-exact)
    _check("mu (paths)", mu_f, mu_g, 1e-2, 1e-3)
    _check("r (paths)", r_f, r_g, 1e-2, 1e-3)
    _check("embeds (paths)", emb_f, emb_g, 1e-2, 1e-3)
    _check("dist (paths)", dist_f, dist_g, 1e-2, 1e-3)

    # parity with the f32 reference semantics (bf16 MXU deviations expected -> loose tolerance)
    mu_r, r_r, emb_r, dist_r = _reference_forward(
        x, adj, params, mu0, cluster_temp=CLUSTER_TEMP, num_iter=NUM_ITER)
    _check("mu (ref)", mu_f, mu_r, 5e-2, 2e-2)
    _check("r (ref)", r_f, r_r, 5e-2, 2e-2)
    _check("embeds (ref)", emb_f, emb_r, 5e-2, 2e-2)
    _check("dist (ref)", dist_f, dist_r, 5e-2, 2e-2)

    print("KERNEL_OK")
</pallas_src>

<mosaic_0001>
module attributes {stable_mosaic.version = 11 : i64} {
  func.func @_fused_kernel(%arg0: memref<256x32xf32, #tpu.memory_space<vmem>>, %arg1: memref<256x256xi8, #tpu.memory_space<vmem>>, %arg2: memref<32x128xf32, #tpu.memory_space<vmem>>, %arg3: memref<1x128xf32, #tpu.memory_space<vmem>>, %arg4: memref<128x128xf32, #tpu.memory_space<vmem>>, %arg5: memref<1x128xf32, #tpu.memory_space<vmem>>, %arg6: memref<128x8xf32, #tpu.memory_space<vmem>>, %arg7: memref<128x8xf32, #tpu.memory_space<vmem>>, %arg8: memref<256x8xf32, #tpu.memory_space<vmem>>, %arg9: memref<256x128xf32, #tpu.memory_space<vmem>>, %arg10: memref<256x8xf32, #tpu.memory_space<vmem>>) attributes {dimension_semantics = [], scalar_prefetch = 0 : i64, scratch_operands = 0 : i64, tpu.core_type = #tpu.core_type<tc>} {
    %c0 = arith.constant 0 : index
    %c0_0 = arith.constant 0 : index
    %0 = vector.load %arg1[%c0, %c0_0] : memref<256x256xi8, #tpu.memory_space<vmem>>, vector<256x256xi8>
    %1 = arith.sitofp %0 : vector<256x256xi8> to vector<256x256xf32>
    %2 = arith.truncf %1 : vector<256x256xf32> to vector<256x256xbf16>
    %c0_1 = arith.constant 0 : index
    %c0_2 = arith.constant 0 : index
    %3 = vector.load %arg0[%c0_1, %c0_2] : memref<256x32xf32, #tpu.memory_space<vmem>>, vector<256x32xf32>
    %c0_3 = arith.constant 0 : index
    %c0_4 = arith.constant 0 : index
    %4 = vector.load %arg2[%c0_3, %c0_4] : memref<32x128xf32, #tpu.memory_space<vmem>>, vector<32x128xf32>
    %cst = arith.constant dense<0.000000e+00> : vector<256x128xf32>
    %5 = tpu.matmul %3, %4, %cst {dimension_numbers = #tpu.dot_dimension_numbers<[1], [0], [0], [1], [0, 0, 1, 1], [], []>} : vector<256x32xf32>, vector<32x128xf32>, vector<256x128xf32> -> vector<256x128xf32>
    %6 = arith.truncf %5 : vector<256x128xf32> to vector<256x128xbf16>
    %cst_5 = arith.constant dense<0.000000e+00> : vector<256x128xf32>
    %7 = tpu.matmul %2, %6, %cst_5 {dimension_numbers = #tpu.dot_dimension_numbers<[1], [0], [0], [1], [0, 0, 1, 1], [], []>} : vector<256x256xbf16>, vector<256x128xbf16>, vector<256x128xf32> -> vector<256x128xf32>
    %c0_6 = arith.constant 0 : index
    %c0_7 = arith.constant 0 : index
    %8 = vector.load %arg3[%c0_6, %c0_7] : memref<1x128xf32, #tpu.memory_space<vmem>>, vector<1x128xf32>
    %9 = vector.broadcast %8 : vector<1x128xf32> to vector<256x128xf32>
    %10 = arith.addf %7, %9 : vector<256x128xf32>
    %cst_8 = arith.constant 0.000000e+00 : f32
    %11 = vector.broadcast %cst_8 : f32 to vector<256x128xf32>
    %12 = arith.maximumf %10, %11 : vector<256x128xf32>
    %c0_9 = arith.constant 0 : index
    %c0_10 = arith.constant 0 : index
    %13 = vector.load %arg4[%c0_9, %c0_10] : memref<128x128xf32, #tpu.memory_space<vmem>>, vector<128x128xf32>
    %cst_11 = arith.constant dense<0.000000e+00> : vector<256x128xf32>
    %14 = tpu.matmul %12, %13, %cst_11 {dimension_numbers = #tpu.dot_dimension_numbers<[1], [0], [0], [1], [0, 0, 1, 1], [], []>} : vector<256x128xf32>, vector<128x128xf32>, vector<256x128xf32> -> vector<256x128xf32>
    %15 = arith.truncf %14 : vector<256x128xf32> to vector<256x128xbf16>
    %cst_12 = arith.constant dense<0.000000e+00> : vector<256x128xf32>
    %16 = tpu.matmul %2, %15, %cst_12 {dimension_numbers = #tpu.dot_dimension_numbers<[1], [0], [0], [1], [0, 0, 1, 1], [], []>} : vector<256x256xbf16>, vector<256x128xbf16>, vector<256x128xf32> -> vector<256x128xf32>
    %c0_13 = arith.constant 0 : index
    %c0_14 = arith.constant 0 : index
    %17 = vector.load %arg5[%c0_13, %c0_14] : memref<1x128xf32, #tpu.memory_space<vmem>>, vector<1x128xf32>
    %18 = vector.broadcast %17 : vector<1x128xf32> to vector<256x128xf32>
    %19 = arith.addf %16, %18 : vector<256x128xf32>
    %c0_15 = arith.constant 0 : index
    %c0_16 = arith.constant 0 : index
    %20 = vector.load %arg9[%c0_15, %c0_16] : memref<256x128xf32, #tpu.memory_space<vmem>>, vector<256x128xf32>
    tpu.vector_store %arg9[%c0_15, %c0_16], %19 {strides = array<i32>} : memref<256x128xf32, #tpu.memory_space<vmem>>, vector<256x128xf32>,
    %21 = arith.mulf %19, %19 : vector<256x128xf32>
    %cst_17 = arith.constant dense<0.000000e+00> : vector<256xf32>
    %22 = vector.multi_reduction <add>, %21, %cst_17 [1] : vector<256x128xf32> to vector<256xf32>
    %23 = vector.shape_cast %22 : vector<256xf32> to vector<256x1xf32>
    %cst_18 = arith.constant 9.99999996E-13 : f32
    %24 = vector.broadcast %cst_18 : f32 to vector<256x1xf32>
    %25 = arith.addf %23, %24 : vector<256x1xf32>
    %26 = math.rsqrt %25 : vector<256x1xf32>
    %27 = vector.broadcast %26 : vector<256x1xf32> to vector<256x128xf32>
    %28 = arith.mulf %19, %27 : vector<256x128xf32>
    %c0_19 = arith.constant 0 : index
    %c0_20 = arith.constant 0 : index
    %29 = vector.load %arg6[%c0_19, %c0_20] : memref<128x8xf32, #tpu.memory_space<vmem>>, vector<128x8xf32>
    %30 = arith.truncf %28 : vector<256x128xf32> to vector<256x128xbf16>
    %c0_i32 = arith.constant 0 : i32
    %31 = arith.truncf %29 : vector<128x8xf32> to vector<128x8xbf16>
    %cst_21 = arith.constant dense<0.000000e+00> : vector<256x8xf32>
    %32 = tpu.matmul %30, %31, %cst_21 {dimension_numbers = #tpu.dot_dimension_numbers<[1], [0], [0], [1], [0, 0, 1, 1], [], []>} : vector<256x128xbf16>, vector<128x8xbf16>, vector<256x8xf32> -> vector<256x8xf32>
    %cst_22 = arith.constant 5.000000e+00 : f32
    %33 = vector.broadcast %cst_22 : f32 to vector<256x8xf32>
    %34 = arith.mulf %33, %32 : vector<256x8xf32>
    %cst_23 = arith.constant dense<0xFF800000> : vector<256xf32>
    %35 = vector.multi_reduction <maximumf>, %34, %cst_23 [1] : vector<256x8xf32> to vector<256xf32>
    %36 = vector.shape_cast %35 : vector<256xf32> to vector<256x1xf32>
    %37 = vector.broadcast %36 : vector<256x1xf32> to vector<256x8xf32>
    %38 = arith.subf %34, %37 : vector<256x8xf32>
    %39 = math.exp %38 : vector<256x8xf32>
    %cst_24 = arith.constant dense<0.000000e+00> : vector<256xf32>
    %40 = vector.multi_reduction <add>, %39, %cst_24 [1] : vector<256x8xf32> to vector<256xf32>
    %41 = vector.shape_cast %40 : vector<256xf32> to vector<256x1xf32>
    %42 = tpu.reciprocal %41 {approx = true} : vector<256x1xf32> -> vector<256x1xf32>
    %43 = vector.broadcast %42 : vector<256x1xf32> to vector<256x8xf32>
    %44 = arith.mulf %39, %43 : vector<256x8xf32>
    %cst_25 = arith.constant dense<0.000000e+00> : vector<8xf32>
    %45 = vector.multi_reduction <add>, %44, %cst_25 [0] : vector<256x8xf32> to vector<8xf32>
    %46 = vector.shape_cast %45 : vector<8xf32> to vector<1x8xf32>
    %cst_26 = arith.constant 9.99999993E-9 : f32
    %47 = vector.broadcast %cst_26 : f32 to vector<1x8xf32>
    %48 = arith.addf %46, %47 : vector<1x8xf32>
    %49 = arith.truncf %44 : vector<256x8xf32> to vector<256x8xbf16>
    %cst_27 = arith.constant dense<0.000000e+00> : vector<128x8xf32>
    %50 = tpu.matmul %30, %49, %cst_27 {dimension_numbers = #tpu.dot_dimension_numbers<[0], [0], [1], [1], [0, 1, 1, 1], [], []>} : vector<256x128xbf16>, vector<256x8xbf16>, vector<128x8xf32> -> vector<128x8xf32>
    %51 = tpu.reciprocal %48 {approx = true} : vector<1x8xf32> -> vector<1x8xf32>
    %52 = vector.broadcast %51 : vector<1x8xf32> to vector<128x8xf32>
    %53 = arith.mulf %50, %52 : vector<128x8xf32>
    %c1_i32 = arith.constant 1 : i32
    %54 = arith.truncf %53 : vector<128x8xf32> to vector<128x8xbf16>
    %cst_28 = arith.constant dense<0.000000e+00> : vector<256x8xf32>
    %55 = tpu.matmul %30, %54, %cst_28 {dimension_numbers = #tpu.dot_dimension_numbers<[1], [0], [0], [1], [0, 0, 1, 1], [], []>} : vector<256x128xbf16>, vector<128x8xbf16>, vector<256x8xf32> -> vector<256x8xf32>
    %cst_29 = arith.constant 5.000000e+00 : f32
    %56 = vector.broadcast %cst_29 : f32 to vector<256x8xf32>
    %57 = arith.mulf %56, %55 : vector<256x8xf32>
    %cst_30 = arith.constant dense<0xFF800000> : vector<256xf32>
    %58 = vector.multi_reduction <maximumf>, %57, %cst_30 [1] : vector<256x8xf32> to vector<256xf32>
    %59 = vector.shape_cast %58 : vector<256xf32> to vector<256x1xf32>
    %60 = vector.broadcast %59 : vector<256x1xf32> to vector<256x8xf32>
    %61 = arith.subf %57, %60 : vector<256x8xf32>
    %62 = math.exp %61 : vector<256x8xf32>
    %cst_31 = arith.constant dense<0.000000e+00> : vector<256xf32>
    %63 = vector.multi_reduction <add>, %62, %cst_31 [1] : vector<256x8xf32> to vector<256xf32>
    %64 = vector.shape_cast %63 : vector<256xf32> to vector<256x1xf32>
    %65 = tpu.reciprocal %64 {approx = true} : vector<256x1xf32> -> vector<256x1xf32>
    %66 = vector.broadcast %65 : vector<256x1xf32> to vector<256x8xf32>
    %67 = arith.mulf %62, %66 : vector<256x8xf32>
    %cst_32 = arith.constant dense<0.000000e+00> : vector<8xf32>
    %68 = vector.multi_reduction <add>, %67, %cst_32 [0] : vector<256x8xf32> to vector<8xf32>
    %69 = vector.shape_cast %68 : vector<8xf32> to vector<1x8xf32>
    %cst_33 = arith.constant 9.99999993E-9 : f32
    %70 = vector.broadcast %cst_33 : f32 to vector<1x8xf32>
    %71 = arith.addf %69, %70 : vector<1x8xf32>
    %72 = arith.truncf %67 : vector<256x8xf32> to vector<256x8xbf16>
    %cst_34 = arith.constant dense<0.000000e+00> : vector<128x8xf32>
    %73 = tpu.matmul %30, %72, %cst_34 {dimension_numbers = #tpu.dot_dimension_numbers<[0], [0], [1], [1], [0, 1, 1, 1], [], []>} : vector<256x128xbf16>, vector<256x8xbf16>, vector<128x8xf32> -> vector<128x8xf32>
    %74 = tpu.reciprocal %71 {approx = true} : vector<1x8xf32> -> vector<1x8xf32>
    %75 = vector.broadcast %74 : vector<1x8xf32> to vector<128x8xf32>
    %76 = arith.mulf %73, %75 : vector<128x8xf32>
    %77 = arith.truncf %76 : vector<128x8xf32> to vector<128x8xbf16>
    %cst_35 = arith.constant dense<0.000000e+00> : vector<256x8xf32>
    %78 = tpu.matmul %30, %77, %cst_35 {dimension_numbers = #tpu.dot_dimension_numbers<[1], [0], [0], [1], [0, 0, 1, 1], [], []>} : vector<256x128xbf16>, vector<128x8xbf16>, vector<256x8xf32> -> vector<256x8xf32>
    %cst_36 = arith.constant 5.000000e+00 : f32
    %79 = vector.broadcast %cst_36 : f32 to vector<256x8xf32>
    %80 = arith.mulf %79, %78 : vector<256x8xf32>
    %cst_37 = arith.constant dense<0xFF800000> : vector<256xf32>
    %81 = vector.multi_reduction <maximumf>, %80, %cst_37 [1] : vector<256x8xf32> to vector<256xf32>
    %82 = vector.shape_cast %81 : vector<256xf32> to vector<256x1xf32>
    %83 = vector.broadcast %82 : vector<256x1xf32> to vector<256x8xf32>
    %84 = arith.subf %80, %83 : vector<256x8xf32>
    %85 = math.exp %84 : vector<256x8xf32>
    %cst_38 = arith.constant dense<0.000000e+00> : vector<256xf32>
    %86 = vector.multi_reduction <add>, %85, %cst_38 [1] : vector<256x8xf32> to vector<256xf32>
    %87 = vector.shape_cast %86 : vector<256xf32> to vector<256x1xf32>
    %88 = tpu.reciprocal %87 {approx = true} : vector<256x1xf32> -> vector<256x1xf32>
    %89 = vector.broadcast %88 : vector<256x1xf32> to vector<256x8xf32>
    %90 = arith.mulf %85, %89 : vector<256x8xf32>
    %c0_39 = arith.constant 0 : index
    %c0_40 = arith.constant 0 : index
    %91 = vector.load %arg7[%c0_39, %c0_40] : memref<128x8xf32, #tpu.memory_space<vmem>>, vector<128x8xf32>
    tpu.vector_store %arg7[%c0_39, %c0_40], %76 {strides = array<i32>} : memref<128x8xf32, #tpu.memory_space<vmem>>, vector<128x8xf32>,
    %c0_41 = arith.constant 0 : index
    %c0_42 = arith.constant 0 : index
    %92 = vector.load %arg8[%c0_41, %c0_42] : memref<256x8xf32, #tpu.memory_space<vmem>>, vector<256x8xf32>
    tpu.vector_store %arg8[%c0_41, %c0_42], %90 {strides = array<i32>} : memref<256x8xf32, #tpu.memory_space<vmem>>, vector<256x8xf32>,
    %c0_43 = arith.constant 0 : index
    %c0_44 = arith.constant 0 : index
    %93 = vector.load %arg10[%c0_43, %c0_44] : memref<256x8xf32, #tpu.memory_space<vmem>>, vector<256x8xf32>
    tpu.vector_store %arg10[%c0_43, %c0_44], %78 {strides = array<i32>} : memref<256x8xf32, #tpu.memory_space<vmem>>, vector<256x8xf32>,
    return
  }
}

</mosaic_0001>

<bundles_post_ra>
// kernel: tpu_custom_call.1
= control target key start
LH: loop header
LB: loop body
LE: loop exit
PB: predicated region body
PF: predicated region fallthrough
CT: control target
= control target key end

     0   :  { %vm116_vm0 = vcmask 261120   ;;  %s7506_s0 = inlined_call_operand.vmem [shape: f32[256,32], index: 0, kind: input, shape index: {}]   ;;  %s7507_s1 = inlined_call_operand.vmem [shape: s8[256,256], index: 1, kind: input, shape index: {}]   ;;  %s7508_s2 = inlined_call_operand.vmem [shape: f32[32,128], index: 2, kind: input, shape index: {}]   ;;  %s7509_s3 = inlined_call_operand.vmem [shape: f32[1,128], index: 3, kind: input, shape index: {}]   ;;  %s7510_s4 = inlined_call_operand.vmem [shape: f32[128,128], index: 4, kind: input, shape index: {}]   ;;  %s7511_s5 = inlined_call_operand.vmem [shape: f32[1,128], index: 5, kind: input, shape index: {}]   ;;  %s7512_s6 = inlined_call_operand.vmem [shape: f32[128,8], index: 6, kind: input, shape index: {}]   ;;  %s7513_s7 = inlined_call_operand.vmem [shape: f32[128,8], index: 7, kind: output, shape index: {0}]   ;;  %s7514_s8 = inlined_call_operand.vmem [shape: f32[256,8], index: 8, kind: output, shape index: {1}]   ;;  %s7515_s9 = inlined_call_operand.hbm [shape: f32[256,128], index: 9, kind: output, shape index: {2}]   ;;  %s7516_s10 = inlined_call_operand.vmem [shape: f32[256,8], index: 10, kind: output, shape index: {3}]  }
   0x1   :  { %v115_v0 = vld [vmem:[%s7508_s2 + $0x18] sm:$0xff]  ;;  %v114_v1 = vld [vmem:[%s7508_s2 + $0x10] sm:$0xff]  ;;  %v113_v2 = vld [vmem:[%s7508_s2 + $0x8] sm:$0xff] }
   0x2   :  { %4077 = vmatprep.subr.mxu0 %v115_v0  ;;  %4357 = vmatprep.subr.mxu1 %v115_v0  ;;  %v112_v3 = vld [vmem:[%s7508_s2] sm:$0xff]  ;;  %v81_v6 = vld [vmem:[%s7506_s0 + $0x8] sm:$0xff]  ;;  %v82_v8 = vld [vmem:[%s7506_s0 + $0x10] sm:$0xff] }
   0x3   :  { %4078 = vmatpush3.msra.mxu0 %v115_v0  ;;  %4361 = vmatpush3.msra.mxu1 %v115_v0  ;;  %v80_v4 = vld [vmem:[%s7506_s0] sm:$0xff]  ;;  %v97_v7 = vld [vmem:[%s7506_s0 + $0x88] sm:$0xff]  ;;  %v98_v9 = vld [vmem:[%s7506_s0 + $0x90] sm:$0xff] }
   0x4   :  { %4079 = vmatprep.subr.mxu0 %v114_v1  ;;  %4358 = vmatprep.subr.mxu1 %v114_v1  ;;  %v96_v5 = vld [vmem:[%s7506_s0 + $0x80] sm:$0xff]  ;;  %v83_v10 = vld [vmem:[%s7506_s0 + $0x18] sm:$0xff] }
   0x5   :  { %4080 = vmatpush3.msra.mxu0 %v114_v1  ;;  %4362 = vmatpush3.msra.mxu1 %v114_v1  ;;  %v99_v11 = vld [vmem:[%s7506_s0 + $0x98] sm:$0xff]  ;;  %v84_v12 = vld [vmem:[%s7506_s0 + $0x20] sm:$0xff] }
   0x6   :  { %4081 = vmatprep.subr.mxu0 %v113_v2  ;;  %4359 = vmatprep.subr.mxu1 %v113_v2  ;;  %v100_v13 = vld [vmem:[%s7506_s0 + $0xa0] sm:$0xff] }
   0x7   :  { %4082 = vmatpush3.msra.mxu0 %v113_v2  ;;  %4363 = vmatpush3.msra.mxu1 %v113_v2 }
   0x8   :  { %4083 = vmatprep.subr.mxu0 %v112_v3  ;;  %4360 = vmatprep.subr.mxu1 %v112_v3 }
   0x9   :  { %4084 = vmatpush3.msra.mxu0 %v112_v3  ;;  %4364 = vmatpush3.msra.mxu1 %v112_v3 }
   0xa   :  { %4085 = vmatprep.mubr.msk.f32.mxu0 %vm116_vm0, %v80_v4  ;;  %4109 = vmatprep.mubr.msk.f32.mxu1 %vm116_vm0, %v96_v5 }
   0xb   :  { %4086 = vmatmul.mubr.msk.f32.vlgmr.msra.gmra.mxu0 %vm116_vm0, %v81_v6  ;;  %4110 = vmatmul.mubr.msk.f32.vlgmr.msra.gmra.mxu1 %vm116_vm0, %v97_v7 }
   0xc   :  { %4088 = vmatprep.mubr.msk.f32.mxu0 %vm116_vm0, %v82_v8  ;;  %4112 = vmatprep.mubr.msk.f32.mxu1 %vm116_vm0, %v98_v9 }
   0xd   :  { %16 = vsyncpa [#allocation3], 0  ;;  %v85_v14 = vld [vmem:[%s7506_s0 + $0x28] sm:$0xff]  ;;  %v86_v16 = vld [vmem:[%s7506_s0 + $0x30] sm:$0xff]  ;;  %vm1536_vm1 = vcmask 64512  }
   0xe   :  { %v101_v15 = vld [vmem:[%s7506_s0 + $0xa8] sm:$0xff]  ;;  %v102_v17 = vld [vmem:[%s7506_s0 + $0xb0] sm:$0xff]  ;;  %v87_v18 = vld [vmem:[%s7506_s0 + $0x38] sm:$0xff] }
   0xf   :  { %4089 = vmatmul.mubr.msk.f32.gmra.mxu0 %vm116_vm0, %v83_v10  ;;  %4113 = vmatmul.mubr.msk.f32.gmra.mxu1 %vm116_vm0, %v99_v11  ;;  %v103_v19 = vld [vmem:[%s7506_s0 + $0xb8] sm:$0xff]  ;;  %v88_v20 = vld [vmem:[%s7506_s0 + $0x40] sm:$0xff]  ;;  %v89_v22 = vld [vmem:[%s7506_s0 + $0x48] sm:$0xff] }
  0x10   :  { %4091 = vmatprep.mubr.msk.f32.mxu0 %vm116_vm0, %v84_v12  ;;  %4115 = vmatprep.mubr.msk.f32.mxu1 %vm116_vm0, %v100_v13  ;;  %v104_v21 = vld [vmem:[%s7506_s0 + $0xc0] sm:$0xff]  ;;  %v105_v23 = vld [vmem:[%s7506_s0 + $0xc8] sm:$0xff]  ;;  %v90_v24 = vld [vmem:[%s7506_s0 + $0x50] sm:$0xff] }
  0x11   :  { %v106_v25 = vld [vmem:[%s7506_s0 + $0xd0] sm:$0xff]  ;;  %v91_v26 = vld [vmem:[%s7506_s0 + $0x58] sm:$0xff]  ;;  %v92_v28 = vld [vmem:[%s7506_s0 + $0x60] sm:$0xff] }
  0x12   :  { %v107_v27 = vld [vmem:[%s7506_s0 + $0xd8] sm:$0xff]  ;;  %v108_v29 = vld [vmem:[%s7506_s0 + $0xe0] sm:$0xff]  ;;  %v93_v30 = vld [vmem:[%s7506_s0 + $0x68] sm:$0xff] }
  0x13   :  { %4092 = vmatmul.mubr.msk.f32.gmra.mxu0 %vm116_vm0, %v85_v14  ;;  %4116 = vmatmul.mubr.msk.f32.gmra.mxu1 %vm116_vm0, %v101_v15  ;;  %v109_v31 = vld [vmem:[%s7506_s0 + $0xe8] sm:$0xff]  ;;  %v94_v32 = vld [vmem:[%s7506_s0 + $0x70] sm:$0xff]  ;;  %v95_v34 = vld [vmem:[%s7506_s0 + $0x78] sm:$0xff] }
  0x14   :  { %4094 = vmatprep.mubr.msk.f32.mxu0 %vm116_vm0, %v86_v16  ;;  %4118 = vmatprep.mubr.msk.f32.mxu1 %vm116_vm0, %v102_v17  ;;  %v110_v33 = vld [vmem:[%s7506_s0 + $0xf0] sm:$0xff]  ;;  %v111_v35 = vld [vmem:[%s7506_s0 + $0xf8] sm:$0xff]  ;;  %v5043_v36 = vld [vmem:[%s7507_s1 + $0x8] sm:$0xff] }
  0x15   :  { %v49_v37 = vunpack.c.l.s8.bf16 %v5043_v36 }
  0x17   :  { %4095 = vmatmul.mubr.msk.f32.gmra.mxu0 %vm116_vm0, %v87_v18  ;;  %4119 = vmatmul.mubr.msk.f32.gmra.mxu1 %vm116_vm0, %v103_v19 }
  0x18   :  { %4097 = vmatprep.mubr.msk.f32.mxu0 %vm116_vm0, %v88_v20  ;;  %4121 = vmatprep.mubr.msk.f32.mxu1 %vm116_vm0, %v104_v21  ;;  %v669_v21 = vld [vmem:[%s7510_s4 + $0x78] sm:$0xff] }
  0x19   :  { %4133 = vmatprep.subr.mxu0 %v669_v21 }
  0x1a   :  { %4134 = vmatpush3.msra.mxu0 %v669_v21 }
  0x1b   :  { %4098 = vmatmul.mubr.msk.f32.gmra.mxu0 %vm116_vm0, %v89_v22  ;;  %4122 = vmatmul.mubr.msk.f32.gmra.mxu1 %vm116_vm0, %v105_v23  ;;  %v668_v22 = vld [vmem:[%s7510_s4 + $0x70] sm:$0xff]  ;;  %v5064_v23 = vld [vmem:[%s7507_s1] sm:$0xff] }
  0x1c   :  { %4100 = vmatprep.mubr.msk.f32.mxu0 %vm116_vm0, %v90_v24  ;;  %4124 = vmatprep.mubr.msk.f32.mxu1 %vm116_vm0, %v106_v25  ;;  %v667_v24 = vld [vmem:[%s7510_s4 + $0x68] sm:$0xff] }
  0x1d   :  { %4135 = vmatprep.subr.mxu0 %v668_v22 }
  0x1e   :  { %4136 = vmatpush3.msra.mxu0 %v668_v22 }
  0x1f   :  { %4101 = vmatmul.mubr.msk.f32.gmra.mxu0 %vm116_vm0, %v91_v26  ;;  %4125 = vmatmul.mubr.msk.f32.gmra.mxu1 %vm116_vm0, %v107_v27  ;;  %v48_v26 = vunpack.c.l.s8.bf16 %v5064_v23  ;;  %v666_v27 = vld [vmem:[%s7510_s4 + $0x60] sm:$0xff] }
  0x20   :  { %4103 = vmatprep.mubr.msk.f32.mxu0 %vm116_vm0, %v92_v28  ;;  %4127 = vmatprep.mubr.msk.f32.mxu1 %vm116_vm0, %v108_v29  ;;  %v51_v28 = vunpack.c.h.s8.bf16 %v5043_v36  ;;  %v665_v29 = vld [vmem:[%s7510_s4 + $0x58] sm:$0xff] }
  0x21   :  { %4137 = vmatprep.subr.mxu0 %v667_v24 }
  0x22   :  { %4138 = vmatpush3.msra.mxu0 %v667_v24  ;;  %v5276_v24 = vld [vmem:[%s7509_s3] ss:$0 sm:$0xff] }
  0x23   :  { %4104 = vmatmul.mubr.msk.f32.gmra.mxu0 %vm116_vm0, %v93_v30  ;;  %4128 = vmatmul.mubr.msk.f32.gmra.mxu1 %vm116_vm0, %v109_v31  ;;  %v664_v30 = vld [vmem:[%s7510_s4 + $0x50] sm:$0xff]  ;;  %v5089_v31 = vld [vmem:[%s7507_s1 + $0x18] sm:$0xff] }
  0x24   :  { %4106 = vmatprep.mubr.msk.f32.mxu0 %vm116_vm0, %v94_v32  ;;  %4130 = vmatprep.mubr.msk.f32.mxu1 %vm116_vm0, %v110_v33  ;;  %v663_v32 = vld [vmem:[%s7510_s4 + $0x48] sm:$0xff]  ;;  %v50_v33 = vunpack.c.h.s8.bf16 %v5064_v23 }
  0x25   :  { %4139 = vmatprep.subr.mxu0 %v666_v27 }
  0x26   :  { %4140 = vmatpush3.msra.mxu0 %v666_v27 }
  0x27   :  { %4107 = vmatmul.mubr.msk.f32.gmra.mxu0 %vm116_vm0, %v95_v34  ;;  %4131 = vmatmul.mubr.msk.f32.gmra.mxu1 %vm116_vm0, %v111_v35  ;;  %v662_v34 = vld [vmem:[%s7510_s4 + $0x40] sm:$0xff]  ;;  %v53_v35 = vunpack.c.l.s8.bf16 %v5089_v31 }
  0x28   :  { %493 = vmatprep.mubr.bf16.mxu1 %v49_v37  ;;  %4141 = vmatprep.subr.mxu0 %v665_v29 }
  0x29   :  { %4142 = vmatpush3.msra.mxu0 %v665_v29 }
  0x2a   :  { %4143 = vmatprep.subr.mxu0 %v664_v30 }
  0x2b   :  { %4144 = vmatpush3.msra.mxu0 %v664_v30 }
  0x2c   :  { %4145 = vmatprep.subr.mxu0 %v663_v32 }
  0x2d   :  { %4146 = vmatpush3.msra.mxu0 %v663_v32 }
  0x2e   :  { %4147 = vmatprep.subr.mxu0 %v662_v34 }
  0x2f   :  { %4148 = vmatpush3.msra.mxu0 %v662_v34 }
  0xcb   :  { %v5048_v38 = vpop.f32.mrf.mxu0  ;;  %v5050_v39 = vpop.f32.mrf.mxu1 }
  0xcd   :  { %v5052_v40 = vpop.f32.mrf.mxu0  ;;  %v359_v41 = vpop.f32.mrf.mxu1 }
  0xce   :  { %v446_v20 = vpack.c.bf16 %v5050_v39, %v359_v41  ;;  %v438_v25 = vpack.c.bf16 %v5048_v38, %v5052_v40  ;;  %v661_v38 = vld [vmem:[%s7510_s4 + $0x38] sm:$0xff]  ;;  %v660_v39 = vld [vmem:[%s7510_s4 + $0x30] sm:$0xff] }
  0xcf   :  { %v4090_v42 = vpop.f32.mrf.mxu0  ;;  %v4114_v43 = vpop.f32.mrf.mxu1  ;;  %v5112_v40 = vld [vmem:[%s7507_s1 + $0x10] sm:$0xff]  ;;  %4149 = vmatprep.subr.mxu0 %v661_v38 }
  0xd0   :  { %4150 = vmatpush3.msra.mxu0 %v661_v38  ;;  %v52_v41 = vunpack.c.l.s8.bf16 %v5112_v40 }
  0xd1   :  { %v289_v44 = vpop.f32.mrf.mxu0  ;;  %v369_v45 = vpop.f32.mrf.mxu1  ;;  %4151 = vmatprep.subr.mxu0 %v660_v39 }
  0xd2   :  { %v447_v18 = vpack.c.bf16 %v4114_v43, %v369_v45  ;;  %v439_v19 = vpack.c.bf16 %v4090_v42, %v289_v44  ;;  %4152 = vmatpush3.msra.mxu0 %v660_v39  ;;  %v55_v42 = vunpack.c.h.s8.bf16 %v5089_v31  ;;  %v5123_v43 = vld [vmem:[%s7507_s1 + $0x28] sm:$0xff]  ;;  %v54_v44 = vunpack.c.h.s8.bf16 %v5112_v40 }
  0xd3   :  { %v4093_v46 = vpop.f32.mrf.mxu0  ;;  %v4117_v47 = vpop.f32.mrf.mxu1  ;;  %v7540_v45 = vunpack.c.l.s8.bf16 %v5123_v43  ;;  %v7590_v23 = vunpack.c.h.s8.bf16 %v5123_v43 }
  0xd5   :  { %v299_v48 = vpop.f32.mrf.mxu0  ;;  %v379_v49 = vpop.f32.mrf.mxu1 }
  0xd6   :  { %v448_v16 = vpack.c.bf16 %v4117_v47, %v379_v49  ;;  %v440_v17 = vpack.c.bf16 %v4093_v46, %v299_v48  ;;  %v5134_v46 = vld [vmem:[%s7507_s1 + $0x20] sm:$0xff]  ;;  %v7538_v48 = vunpack.c.h.s8.bf16 %v5123_v43  ;;  %v5145_v49 = vld [vmem:[%s7507_s1 + $0x38] sm:$0xff] }
  0xd7   :  { %v4096_v50 = vpop.f32.mrf.mxu0  ;;  %v4120_v51 = vpop.f32.mrf.mxu1  ;;  %v7539_v47 = vunpack.c.l.s8.bf16 %v5134_v46  ;;  %v7589_v36 = vunpack.c.l.s8.bf16 %v5134_v46 }
  0xd9   :  { %v309_v52 = vpop.f32.mrf.mxu0  ;;  %v389_v53 = vpop.f32.mrf.mxu1 }
  0xda   :  { %v449_v14 = vpack.c.bf16 %v4120_v51, %v389_v53  ;;  %v441_v15 = vpack.c.bf16 %v4096_v50, %v309_v52  ;;  %v7537_v50 = vunpack.c.h.s8.bf16 %v5134_v46  ;;  %v7536_v51 = vunpack.c.l.s8.bf16 %v5145_v49  ;;  %v5156_v52 = vld [vmem:[%s7507_s1 + $0x30] sm:$0xff] }
  0xdb   :  { %v4099_v54 = vpop.f32.mrf.mxu0  ;;  %v4123_v55 = vpop.f32.mrf.mxu1  ;;  %v7535_v53 = vunpack.c.l.s8.bf16 %v5156_v52  ;;  %v7593_v31 = vunpack.c.l.s8.bf16 %v5156_v52  ;;  %v7595_v40 = vunpack.c.h.s8.bf16 %v5156_v52 }
  0xdd   :  { %v319_v56 = vpop.f32.mrf.mxu0  ;;  %v399_v57 = vpop.f32.mrf.mxu1 }
  0xde   :  { %v450_v12 = vpack.c.bf16 %v4123_v55, %v399_v57  ;;  %v442_v13 = vpack.c.bf16 %v4099_v54, %v319_v56  ;;  %v7534_v54 = vunpack.c.h.s8.bf16 %v5145_v49  ;;  %v5167_v55 = vld [vmem:[%s7507_s1 + $0x48] sm:$0xff]  ;;  %v7533_v56 = vunpack.c.h.s8.bf16 %v5156_v52 }
  0xdf   :  { %v4102_v58 = vpop.f32.mrf.mxu0  ;;  %v4126_v59 = vpop.f32.mrf.mxu1  ;;  %v7532_v57 = vunpack.c.l.s8.bf16 %v5167_v55 }
  0xe1   :  { %v329_v60 = vpop.f32.mrf.mxu0  ;;  %v409_v61 = vpop.f32.mrf.mxu1 }
  0xe2   :  { %v451_v10 = vpack.c.bf16 %v4126_v59, %v409_v61  ;;  %v443_v11 = vpack.c.bf16 %v4102_v58, %v329_v60  ;;  %v5178_v58 = vld [vmem:[%s7507_s1 + $0x40] sm:$0xff]  ;;  %v7530_v60 = vunpack.c.h.s8.bf16 %v5167_v55  ;;  %v659_v61 = vld [vmem:[%s7510_s4 + $0x28] sm:$0xff] }
  0xe3   :  { %v4105_v62 = vpop.f32.mrf.mxu0  ;;  %v4129_v63 = vpop.f32.mrf.mxu1  ;;  %v7531_v59 = vunpack.c.l.s8.bf16 %v5178_v58  ;;  %4153 = vmatprep.subr.mxu0 %v659_v61 }
  0xe4   :  { %4154 = vmatpush3.msra.mxu0 %v659_v61 }
  0xe5   :  { %v339_v0 = vpop.f32.mrf.mxu0  ;;  %v419_v1 = vpop.f32.mrf.mxu1 }
  0xe6   :  { %v452_v8 = vpack.c.bf16 %v4129_v63, %v419_v1  ;;  %v444_v9 = vpack.c.bf16 %v4105_v62, %v339_v0  ;;  %v5192_v62 = vld [vmem:[%s7507_s1 + $0x58] sm:$0xff]  ;;  %v658_v63 = vld [vmem:[%s7510_s4 + $0x20] sm:$0xff]  ;;  %v7529_v0 = vunpack.c.h.s8.bf16 %v5178_v58 }
  0xe7   :  { %v4108_v2 = vpop.f32.mrf.mxu0  ;;  %v4132_v3 = vpop.f32.mrf.mxu1  ;;  %4155 = vmatprep.subr.mxu0 %v658_v63  ;;  %v657_v1 = vld [vmem:[%s7510_s4 + $0x18] sm:$0xff] }
  0xe8   :  { %4156 = vmatpush3.msra.mxu0 %v658_v63 }
  0xe9   :  { %v349_v4 = vpop.f32.mrf.mxu0  ;;  %v429_v5 = vpop.f32.mrf.mxu1  ;;  %4157 = vmatprep.subr.mxu0 %v657_v1 }
  0xea   :  { %v445_v6 = vpack.c.bf16 %v4108_v2, %v349_v4  ;;  %v453_v7 = vpack.c.bf16 %v4132_v3, %v429_v5  ;;  %v7528_v2 = vunpack.c.l.s8.bf16 %v5192_v62  ;;  %4158 = vmatpush3.msra.mxu0 %v657_v1  ;;  %v656_v3 = vld [vmem:[%s7510_s4 + $0x10] sm:$0xff]  ;;  %v655_v4 = vld [vmem:[%s7510_s4 + $0x8] sm:$0xff] }
  0xeb   :  { %4159 = vmatprep.subr.mxu0 %v656_v3  ;;  %v5215_v5 = vld [vmem:[%s7507_s1 + $0x50] sm:$0xff] }
  0xec   :  { %3605 = vmatprep.subr.bf16.mxu1 %v453_v7  ;;  %4160 = vmatpush3.msra.mxu0 %v656_v3  ;;  %v7527_v7 = vunpack.c.l.s8.bf16 %v5215_v5 }
  0xed   :  { %3606 = vmatpush3.bf16.msra.mxu1 %v445_v6  ;;  %4161 = vmatprep.subr.mxu0 %v655_v4  ;;  %v654_v6 = vld [vmem:[%s7510_s4] sm:$0xff] }
  0xee   :  { %3607 = vmatprep.subr.bf16.mxu1 %v452_v8  ;;  %4162 = vmatpush3.msra.mxu0 %v655_v4  ;;  %v7526_v8 = vunpack.c.h.s8.bf16 %v5192_v62 }
  0xef   :  { %4163 = vmatprep.subr.mxu0 %v654_v6 }
  0xf0   :  { %4164 = vmatpush3.msra.mxu0 %v654_v6 }
  0xf1   :  { %3608 = vmatpush3.bf16.msra.mxu1 %v444_v9  ;;  %v5229_v9 = vld [vmem:[%s7507_s1 + $0x68] sm:$0xff] }
  0xf2   :  { %3609 = vmatprep.subr.bf16.mxu1 %v451_v10  ;;  %v7525_v10 = vunpack.c.h.s8.bf16 %v5215_v5 }
  0xf5   :  { %3610 = vmatpush3.bf16.msra.mxu1 %v443_v11  ;;  %v7524_v11 = vunpack.c.l.s8.bf16 %v5229_v9 }
  0xf6   :  { %3611 = vmatprep.subr.bf16.mxu1 %v450_v12  ;;  %v5240_v12 = vld [vmem:[%s7507_s1 + $0x60] sm:$0xff] }
  0xf7   :  { %v7607_v52 = vunpack.c.h.s8.bf16 %v5240_v12 }
  0xf9   :  { %3612 = vmatpush3.bf16.msra.mxu1 %v442_v13  ;;  %v7523_v13 = vunpack.c.l.s8.bf16 %v5240_v12 }
  0xfa   :  { %3613 = vmatprep.subr.bf16.mxu1 %v449_v14  ;;  %v7522_v14 = vunpack.c.h.s8.bf16 %v5229_v9 }
  0xfd   :  { %3614 = vmatpush3.bf16.msra.mxu1 %v441_v15  ;;  %v5251_v15 = vld [vmem:[%s7507_s1 + $0x78] sm:$0xff] }
  0xfe   :  { %3615 = vmatprep.subr.bf16.mxu1 %v448_v16  ;;  %v7521_v16 = vunpack.c.h.s8.bf16 %v5240_v12 }
 0x101   :  { %3616 = vmatpush3.bf16.msra.mxu1 %v440_v17  ;;  %v7520_v17 = vunpack.c.l.s8.bf16 %v5251_v15 }
 0x102   :  { %3617 = vmatprep.subr.bf16.mxu1 %v447_v18  ;;  %v5262_v18 = vld [vmem:[%s7507_s1 + $0x70] sm:$0xff] }
 0x103   :  { %v7517_v21 = vunpack.c.h.s8.bf16 %v5262_v18 }
 0x105   :  { %3618 = vmatpush3.bf16.msra.mxu1 %v439_v19  ;;  %v7519_v19 = vunpack.c.l.s8.bf16 %v5262_v18 }
 0x106   :  { %3619 = vmatprep.subr.bf16.mxu1 %v446_v20  ;;  %v7518_v20 = vunpack.c.h.s8.bf16 %v5251_v15 }
 0x109   :  { %3620 = vmatpush3.bf16.msra.mxu1 %v438_v25 }
 0x10c   :  { %494 = vmatmul.mubr.bf16.vlgmr.msra.gmra.mxu1 %v48_v26 }
 0x10d   :  { %501 = vmatprep.mubr.bf16.mxu1 %v51_v28 }
 0x114   :  { %502 = vmatmul.mubr.bf16.gmra.mxu1 %v50_v33 }
 0x115   :  { %509 = vmatprep.mubr.bf16.mxu1 %v53_v35 }
 0x11c   :  { %510 = vmatmul.mubr.bf16.gmra.mxu1 %v52_v41 }
 0x11d   :  { %517 = vmatprep.mubr.bf16.mxu1 %v55_v42 }
 0x124   :  { %518 = vmatmul.mubr.bf16.gmra.mxu1 %v54_v44 }
 0x125   :  { %525 = vmatprep.mubr.bf16.mxu1 %v7540_v45 }
 0x12c   :  { %526 = vmatmul.mubr.bf16.gmra.mxu1 %v7539_v47 }
 0x12d   :  { %533 = vmatprep.mubr.bf16.mxu1 %v7538_v48 }
 0x134   :  { %534 = vmatmul.mubr.bf16.gmra.mxu1 %v7537_v50 }
 0x135   :  { %541 = vmatprep.mubr.bf16.mxu1 %v7536_v51 }
 0x13c   :  { %542 = vmatmul.mubr.bf16.gmra.mxu1 %v7535_v53 }
 0x13d   :  { %549 = vmatprep.mubr.bf16.mxu1 %v7534_v54 }
 0x144   :  { %550 = vmatmul.mubr.bf16.gmra.mxu1 %v7533_v56 }
 0x145   :  { %557 = vmatprep.mubr.bf16.mxu1 %v7532_v57 }
 0x14c   :  { %558 = vmatmul.mubr.bf16.gmra.mxu1 %v7531_v59 }
 0x14d   :  { %565 = vmatprep.mubr.bf16.mxu1 %v7530_v60 }
 0x154   :  { %566 = vmatmul.mubr.bf16.gmra.mxu1 %v7529_v0 }
 0x155   :  { %573 = vmatprep.mubr.bf16.mxu1 %v7528_v2 }
 0x15c   :  { %574 = vmatmul.mubr.bf16.gmra.mxu1 %v7527_v7 }
 0x15d   :  { %581 = vmatprep.mubr.bf16.mxu1 %v7526_v8 }
 0x164   :  { %582 = vmatmul.mubr.bf16.gmra.mxu1 %v7525_v10 }
 0x165   :  { %589 = vmatprep.mubr.bf16.mxu1 %v7524_v11 }
 0x16c   :  { %590 = vmatmul.mubr.bf16.gmra.mxu1 %v7523_v13 }
 0x16d   :  { %597 = vmatprep.mubr.bf16.mxu1 %v7522_v14 }
 0x174   :  { %598 = vmatmul.mubr.bf16.gmra.mxu1 %v7521_v16 }
 0x175   :  { %605 = vmatprep.mubr.bf16.mxu1 %v7520_v17 }
 0x17c   :  { %606 = vmatmul.mubr.bf16.gmra.mxu1 %v7519_v19 }
 0x17d   :  { %613 = vmatprep.mubr.bf16.mxu1 %v7518_v20 }
 0x184   :  { %614 = vmatmul.mubr.bf16.gmra.mxu1 %v7517_v21 }
 0x1cc   :  { %v3621_v22 = vpop.f32.mrf.mxu1 }
 0x1ce   :  { %v3622_v25 = vpop.f32.mrf.mxu1 }
 0x1cf   :  { %v3623_v27 = vadd.f32 %v3622_v25, %v3621_v22 }
 0x1d0   :  { %v3624_v29 = vpop.f32.mrf.mxu1 }
 0x1d1   :  { %v496_v30 = vadd.f32 %v3623_v27, %v5276_v24 }
 0x1d2   :  { %v3625_v32 = vpop.f32.mrf.mxu1 }
 0x1d3   :  { %v622_v34 = vmax.f32 %v496_v30, 0.0  ;;  %v3626_v38 = vadd.f32 %v3625_v32, %v3624_v29 }
 0x1d4   :  { %v3627_v39 = vpop.f32.mrf.mxu1 }
 0x1d5   :  { %v499_v61 = vadd.f32 %v3626_v38, %v5276_v24  ;;  %4165 = vmatprep.mubr.f32.mxu0 %v622_v34 }
 0x1d6   :  { %v3628_v63 = vpop.f32.mrf.mxu1 }
 0x1d7   :  { %v623_v1 = vmax.f32 %v499_v61, 0.0  ;;  %v3629_v3 = vadd.f32 %v3628_v63, %v3627_v39 }
 0x1d8   :  { %v3630_v4 = vpop.f32.mrf.mxu1 }
 0x1d9   :  { %v504_v6 = vadd.f32 %v3629_v3, %v5276_v24  ;;  %4166 = vmatmul.mubr.f32.vlgmr.msra.gmra.mxu0 %v623_v1 }
 0x1da   :  { %v3631_v21 = vpop.f32.mrf.mxu1 }
 0x1db   :  { %v624_v20 = vmax.f32 %v504_v6, 0.0  ;;  %v3632_v22 = vadd.f32 %v3631_v21, %v3630_v4 }
 0x1dc   :  { %v3633_v25 = vpop.f32.mrf.mxu1 }
 0x1dd   :  { %v507_v27 = vadd.f32 %v3632_v22, %v5276_v24  ;;  %4168 = vmatprep.mubr.f32.mxu0 %v624_v20 }
 0x1de   :  { %v3634_v30 = vpop.f32.mrf.mxu1 }
 0x1df   :  { %v3635_v29 = vadd.f32 %v3634_v30, %v3633_v25  ;;  %v625_v32 = vmax.f32 %v507_v27, 0.0 }
 0x1e0   :  { %v3636_v19 = vpop.f32.mrf.mxu1 }
 0x1e1   :  { %v512_v34 = vadd.f32 %v3635_v29, %v5276_v24  ;;  %4169 = vmatmul.mubr.f32.gmra.mxu0 %v625_v32 }
 0x1e2   :  { %v3637_v38 = vpop.f32.mrf.mxu1 }
 0x1e3   :  { %v626_v39 = vmax.f32 %v512_v34, 0.0  ;;  %v3638_v61 = vadd.f32 %v3637_v38, %v3636_v19 }
 0x1e4   :  { %v3639_v63 = vpop.f32.mrf.mxu1 }
 0x1e5   :  { %v515_v1 = vadd.f32 %v3638_v61, %v5276_v24  ;;  %4171 = vmatprep.mubr.f32.mxu0 %v626_v39 }
 0x1e6   :  { %v3640_v3 = vpop.f32.mrf.mxu1 }
 0x1e7   :  { %v3641_v21 = vadd.f32 %v3640_v3, %v3639_v63  ;;  %v627_v4 = vmax.f32 %v515_v1, 0.0 }
 0x1e8   :  { %v3642_v6 = vpop.f32.mrf.mxu1 }
 0x1e9   :  { %v520_v20 = vadd.f32 %v3641_v21, %v5276_v24  ;;  %4172 = vmatmul.mubr.f32.gmra.mxu0 %v627_v4 }
 0x1ea   :  { %v3643_v22 = vpop.f32.mrf.mxu1 }
 0x1eb   :  { %v628_v25 = vmax.f32 %v520_v20, 0.0  ;;  %v3644_v27 = vadd.f32 %v3643_v22, %v3642_v6 }
 0x1ec   :  { %v3645_v30 = vpop.f32.mrf.mxu1 }
 0x1ed   :  { %v523_v29 = vadd.f32 %v3644_v27, %v5276_v24  ;;  %4174 = vmatprep.mubr.f32.mxu0 %v628_v25 }
 0x1ee   :  { %v3646_v32 = vpop.f32.mrf.mxu1 }
 0x1ef   :  { %v3647_v19 = vadd.f32 %v3646_v32, %v3645_v30  ;;  %v629_v34 = vmax.f32 %v523_v29, 0.0 }
 0x1f0   :  { %v3648_v38 = vpop.f32.mrf.mxu1 }
 0x1f1   :  { %v528_v39 = vadd.f32 %v3647_v19, %v5276_v24  ;;  %4175 = vmatmul.mubr.f32.gmra.mxu0 %v629_v34 }
 0x1f2   :  { %v3649_v61 = vpop.f32.mrf.mxu1 }
 0x1f3   :  { %v630_v63 = vmax.f32 %v528_v39, 0.0  ;;  %v3650_v1 = vadd.f32 %v3649_v61, %v3648_v38 }
 0x1f4   :  { %v3651_v3 = vpop.f32.mrf.mxu1 }
 0x1f5   :  { %v531_v21 = vadd.f32 %v3650_v1, %v5276_v24  ;;  %4177 = vmatprep.mubr.f32.mxu0 %v630_v63 }
 0x1f6   :  { %v3652_v4 = vpop.f32.mrf.mxu1 }
 0x1f7   :  { %v3653_v6 = vadd.f32 %v3652_v4, %v3651_v3  ;;  %v631_v20 = vmax.f32 %v531_v21, 0.0 }
 0x1f8   :  { %v3654_v22 = vpop.f32.mrf.mxu1 }
 0x1f9   :  { %v536_v25 = vadd.f32 %v3653_v6, %v5276_v24  ;;  %4178 = vmatmul.mubr.f32.gmra.mxu0 %v631_v20 }
 0x1fa   :  { %v3655_v27 = vpop.f32.mrf.mxu1 }
 0x1fb   :  { %v632_v30 = vmax.f32 %v536_v25, 0.0  ;;  %v3656_v29 = vadd.f32 %v3655_v27, %v3654_v22 }
 0x1fc   :  { %v3657_v32 = vpop.f32.mrf.mxu1 }
 0x1fd   :  { %v539_v19 = vadd.f32 %v3656_v29, %v5276_v24  ;;  %4180 = vmatprep.mubr.f32.mxu0 %v632_v30 }
 0x1fe   :  { %v3658_v34 = vpop.f32.mrf.mxu1 }
 0x1ff   :  { %v3659_v38 = vadd.f32 %v3658_v34, %v3657_v32  ;;  %v633_v39 = vmax.f32 %v539_v19, 0.0 }
 0x200   :  { %v3660_v61 = vpop.f32.mrf.mxu1 }
 0x201   :  { %v544_v63 = vadd.f32 %v3659_v38, %v5276_v24  ;;  %4181 = vmatmul.mubr.f32.gmra.mxu0 %v633_v39 }
 0x202   :  { %v3661_v1 = vpop.f32.mrf.mxu1 }
 0x203   :  { %v634_v3 = vmax.f32 %v544_v63, 0.0  ;;  %v3662_v21 = vadd.f32 %v3661_v1, %v3660_v61 }
 0x204   :  { %v3663_v4 = vpop.f32.mrf.mxu1 }
 0x205   :  { %v547_v6 = vadd.f32 %v3662_v21, %v5276_v24  ;;  %4183 = vmatprep.mubr.f32.mxu0 %v634_v3 }
 0x206   :  { %v3664_v20 = vpop.f32.mrf.mxu1 }
 0x207   :  { %v3665_v22 = vadd.f32 %v3664_v20, %v3663_v4  ;;  %v635_v25 = vmax.f32 %v547_v6, 0.0 }
 0x208   :  { %v3666_v27 = vpop.f32.mrf.mxu1 }
 0x209   :  { %v552_v30 = vadd.f32 %v3665_v22, %v5276_v24  ;;  %4184 = vmatmul.mubr.f32.gmra.mxu0 %v635_v25 }
 0x20a   :  { %v3667_v29 = vpop.f32.mrf.mxu1 }
 0x20b   :  { %v636_v32 = vmax.f32 %v552_v30, 0.0  ;;  %v3668_v19 = vadd.f32 %v3667_v29, %v3666_v27 }
 0x20c   :  { %v3669_v34 = vpop.f32.mrf.mxu1 }
 0x20d   :  { %v555_v38 = vadd.f32 %v3668_v19, %v5276_v24  ;;  %4186 = vmatprep.mubr.f32.mxu0 %v636_v32 }
 0x20e   :  { %v3670_v39 = vpop.f32.mrf.mxu1 }
 0x20f   :  { %v3671_v61 = vadd.f32 %v3670_v39, %v3669_v34  ;;  %v637_v63 = vmax.f32 %v555_v38, 0.0 }
 0x210   :  { %v3672_v1 = vpop.f32.mrf.mxu1 }
 0x211   :  { %v560_v3 = vadd.f32 %v3671_v61, %v5276_v24  ;;  %4187 = vmatmul.mubr.f32.gmra.mxu0 %v637_v63 }
 0x212   :  { %v3673_v21 = vpop.f32.mrf.mxu1 }
 0x213   :  { %v638_v4 = vmax.f32 %v560_v3, 0.0  ;;  %v3674_v6 = vadd.f32 %v3673_v21, %v3672_v1 }
 0x214   :  { %v3675_v20 = vpop.f32.mrf.mxu1 }
 0x215   :  { %v563_v22 = vadd.f32 %v3674_v6, %v5276_v24  ;;  %4189 = vmatprep.mubr.f32.mxu0 %v638_v4 }
 0x216   :  { %v3676_v25 = vpop.f32.mrf.mxu1 }
 0x217   :  { %v3677_v27 = vadd.f32 %v3676_v25, %v3675_v20  ;;  %v639_v30 = vmax.f32 %v563_v22, 0.0 }
 0x218   :  { %v3678_v29 = vpop.f32.mrf.mxu1 }
 0x219   :  { %v568_v32 = vadd.f32 %v3677_v27, %v5276_v24  ;;  %4190 = vmatmul.mubr.f32.gmra.mxu0 %v639_v30 }
 0x21a   :  { %v3679_v19 = vpop.f32.mrf.mxu1 }
 0x21b   :  { %v640_v34 = vmax.f32 %v568_v32, 0.0  ;;  %v3680_v38 = vadd.f32 %v3679_v19, %v3678_v29 }
 0x21c   :  { %v3681_v39 = vpop.f32.mrf.mxu1 }
 0x21d   :  { %v571_v61 = vadd.f32 %v3680_v38, %v5276_v24  ;;  %4192 = vmatprep.mubr.f32.mxu0 %v640_v34 }
 0x21e   :  { %v3682_v63 = vpop.f32.mrf.mxu1 }
 0x21f   :  { %v3683_v1 = vadd.f32 %v3682_v63, %v3681_v39  ;;  %v641_v3 = vmax.f32 %v571_v61, 0.0 }
 0x220   :  { %v3684_v21 = vpop.f32.mrf.mxu1 }
 0x221   :  { %v576_v4 = vadd.f32 %v3683_v1, %v5276_v24  ;;  %4193 = vmatmul.mubr.f32.gmra.mxu0 %v641_v3 }
 0x222   :  { %v3685_v6 = vpop.f32.mrf.mxu1 }
 0x223   :  { %v642_v20 = vmax.f32 %v576_v4, 0.0  ;;  %v3686_v22 = vadd.f32 %v3685_v6, %v3684_v21 }
 0x224   :  { %v3687_v25 = vpop.f32.mrf.mxu1 }
 0x225   :  { %v579_v27 = vadd.f32 %v3686_v22, %v5276_v24  ;;  %4195 = vmatprep.mubr.f32.mxu0 %v642_v20 }
 0x226   :  { %v3688_v30 = vpop.f32.mrf.mxu1 }
 0x227   :  { %v3689_v29 = vadd.f32 %v3688_v30, %v3687_v25  ;;  %v643_v32 = vmax.f32 %v579_v27, 0.0 }
 0x228   :  { %v3690_v19 = vpop.f32.mrf.mxu1 }
 0x229   :  { %v584_v34 = vadd.f32 %v3689_v29, %v5276_v24  ;;  %4196 = vmatmul.mubr.f32.gmra.mxu0 %v643_v32 }
 0x22a   :  { %v3691_v38 = vpop.f32.mrf.mxu1 }
 0x22b   :  { %v644_v39 = vmax.f32 %v584_v34, 0.0  ;;  %v3692_v61 = vadd.f32 %v3691_v38, %v3690_v19 }
 0x22c   :  { %v3693_v63 = vpop.f32.mrf.mxu1 }
 0x22d   :  { %v587_v1 = vadd.f32 %v3692_v61, %v5276_v24  ;;  %4198 = vmatprep.mubr.f32.mxu0 %v644_v39 }
 0x22e   :  { %v3694_v3 = vpop.f32.mrf.mxu1 }
 0x22f   :  { %v3695_v21 = vadd.f32 %v3694_v3, %v3693_v63  ;;  %v645_v4 = vmax.f32 %v587_v1, 0.0 }
 0x230   :  { %v3696_v6 = vpop.f32.mrf.mxu1 }
 0x231   :  { %v592_v20 = vadd.f32 %v3695_v21, %v5276_v24  ;;  %4199 = vmatmul.mubr.f32.gmra.mxu0 %v645_v4 }
 0x232   :  { %v3697_v22 = vpop.f32.mrf.mxu1 }
 0x233   :  { %v646_v25 = vmax.f32 %v592_v20, 0.0  ;;  %v3698_v27 = vadd.f32 %v3697_v22, %v3696_v6 }
 0x234   :  { %v3699_v30 = vpop.f32.mrf.mxu1 }
 0x235   :  { %v595_v29 = vadd.f32 %v3698_v27, %v5276_v24  ;;  %4201 = vmatprep.mubr.f32.mxu0 %v646_v25 }
 0x236   :  { %v3700_v32 = vpop.f32.mrf.mxu1 }
 0x237   :  { %v647_v19 = vmax.f32 %v595_v29, 0.0  ;;  %v3701_v34 = vadd.f32 %v3700_v32, %v3699_v30 }
 0x238   :  { %v3702_v38 = vpop.f32.mrf.mxu1 }
 0x239   :  { %v600_v39 = vadd.f32 %v3701_v34, %v5276_v24  ;;  %4202 = vmatmul.mubr.f32.gmra.mxu0 %v647_v19 }
 0x23a   :  { %v3703_v61 = vpop.f32.mrf.mxu1 }
 0x23b   :  { %v648_v63 = vmax.f32 %v600_v39, 0.0  ;;  %v3704_v1 = vadd.f32 %v3703_v61, %v3702_v38 }
 0x23c   :  { %v3705_v3 = vpop.f32.mrf.mxu1 }
 0x23d   :  { %v603_v21 = vadd.f32 %v3704_v1, %v5276_v24  ;;  %4204 = vmatprep.mubr.f32.mxu0 %v648_v63 }
 0x23e   :  { %v3706_v4 = vpop.f32.mrf.mxu1 }
 0x23f   :  { %v649_v6 = vmax.f32 %v603_v21, 0.0  ;;  %v3707_v20 = vadd.f32 %v3706_v4, %v3705_v3 }
 0x240   :  { %v3708_v22 = vpop.f32.mrf.mxu1 }
 0x241   :  { %v608_v25 = vadd.f32 %v3707_v20, %v5276_v24  ;;  %4205 = vmatmul.mubr.f32.gmra.mxu0 %v649_v6 }
 0x242   :  { %v3709_v27 = vpop.f32.mrf.mxu1 }
 0x243   :  { %v650_v30 = vmax.f32 %v608_v25, 0.0  ;;  %v3710_v29 = vadd.f32 %v3709_v27, %v3708_v22 }
 0x244   :  { %v3711_v32 = vpop.f32.mrf.mxu1 }
 0x245   :  { %v611_v19 = vadd.f32 %v3710_v29, %v5276_v24  ;;  %4207 = vmatprep.mubr.f32.mxu0 %v650_v30 }
 0x246   :  { %v3712_v34 = vpop.f32.mrf.mxu1 }
 0x247   :  { %v651_v38 = vmax.f32 %v611_v19, 0.0  ;;  %v3713_v39 = vadd.f32 %v3712_v34, %v3711_v32 }
 0x248   :  { %v3714_v61 = vpop.f32.mrf.mxu1 }
 0x249   :  { %v616_v63 = vadd.f32 %v3713_v39, %v5276_v24  ;;  %4208 = vmatmul.mubr.f32.gmra.mxu0 %v651_v38 }
 0x24a   :  { %v3715_v1 = vpop.f32.mrf.mxu1 }
 0x24b   :  { %v652_v3 = vmax.f32 %v616_v63, 0.0  ;;  %v3716_v21 = vadd.f32 %v3715_v1, %v3714_v61 }
 0x24d   :  { %v619_v4 = vadd.f32 %v3716_v21, %v5276_v24  ;;  %4210 = vmatprep.mubr.f32.mxu0 %v652_v3 }
 0x24f   :  { %v653_v6 = vmax.f32 %v619_v4, 0.0 }
 0x251   :  { %4211 = vmatmul.mubr.f32.gmra.mxu0 %v653_v6 }
 0x252   :  { %950 = vmatprep.mubr.bf16.mxu0 %v49_v37 }
 0x299   :  { %v5312_v20 = vpop.f32.mrf.mxu0 }
 0x29b   :  { %v736_v22 = vpop.f32.mrf.mxu0 }
 0x29c   :  { %v895_v25 = vpack.c.bf16 %v5312_v20, %v736_v22 }
 0x2a1   :  { %v4170_v27 = vpop.f32.mrf.mxu0 }
 0x2a3   :  { %v746_v30 = vpop.f32.mrf.mxu0 }
 0x2a9   :  { %v4173_v29 = vpop.f32.mrf.mxu0 }
 0x2ab   :  { %v756_v32 = vpop.f32.mrf.mxu0 }
 0x2ac   :  { %v897_v19 = vpack.c.bf16 %v4173_v29, %v756_v32 }
 0x2b1   :  { %v4176_v34 = vpop.f32.mrf.mxu0 }
 0x2b3   :  { %v766_v38 = vpop.f32.mrf.mxu0 }
 0x2b4   :  { %v898_v47 = vpack.c.bf16 %v4176_v34, %v766_v38  ;;  %v1318_v34 = vld [vmem:[%s7512_s6 + $0x78] sm:$0xff] }
 0x2b9   :  { %v4179_v39 = vpop.f32.mrf.mxu0 }
 0x2bb   :  { %v776_v24 = vpop.f32.mrf.mxu0 }
 0x2bc   :  { %v899_v50 = vpack.c.bf16 %v4179_v39, %v776_v24 }
 0x2c1   :  { %v4182_v61 = vpop.f32.mrf.mxu0 }
 0x2c3   :  { %v786_v63 = vpop.f32.mrf.mxu0 }
 0x2c4   :  { %v900_v53 = vpack.c.bf16 %v4182_v61, %v786_v63 }
 0x2c9   :  { %v4185_v1 = vpop.f32.mrf.mxu0 }
 0x2cb   :  { %v796_v3 = vpop.f32.mrf.mxu0 }
 0x2cc   :  { %v901_v56 = vpack.c.bf16 %v4185_v1, %v796_v3  ;;  %v1315_v3 = vld [vmem:[%s7512_s6 + $0x60] sm:$0xff] }
 0x2d1   :  { %v4188_v21 = vpop.f32.mrf.mxu0 }
 0x2d3   :  { %v806_v37 = vpop.f32.mrf.mxu0 }
 0x2d4   :  { %v902_v59 = vpack.c.bf16 %v4188_v21, %v806_v37  ;;  %v1316_v21 = vld [vmem:[%s7512_s6 + $0x68] sm:$0xff] }
 0x2d9   :  { %v4191_v4 = vpop.f32.mrf.mxu0 }
 0x2db   :  { %v816_v6 = vpop.f32.mrf.mxu0 }
 0x2e1   :  { %v4194_v17 = vpop.f32.mrf.mxu0 }
 0x2e3   :  { %v826_v16 = vpop.f32.mrf.mxu0 }
 0x2e9   :  { %v4197_v20 = vpop.f32.mrf.mxu0 }
 0x2eb   :  { %v836_v22 = vpop.f32.mrf.mxu0 }
 0x2ec   :  { %v905_v45 = vpack.c.bf16 %v4197_v20, %v836_v22 }
 0x2f1   :  { %v4200_v14 = vpop.f32.mrf.mxu0 }
 0x2f3   :  { %v846_v13 = vpop.f32.mrf.mxu0 }
 0x2f4   :  { %v906_v48 = vpack.c.bf16 %v4200_v14, %v846_v13 }
 0x2f9   :  { %v4203_v11 = vpop.f32.mrf.mxu0 }
 0x2fb   :  { %v856_v29 = vpop.f32.mrf.mxu0 }
 0x2fc   :  { %v907_v51 = vpack.c.bf16 %v4203_v11, %v856_v29 }
 0x301   :  { %v4206_v32 = vpop.f32.mrf.mxu0 }
 0x303   :  { %v866_v10 = vpop.f32.mrf.mxu0 }
 0x304   :  { %v908_v54 = vpack.c.bf16 %v4206_v32, %v866_v10  ;;  %v1313_v32 = vld [vmem:[%s7512_s6 + $0x50] sm:$0xff] }
 0x309   :  { %v4209_v8 = vpop.f32.mrf.mxu0 }
 0x30b   :  { %v876_v7 = vpop.f32.mrf.mxu0 }
 0x30c   :  { %v909_v57 = vpack.c.bf16 %v4209_v8, %v876_v7 }
 0x311   :  { %v4212_v2 = vpop.f32.mrf.mxu0 }
 0x313   :  { %v886_v0 = vpop.f32.mrf.mxu0 }
 0x314   :  { %v910_v60 = vpack.c.bf16 %v4212_v2, %v886_v0  ;;  %v904_v0 = vpack.c.bf16 %v4194_v17, %v826_v16 }
 0x316   :  { %3765 = vmatprep.subr.bf16.mxu0 %v910_v60  ;;  %v5380_v60 = vld [vmem:[%s7511_s5] ss:$0 sm:$0xff] }
 0x317   :  { %3766 = vmatpush3.bf16.msra.mxu0 %v902_v59  ;;  %v903_v59 = vpack.c.bf16 %v4191_v4, %v816_v6  ;;  %v1341_v4 = vpack.c.bf16 %v1316_v21, %v1315_v3 }
 0x318   :  { %3767 = vmatprep.subr.bf16.mxu0 %v909_v57  ;;  %v896_v57 = vpack.c.bf16 %v4170_v27, %v746_v30 }
 0x31b   :  { %3768 = vmatpush3.bf16.msra.mxu0 %v901_v56  ;;  %v7611_v56 = vunpack.c.h.s8.bf16 %v5262_v18 }
 0x31c   :  { %3769 = vmatprep.subr.bf16.mxu0 %v908_v54  ;;  %v7609_v54 = vunpack.c.l.s8.bf16 %v5262_v18 }
 0x31f   :  { %3770 = vmatpush3.bf16.msra.mxu0 %v900_v53  ;;  %v7608_v53 = vunpack.c.l.s8.bf16 %v5251_v15 }
 0x320   :  { %3771 = vmatprep.subr.bf16.mxu0 %v907_v51  ;;  %v7606_v51 = vunpack.c.h.s8.bf16 %v5229_v9 }
 0x323   :  { %3772 = vmatpush3.bf16.msra.mxu0 %v899_v50  ;;  %v7605_v50 = vunpack.c.l.s8.bf16 %v5240_v12 }
 0x324   :  { %3773 = vmatprep.subr.bf16.mxu0 %v906_v48  ;;  %v7603_v48 = vunpack.c.h.s8.bf16 %v5215_v5 }
 0x327   :  { %3774 = vmatpush3.bf16.msra.mxu0 %v898_v47  ;;  %v7602_v47 = vunpack.c.h.s8.bf16 %v5192_v62 }
 0x328   :  { %3775 = vmatprep.subr.bf16.mxu0 %v905_v45  ;;  %v7600_v45 = vunpack.c.l.s8.bf16 %v5192_v62 }
 0x32b   :  { %3776 = vmatpush3.bf16.msra.mxu0 %v897_v19  ;;  %v1317_v19 = vld [vmem:[%s7512_s6 + $0x70] sm:$0xff] }
 0x32c   :  { %3777 = vmatprep.subr.bf16.mxu0 %v904_v0  ;;  %v1342_v39 = vpack.c.bf16 %v1318_v34, %v1317_v19  ;;  %v1314_v0 = vld [vmem:[%s7512_s6 + $0x58] sm:$0xff] }
 0x32e   :  { %4213 = vmatprep.subr.bf16.mxu1 %v1342_v39 }
 0x32f   :  { %3778 = vmatpush3.bf16.msra.mxu0 %v896_v57  ;;  %4214 = vmatpush3.bf16.msra.mxu1 %v1342_v39 }
 0x330   :  { %3779 = vmatprep.subr.bf16.mxu0 %v903_v59  ;;  %4215 = vmatprep.subr.bf16.mxu1 %v1341_v4  ;;  %v1340_v59 = vpack.c.bf16 %v1314_v0, %v1313_v32 }
 0x333   :  { %3780 = vmatpush3.bf16.msra.mxu0 %v895_v25  ;;  %4216 = vmatpush3.bf16.msra.mxu1 %v1341_v4 }
 0x334   :  { %4217 = vmatprep.subr.bf16.mxu1 %v1340_v59 }
 0x336   :  { %951 = vmatmul.mubr.bf16.vlgmr.msra.gmra.mxu0 %v48_v26  ;;  %v7588_v26 = vunpack.c.l.s8.bf16 %v5123_v43  ;;  %v7598_v43 = vunpack.c.h.s8.bf16 %v5167_v55 }
 0x337   :  { %958 = vmatprep.mubr.bf16.mxu0 %v51_v28  ;;  %v7591_v28 = vunpack.c.h.s8.bf16 %v5134_v46  ;;  %v7601_v46 = vunpack.c.l.s8.bf16 %v5215_v5  ;;  %4218 = vmatpush3.bf16.msra.mxu1 %v1340_v59 }
 0x33e   :  { %959 = vmatmul.mubr.bf16.gmra.mxu0 %v50_v33  ;;  %v7592_v33 = vunpack.c.l.s8.bf16 %v5145_v49 }
 0x33f   :  { %966 = vmatprep.mubr.bf16.mxu0 %v53_v35  ;;  %v7594_v35 = vunpack.c.h.s8.bf16 %v5145_v49  ;;  %v7604_v49 = vunpack.c.l.s8.bf16 %v5229_v9 }
 0x346   :  { %967 = vmatmul.mubr.bf16.gmra.mxu0 %v52_v41  ;;  %v7596_v41 = vunpack.c.l.s8.bf16 %v5167_v55  ;;  %v7610_v55 = vunpack.c.h.s8.bf16 %v5251_v15 }
 0x347   :  { %974 = vmatprep.mubr.bf16.mxu0 %v55_v42  ;;  %v7597_v42 = vunpack.c.l.s8.bf16 %v5178_v58 }
 0x34e   :  { %975 = vmatmul.mubr.bf16.gmra.mxu0 %v54_v44  ;;  %v7599_v44 = vunpack.c.h.s8.bf16 %v5178_v58 }
 0x34f   :  { %982 = vmatprep.mubr.bf16.mxu0 %v7588_v26 }
 0x356   :  { %983 = vmatmul.mubr.bf16.gmra.mxu0 %v7589_v36 }
 0x357   :  { %990 = vmatprep.mubr.bf16.mxu0 %v7590_v23 }
 0x35e   :  { %991 = vmatmul.mubr.bf16.gmra.mxu0 %v7591_v28 }
 0x35f   :  { %998 = vmatprep.mubr.bf16.mxu0 %v7592_v33  ;;  %v1311_v33 = vld [vmem:[%s7512_s6 + $0x40] sm:$0xff] }
 0x366   :  { %999 = vmatmul.mubr.bf16.gmra.mxu0 %v7593_v31  ;;  %v1312_v31 = vld [vmem:[%s7512_s6 + $0x48] sm:$0xff] }
 0x367   :  { %1006 = vmatprep.mubr.bf16.mxu0 %v7594_v35 }
 0x36e   :  { %1007 = vmatmul.mubr.bf16.gmra.mxu0 %v7595_v40  ;;  %v1339_v40 = vpack.c.bf16 %v1312_v31, %v1311_v33 }
 0x36f   :  { %1014 = vmatprep.mubr.bf16.mxu0 %v7596_v41 }
 0x370   :  { %4219 = vmatprep.subr.bf16.mxu1 %v1339_v40 }
 0x371   :  { %4220 = vmatpush3.bf16.msra.mxu1 %v1339_v40 }
 0x376   :  { %1015 = vmatmul.mubr.bf16.gmra.mxu0 %v7597_v42 }
 0x377   :  { %1022 = vmatprep.mubr.bf16.mxu0 %v7598_v43 }
 0x37e   :  { %1023 = vmatmul.mubr.bf16.gmra.mxu0 %v7599_v44 }
 0x37f   :  { %1030 = vmatprep.mubr.bf16.mxu0 %v7600_v45  ;;  %v1309_v45 = vld [vmem:[%s7512_s6 + $0x30] sm:$0xff] }
 0x386   :  { %1031 = vmatmul.mubr.bf16.gmra.mxu0 %v7601_v46  ;;  %v1310_v46 = vld [vmem:[%s7512_s6 + $0x38] sm:$0xff] }
 0x387   :  { %1038 = vmatprep.mubr.bf16.mxu0 %v7602_v47 }
 0x38e   :  { %1039 = vmatmul.mubr.bf16.gmra.mxu0 %v7603_v48  ;;  %v1338_v48 = vpack.c.bf16 %v1310_v46, %v1309_v45 }
 0x38f   :  { %1046 = vmatprep.mubr.bf16.mxu0 %v7604_v49 }
 0x390   :  { %4221 = vmatprep.subr.bf16.mxu1 %v1338_v48 }
 0x391   :  { %4222 = vmatpush3.bf16.msra.mxu1 %v1338_v48 }
 0x396   :  { %1047 = vmatmul.mubr.bf16.gmra.mxu0 %v7605_v50 }
 0x397   :  { %1054 = vmatprep.mubr.bf16.mxu0 %v7606_v51 }
 0x39e   :  { %1055 = vmatmul.mubr.bf16.gmra.mxu0 %v7607_v52 }
 0x39f   :  { %1062 = vmatprep.mubr.bf16.mxu0 %v7608_v53  ;;  %v1307_v53 = vld [vmem:[%s7512_s6 + $0x20] sm:$0xff] }
 0x3a6   :  { %1063 = vmatmul.mubr.bf16.gmra.mxu0 %v7609_v54  ;;  %v1308_v54 = vld [vmem:[%s7512_s6 + $0x28] sm:$0xff] }
 0x3a7   :  { %1070 = vmatprep.mubr.bf16.mxu0 %v7610_v55 }
 0x3ae   :  { %1071 = vmatmul.mubr.bf16.gmra.mxu0 %v7611_v56  ;;  %v1337_v56 = vpack.c.bf16 %v1308_v54, %v1307_v53 }
 0x3b0   :  { %4223 = vmatprep.subr.bf16.mxu1 %v1337_v56 }
 0x3b1   :  { %4224 = vmatpush3.bf16.msra.mxu1 %v1337_v56 }
 0x3f6   :  { %v3781_v58 = vpop.f32.mrf.mxu0 }
 0x3f8   :  { %v3782_v62 = vpop.f32.mrf.mxu0 }
 0x3f9   :  { %v3783_v2 = vadd.f32 %v3782_v62, %v3781_v58 }
 0x3fa   :  { %v3784_v5 = vpop.f32.mrf.mxu0 }
 0x3fb   :  { %v5383_v7 = vadd.f32 %v3783_v2, %v5380_v60 }
 0x3fc   :  { %v3785_v8 = vpop.f32.mrf.mxu0 }
 0x3fd   :  { %1079 = vst [vmem:[#allocation2] sm:$0xff] %v5383_v7  ;;  %v3786_v9 = vadd.f32 %v3785_v8, %v3784_v5  ;;  %v1111_v10 = vmul.f32 %v5383_v7, %v5383_v7  ;;  %v1305_v8 = vld [vmem:[%s7512_s6 + $0x10] sm:$0xff] }
 0x3fe   :  { %v3787_v11 = vpop.f32.mrf.mxu0 }
 0x3ff   :  { %v5389_v12 = vadd.f32 %v3786_v9, %v5380_v60  ;;  %1143 = vadd.xlane.f32.xlu0 %v1111_v10  ;;  %v1306_v9 = vld [vmem:[%s7512_s6 + $0x18] sm:$0xff] }
 0x400   :  { %v3788_v13 = vpop.f32.mrf.mxu0 }
 0x401   :  { %1080 = vst [vmem:[#allocation2 + $0x8] sm:$0xff] %v5389_v12  ;;  %v3789_v14 = vadd.f32 %v3788_v13, %v3787_v11  ;;  %v1112_v15 = vmul.f32 %v5389_v12, %v5389_v12  ;;  %v1336_v11 = vpack.c.bf16 %v1306_v9, %v1305_v8 }
 0x402   :  { %v3790_v16 = vpop.f32.mrf.mxu0 }
 0x403   :  { %v5395_v17 = vadd.f32 %v3789_v14, %v5380_v60  ;;  %1145 = vadd.xlane.f32.xlu0 %v1112_v15  ;;  %4225 = vmatprep.subr.bf16.mxu1 %v1336_v11 }
 0x404   :  { %v3791_v18 = vpop.f32.mrf.mxu0  ;;  %4226 = vmatpush3.bf16.msra.mxu1 %v1336_v11 }
 0x405   :  { %1081 = vst [vmem:[#allocation2 + $0x10] sm:$0xff] %v5395_v17  ;;  %v3792_v25 = vadd.f32 %v3791_v18, %v3790_v16  ;;  %v1113_v27 = vmul.f32 %v5395_v17, %v5395_v17  ;;  %v1303_v18 = vld [vmem:[%s7512_s6] sm:$0xff] }
 0x406   :  { %v3793_v30 = vpop.f32.mrf.mxu0 }
 0x407   :  { %v5407_v38 = vadd.f32 %v3792_v25, %v5380_v60  ;;  %1147 = vadd.xlane.f32.xlu1 %v1113_v27  ;;  %v1304_v25 = vld [vmem:[%s7512_s6 + $0x8] sm:$0xff] }
 0x408   :  { %v3794_v24 = vpop.f32.mrf.mxu0 }
 0x409   :  { %1082 = vst [vmem:[#allocation2 + $0x18] sm:$0xff] %v5407_v38  ;;  %v3795_v61 = vadd.f32 %v3794_v24, %v3793_v30  ;;  %v1114_v63 = vmul.f32 %v5407_v38, %v5407_v38  ;;  %v1335_v30 = vpack.c.bf16 %v1304_v25, %v1303_v18 }
 0x40a   :  { %v3796_v1 = vpop.f32.mrf.mxu0 }
 0x40b   :  { %v5419_v37 = vadd.f32 %v3795_v61, %v5380_v60  ;;  %1149 = vadd.xlane.f32.xlu1 %v1114_v63  ;;  %4227 = vmatprep.subr.bf16.mxu1 %v1335_v30 }
 0x40c   :  { %v3797_v6 = vpop.f32.mrf.mxu0  ;;  %4228 = vmatpush3.bf16.msra.mxu1 %v1335_v30 }
 0x40d   :  { %1083 = vst [vmem:[#allocation2 + $0x20] sm:$0xff] %v5419_v37  ;;  %v3798_v20 = vadd.f32 %v3797_v6, %v3796_v1  ;;  %v1115_v22 = vmul.f32 %v5419_v37, %v5419_v37 }
 0x40e   :  { %v3799_v29 = vpop.f32.mrf.mxu0 }
 0x40f   :  { %v5431_v57 = vadd.f32 %v3798_v20, %v5380_v60  ;;  %1151 = vadd.xlane.f32.xlu0 %v1115_v22 }
 0x410   :  { %v3800_v26 = vpop.f32.mrf.mxu0 }
 0x411   :  { %1084 = vst [vmem:[#allocation2 + $0x28] sm:$0xff] %v5431_v57  ;;  %v3801_v36 = vadd.f32 %v3800_v26, %v3799_v29  ;;  %v1116_v23 = vmul.f32 %v5431_v57, %v5431_v57 }
 0x412   :  { %v3802_v28 = vpop.f32.mrf.mxu0 }
 0x413   :  { %v5443_v35 = vadd.f32 %v3801_v36, %v5380_v60  ;;  %1153 = vadd.xlane.f32.xlu1 %v1116_v23 }
 0x414   :  { %v3803_v41 = vpop.f32.mrf.mxu0 }
 0x415   :  { %1085 = vst [vmem:[#allocation2 + $0x30] sm:$0xff] %v5443_v35  ;;  %v3804_v42 = vadd.f32 %v3803_v41, %v3802_v28  ;;  %v1117_v43 = vmul.f32 %v5443_v35, %v5443_v35 }
 0x416   :  { %v3805_v44 = vpop.f32.mrf.mxu0 }
 0x417   :  { %v5455_v47 = vadd.f32 %v3804_v42, %v5380_v60  ;;  %1155 = vadd.xlane.f32.xlu0 %v1117_v43 }
 0x418   :  { %v3806_v49 = vpop.f32.mrf.mxu0 }
 0x419   :  { %1086 = vst [vmem:[#allocation2 + $0x38] sm:$0xff] %v5455_v47  ;;  %v3807_v50 = vadd.f32 %v3806_v49, %v3805_v44  ;;  %v1118_v51 = vmul.f32 %v5455_v47, %v5455_v47 }
 0x41a   :  { %v3808_v52 = vpop.f32.mrf.mxu0 }
 0x41b   :  { %v5467_v55 = vadd.f32 %v3807_v50, %v5380_v60  ;;  %1157 = vadd.xlane.f32.xlu1 %v1118_v51 }
 0x41c   :  { %v3809_v58 = vpop.f32.mrf.mxu0 }
 0x41d   :  { %1087 = vst [vmem:[#allocation2 + $0x40] sm:$0xff] %v5467_v55  ;;  %v3810_v62 = vadd.f32 %v3809_v58, %v3808_v52  ;;  %v1119_v2 = vmul.f32 %v5467_v55, %v5467_v55 }
 0x41e   :  { %v3811_v5 = vpop.f32.mrf.mxu0 }
 0x41f   :  { %v5479_v10 = vadd.f32 %v3810_v62, %v5380_v60  ;;  %1159 = vadd.xlane.f32.xlu0 %v1119_v2 }
 0x420   :  { %v3812_v13 = vpop.f32.mrf.mxu0 }
 0x421   :  { %1088 = vst [vmem:[#allocation2 + $0x48] sm:$0xff] %v5479_v10  ;;  %v3813_v14 = vadd.f32 %v3812_v13, %v3811_v5  ;;  %v1120_v15 = vmul.f32 %v5479_v10, %v5479_v10 }
 0x422   :  { %v3814_v16 = vpop.f32.mrf.mxu0 }
 0x423   :  { %v5491_v27 = vadd.f32 %v3813_v14, %v5380_v60  ;;  %1161 = vadd.xlane.f32.xlu1 %v1120_v15 }
 0x424   :  { %v3815_v19 = vpop.f32.mrf.mxu0 }
 0x425   :  { %1089 = vst [vmem:[#allocation2 + $0x50] sm:$0xff] %v5491_v27  ;;  %v3816_v34 = vadd.f32 %v3815_v19, %v3814_v16  ;;  %v1121_v39 = vmul.f32 %v5491_v27, %v5491_v27 }
 0x426   :  { %v3817_v24 = vpop.f32.mrf.mxu0 }
 0x427   :  { %v5497_v61 = vadd.f32 %v3816_v34, %v5380_v60  ;;  %1163 = vadd.xlane.f32.xlu0 %v1121_v39 }
 0x428   :  { %v3818_v63 = vpop.f32.mrf.mxu0 }
 0x429   :  { %1090 = vst [vmem:[#allocation2 + $0x58] sm:$0xff] %v5497_v61  ;;  %v3819_v1 = vadd.f32 %v3818_v63, %v3817_v24  ;;  %v1122_v3 = vmul.f32 %v5497_v61, %v5497_v61 }
 0x42a   :  { %v3820_v21 = vpop.f32.mrf.mxu0 }
 0x42b   :  { %v5503_v4 = vadd.f32 %v3819_v1, %v5380_v60  ;;  %1165 = vadd.xlane.f32.xlu1 %v1122_v3 }
 0x42c   :  { %v3821_v6 = vpop.f32.mrf.mxu0 }
 0x42d   :  { %1091 = vst [vmem:[#allocation2 + $0x60] sm:$0xff] %v5503_v4  ;;  %v3822_v20 = vadd.f32 %v3821_v6, %v3820_v21  ;;  %v1123_v22 = vmul.f32 %v5503_v4, %v5503_v4 }
 0x42e   :  { %v3823_v29 = vpop.f32.mrf.mxu0 }
 0x42f   :  { %v5509_v32 = vadd.f32 %v3822_v20, %v5380_v60  ;;  %1167 = vadd.xlane.f32.xlu0 %v1123_v22 }
 0x430   :  { %v3824_v0 = vpop.f32.mrf.mxu0 }
 0x431   :  { %1092 = vst [vmem:[#allocation2 + $0x68] sm:$0xff] %v5509_v32  ;;  %v3825_v59 = vadd.f32 %v3824_v0, %v3823_v29  ;;  %v1124_v26 = vmul.f32 %v5509_v32, %v5509_v32 }
 0x432   :  { %v3826_v36 = vpop.f32.mrf.mxu0 }
 0x433   :  { %v5515_v23 = vadd.f32 %v3825_v59, %v5380_v60  ;;  %1169 = vadd.xlane.f32.xlu1 %v1124_v26 }
 0x434   :  { %v3827_v28 = vpop.f32.mrf.mxu0 }
 0x435   :  { %1093 = vst [vmem:[#allocation2 + $0x70] sm:$0xff] %v5515_v23  ;;  %v3828_v33 = vadd.f32 %v3827_v28, %v3826_v36  ;;  %v1125_v31 = vmul.f32 %v5515_v23, %v5515_v23 }
 0x436   :  { %v3829_v40 = vpop.f32.mrf.mxu0 }
 0x437   :  { %v5521_v41 = vadd.f32 %v3828_v33, %v5380_v60  ;;  %1171 = vadd.xlane.f32.xlu0 %v1125_v31 }
 0x438   :  { %v3830_v42 = vpop.f32.mrf.mxu0 }
 0x439   :  { %1094 = vst [vmem:[#allocation2 + $0x78] sm:$0xff] %v5521_v41  ;;  %v3831_v43 = vadd.f32 %v3830_v42, %v3829_v40  ;;  %v1126_v44 = vmul.f32 %v5521_v41, %v5521_v41 }
 0x43a   :  { %v3832_v45 = vpop.f32.mrf.mxu0 }
 0x43b   :  { %v5527_v46 = vadd.f32 %v3831_v43, %v5380_v60  ;;  %1173 = vadd.xlane.f32.xlu1 %v1126_v44 }
 0x43c   :  { %v3833_v48 = vpop.f32.mrf.mxu0 }
 0x43d   :  { %1095 = vst [vmem:[#allocation2 + $0x80] sm:$0xff] %v5527_v46  ;;  %v3834_v49 = vadd.f32 %v3833_v48, %v3832_v45  ;;  %v1127_v50 = vmul.f32 %v5527_v46, %v5527_v46 }
 0x43e   :  { %v3835_v51 = vpop.f32.mrf.mxu0 }
 0x43f   :  { %v5533_v52 = vadd.f32 %v3834_v49, %v5380_v60  ;;  %1175 = vadd.xlane.f32.xlu0 %v1127_v50 }
 0x440   :  { %v3836_v53 = vpop.f32.mrf.mxu0 }
 0x441   :  { %1096 = vst [vmem:[#allocation2 + $0x88] sm:$0xff] %v5533_v52  ;;  %v3837_v54 = vadd.f32 %v3836_v53, %v3835_v51  ;;  %v1128_v56 = vmul.f32 %v5533_v52, %v5533_v52 }
 0x442   :  { %v3838_v58 = vpop.f32.mrf.mxu0 }
 0x443   :  { %v5539_v62 = vadd.f32 %v3837_v54, %v5380_v60  ;;  %1177 = vadd.xlane.f32.xlu1 %v1128_v56 }
 0x444   :  { %v3839_v2 = vpop.f32.mrf.mxu0 }
 0x445   :  { %1097 = vst [vmem:[#allocation2 + $0x90] sm:$0xff] %v5539_v62  ;;  %v3840_v5 = vadd.f32 %v3839_v2, %v3838_v58  ;;  %v1129_v8 = vmul.f32 %v5539_v62, %v5539_v62 }
 0x446   :  { %v3841_v9 = vpop.f32.mrf.mxu0 }
 0x447   :  { %v5545_v11 = vadd.f32 %v3840_v5, %v5380_v60  ;;  %1179 = vadd.xlane.f32.xlu0 %v1129_v8 }
 0x448   :  { %v3842_v13 = vpop.f32.mrf.mxu0 }
 0x449   :  { %1098 = vst [vmem:[#allocation2 + $0x98] sm:$0xff] %v5545_v11  ;;  %v3843_v14 = vadd.f32 %v3842_v13, %v3841_v9  ;;  %v1130_v15 = vmul.f32 %v5545_v11, %v5545_v11 }
 0x44a   :  { %v3844_v16 = vpop.f32.mrf.mxu0 }
 0x44b   :  { %v5551_v18 = vadd.f32 %v3843_v14, %v5380_v60  ;;  %1181 = vadd.xlane.f32.xlu1 %v1130_v15 }
 0x44c   :  { %v3845_v25 = vpop.f32.mrf.mxu0 }
 0x44d   :  { %1099 = vst [vmem:[#allocation2 + $0xa0] sm:$0xff] %v5551_v18  ;;  %v3846_v30 = vadd.f32 %v3845_v25, %v3844_v16  ;;  %v1131_v19 = vmul.f32 %v5551_v18, %v5551_v18 }
 0x44e   :  { %v3847_v34 = vpop.f32.mrf.mxu0 }
 0x44f   :  { %v5557_v39 = vadd.f32 %v3846_v30, %v5380_v60  ;;  %1183 = vadd.xlane.f32.xlu0 %v1131_v19 }
 0x450   :  { %v3848_v24 = vpop.f32.mrf.mxu0 }
 0x451   :  { %1100 = vst [vmem:[#allocation2 + $0xa8] sm:$0xff] %v5557_v39  ;;  %v3849_v63 = vadd.f32 %v3848_v24, %v3847_v34  ;;  %v1132_v1 = vmul.f32 %v5557_v39, %v5557_v39 }
 0x452   :  { %v3850_v3 = vpop.f32.mrf.mxu0 }
 0x453   :  { %v5563_v21 = vadd.f32 %v3849_v63, %v5380_v60  ;;  %1185 = vadd.xlane.f32.xlu1 %v1132_v1 }
 0x454   :  { %v3851_v6 = vpop.f32.mrf.mxu0 }
 0x455   :  { %1101 = vst [vmem:[#allocation2 + $0xb0] sm:$0xff] %v5563_v21  ;;  %v3852_v20 = vadd.f32 %v3851_v6, %v3850_v3  ;;  %v1133_v22 = vmul.f32 %v5563_v21, %v5563_v21 }
 0x456   :  { %v3853_v29 = vpop.f32.mrf.mxu0 }
 0x457   :  { %v5569_v0 = vadd.f32 %v3852_v20, %v5380_v60  ;;  %1187 = vadd.xlane.f32.xlu0 %v1133_v22 }
 0x458   :  { %v3854_v59 = vpop.f32.mrf.mxu0 }
 0x459   :  { %1102 = vst [vmem:[#allocation2 + $0xb8] sm:$0xff] %v5569_v0  ;;  %v3855_v26 = vadd.f32 %v3854_v59, %v3853_v29  ;;  %v1134_v36 = vmul.f32 %v5569_v0, %v5569_v0 }
 0x45a   :  { %v3856_v28 = vpop.f32.mrf.mxu0 }
 0x45b   :  { %v5575_v33 = vadd.f32 %v3855_v26, %v5380_v60  ;;  %1189 = vadd.xlane.f32.xlu1 %v1134_v36 }
 0x45c   :  { %v3857_v31 = vpop.f32.mrf.mxu0 }
 0x45d   :  { %1103 = vst [vmem:[#allocation2 + $0xc0] sm:$0xff] %v5575_v33  ;;  %v3858_v40 = vadd.f32 %v3857_v31, %v3856_v28  ;;  %v1135_v42 = vmul.f32 %v5575_v33, %v5575_v33 }
 0x45e   :  { %v3859_v43 = vpop.f32.mrf.mxu0 }
 0x45f   :  { %v5581_v44 = vadd.f32 %v3858_v40, %v5380_v60  ;;  %1191 = vadd.xlane.f32.xlu0 %v1135_v42 }
 0x460   :  { %v3860_v45 = vpop.f32.mrf.mxu0 }
 0x461   :  { %1104 = vst [vmem:[#allocation2 + $0xc8] sm:$0xff] %v5581_v44  ;;  %v3861_v48 = vadd.f32 %v3860_v45, %v3859_v43  ;;  %v1136_v49 = vmul.f32 %v5581_v44, %v5581_v44 }
 0x462   :  { %v3862_v50 = vpop.f32.mrf.mxu0 }
 0x463   :  { %v5587_v51 = vadd.f32 %v3861_v48, %v5380_v60  ;;  %1193 = vadd.xlane.f32.xlu1 %v1136_v49 }
 0x464   :  { %v3863_v53 = vpop.f32.mrf.mxu0 }
 0x465   :  { %1105 = vst [vmem:[#allocation2 + $0xd0] sm:$0xff] %v5587_v51  ;;  %v3864_v54 = vadd.f32 %v3863_v53, %v3862_v50  ;;  %v1137_v56 = vmul.f32 %v5587_v51, %v5587_v51 }
 0x466   :  { %v3865_v58 = vpop.f32.mrf.mxu0 }
 0x467   :  { %v5593_v2 = vadd.f32 %v3864_v54, %v5380_v60  ;;  %1195 = vadd.xlane.f32.xlu0 %v1137_v56 }
 0x468   :  { %v3866_v5 = vpop.f32.mrf.mxu0 }
 0x469   :  { %1106 = vst [vmem:[#allocation2 + $0xd8] sm:$0xff] %v5593_v2  ;;  %v3867_v8 = vadd.f32 %v3866_v5, %v3865_v58  ;;  %v1138_v9 = vmul.f32 %v5593_v2, %v5593_v2 }
 0x46a   :  { %v3868_v13 = vpop.f32.mrf.mxu0 }
 0x46b   :  { %v5599_v14 = vadd.f32 %v3867_v8, %v5380_v60  ;;  %1197 = vadd.xlane.f32.xlu1 %v1138_v9 }
 0x46c   :  { %v3869_v15 = vpop.f32.mrf.mxu0 }
 0x46d   :  { %1107 = vst [vmem:[#allocation2 + $0xe0] sm:$0xff] %v5599_v14  ;;  %v3870_v16 = vadd.f32 %v3869_v15, %v3868_v13  ;;  %v1139_v25 = vmul.f32 %v5599_v14, %v5599_v14 }
 0x46e   :  { %v3871_v30 = vpop.f32.mrf.mxu0 }
 0x46f   :  { %v5605_v19 = vadd.f32 %v3870_v16, %v5380_v60  ;;  %1199 = vadd.xlane.f32.xlu0 %v1139_v25 }
 0x470   :  { %v3872_v34 = vpop.f32.mrf.mxu0 }
 0x471   :  { %1108 = vst [vmem:[#allocation2 + $0xe8] sm:$0xff] %v5605_v19  ;;  %v3873_v24 = vadd.f32 %v3872_v34, %v3871_v30  ;;  %v1140_v63 = vmul.f32 %v5605_v19, %v5605_v19 }
 0x472   :  { %v3874_v1 = vpop.f32.mrf.mxu0 }
 0x473   :  { %v5611_v3 = vadd.f32 %v3873_v24, %v5380_v60  ;;  %1201 = vadd.xlane.f32.xlu1 %v1140_v63 }
 0x474   :  { %v3875_v6 = vpop.f32.mrf.mxu0 }
 0x475   :  { %1109 = vst [vmem:[#allocation2 + $0xf0] sm:$0xff] %v5611_v3  ;;  %v3876_v20 = vadd.f32 %v3875_v6, %v3874_v1  ;;  %v1141_v22 = vmul.f32 %v5611_v3, %v5611_v3 }
 0x477   :  { %v5617_v29 = vadd.f32 %v3876_v20, %v5380_v60  ;;  %1203 = vadd.xlane.f32.xlu0 %v1141_v22 }
 0x479   :  { %1110 = vst [vmem:[#allocation2 + $0xf8] sm:$0xff] %v5617_v29  ;;  %v1142_v59 = vmul.f32 %v5617_v29, %v5617_v29 }
 0x47b   :  { %1205 = vadd.xlane.f32.xlu1 %v1142_v59 }
 0x488   :  { %v1144_v26 = vpop.xlane.xlu0 %1143 }
 0x489   :  { %v1207_v36 = vadd.f32 1e-12, %v1144_v26 }
 0x48b   :  { %4368 = vrsqrt.f32 %v1207_v36 }
 0x48c   :  { %v1146_v28 = vpop.xlane.xlu0 %1145 }
 0x48d   :  { %v1208_v31 = vadd.f32 1e-12, %v1146_v28 }
 0x48f   :  { %4370 = vrsqrt.f32 %v1208_v31 }
 0x490   :  { %v1148_v40 = vpop.xlane.xlu1 %1147 }
 0x491   :  { %v1209_v42 = vadd.f32 1e-12, %v1148_v40 }
 0x493   :  { %4372 = vrsqrt.f32 %v1209_v42 }
 0x494   :  { %v1150_v43 = vpop.xlane.xlu1 %1149 }
 0x495   :  { %v1210_v45 = vadd.f32 1e-12, %v1150_v43 }
 0x497   :  { %4374 = vrsqrt.f32 %v1210_v45 }
 0x498   :  { %v1152_v60 = vpop.xlane.xlu0 %1151  ;;  %v4369_v49 = vpop.eup %4368 }
 0x499   :  { %v1211_v48 = vadd.f32 1e-12, %v1152_v60  ;;  %v1271_v56 = vmul.f32 %v4369_v49, %v5383_v7 }
 0x49b   :  { %4376 = vrsqrt.f32 %v1211_v48 }
 0x49c   :  { %v4371_v50 = vpop.eup %4370  ;;  %v1154_v53 = vpop.xlane.xlu1 %1153 }
 0x49d   :  { %v1212_v54 = vadd.f32 1e-12, %v1154_v53  ;;  %v1272_v58 = vmul.f32 %v4371_v50, %v5389_v12 }
 0x49f   :  { %4378 = vrsqrt.f32 %v1212_v54  ;;  %v5624_v5 = vpack.c.bf16 %v1272_v58, %v1271_v56 }
 0x4a0   :  { %v1156_v8 = vpop.xlane.xlu0 %1155  ;;  %v4373_v13 = vpop.eup %4372 }
 0x4a1   :  { %7612 = vst [vmem:[#allocation5_spill] sm:$0xff] %v5624_v5  ;;  %v1213_v9 = vadd.f32 1e-12, %v1156_v8  ;;  %4229 = vmatprep.mubr.bf16.mxu1 %v5624_v5  ;;  %4277 = vmatprep.mubr.bf16.mxu0 %v5624_v5  ;;  %v1273_v30 = vmul.f32 %v4373_v13, %v5395_v17 }
 0x4a3   :  { %4380 = vrsqrt.f32 %v1213_v9 }
 0x4a4   :  { %v4375_v15 = vpop.eup %4374  ;;  %v1158_v16 = vpop.xlane.xlu1 %1157 }
 0x4a5   :  { %v1214_v25 = vadd.f32 1e-12, %v1158_v16  ;;  %v1274_v7 = vmul.f32 %v4375_v15, %v5407_v38 }
 0x4a7   :  { %4382 = vrsqrt.f32 %v1214_v25  ;;  %v5630_v12 = vpack.c.bf16 %v1274_v7, %v1273_v30 }
 0x4a8   :  { %v1160_v34 = vpop.xlane.xlu0 %1159  ;;  %v4377_v63 = vpop.eup %4376 }
 0x4a9   :  { %7613 = vst [vmem:[#allocation6_spill] sm:$0xff] %v5630_v12  ;;  %v1215_v24 = vadd.f32 1e-12, %v1160_v34  ;;  %4230 = vmatmul.mubr.bf16.vlgmr.msra.gmra.mxu1 %v5630_v12  ;;  %v1275_v22 = vmul.f32 %v4377_v63, %v5419_v37 }
 0x4ab   :  { %4384 = vrsqrt.f32 %v1215_v24 }
 0x4ac   :  { %v4379_v1 = vpop.eup %4378  ;;  %v1162_v6 = vpop.xlane.xlu1 %1161 }
 0x4ad   :  { %v1216_v20 = vadd.f32 1e-12, %v1162_v6  ;;  %v1276_v59 = vmul.f32 %v4379_v1, %v5431_v57 }
 0x4af   :  { %4386 = vrsqrt.f32 %v1216_v20  ;;  %v5635_v17 = vpack.c.bf16 %v1276_v59, %v1275_v22 }
 0x4b0   :  { %v1164_v38 = vpop.xlane.xlu0 %1163  ;;  %v4381_v36 = vpop.eup %4380 }
 0x4b1   :  { %7614 = vst [vmem:[#allocation7_spill] sm:$0xff] %v5635_v17  ;;  %v1217_v26 = vadd.f32 1e-12, %v1164_v38  ;;  %4233 = vmatprep.mubr.bf16.mxu1 %v5635_v17  ;;  %v1277_v42 = vmul.f32 %v4381_v36, %v5443_v35 }
 0x4b3   :  { %4388 = vrsqrt.f32 %v1217_v26 }
 0x4b4   :  { %v4383_v28 = vpop.eup %4382  ;;  %v1166_v31 = vpop.xlane.xlu1 %1165 }
 0x4b5   :  { %v1218_v40 = vadd.f32 1e-12, %v1166_v31  ;;  %v1278_v43 = vmul.f32 %v4383_v28, %v5455_v47 }
 0x4b7   :  { %4390 = vrsqrt.f32 %v1218_v40  ;;  %v5640_v37 = vpack.c.bf16 %v1278_v43, %v1277_v42 }
 0x4b8   :  { %v1168_v57 = vpop.xlane.xlu0 %1167  ;;  %v4385_v60 = vpop.eup %4384 }
 0x4b9   :  { %7615 = vst [vmem:[#allocation8_spill] sm:$0xff] %v5640_v37  ;;  %v1219_v45 = vadd.f32 1e-12, %v1168_v57  ;;  %4234 = vmatmul.mubr.bf16.gmra.mxu1 %v5640_v37  ;;  %v1279_v53 = vmul.f32 %v4385_v60, %v5467_v55 }
 0x4bb   :  { %4392 = vrsqrt.f32 %v1219_v45 }
 0x4bc   :  { %v4387_v48 = vpop.eup %4386  ;;  %v1170_v49 = vpop.xlane.xlu1 %1169 }
 0x4bd   :  { %v1220_v50 = vadd.f32 1e-12, %v1170_v49  ;;  %v1280_v54 = vmul.f32 %v4387_v48, %v5479_v10 }
 0x4bf   :  { %4394 = vrsqrt.f32 %v1220_v50  ;;  %v5645_v35 = vpack.c.bf16 %v1280_v54, %v1279_v53 }
 0x4c0   :  { %v1172_v47 = vpop.xlane.xlu0 %1171  ;;  %v4389_v58 = vpop.eup %4388 }
 0x4c1   :  { %7616 = vst [vmem:[#allocation9_spill] sm:$0xff] %v5645_v35  ;;  %v1221_v56 = vadd.f32 1e-12, %v1172_v47  ;;  %4237 = vmatprep.mubr.bf16.mxu1 %v5645_v35  ;;  %v1281_v15 = vmul.f32 %v4389_v58, %v5491_v27 }
 0x4c3   :  { %4396 = vrsqrt.f32 %v1221_v56 }
 0x4c4   :  { %v4391_v8 = vpop.eup %4390  ;;  %v1174_v9 = vpop.xlane.xlu1 %1173 }
 0x4c5   :  { %v1222_v13 = vadd.f32 1e-12, %v1174_v9  ;;  %v1282_v16 = vmul.f32 %v4391_v8, %v5497_v61 }
 0x4c7   :  { %4398 = vrsqrt.f32 %v1222_v13  ;;  %v5650_v55 = vpack.c.bf16 %v1282_v16, %v1281_v15 }
 0x4c8   :  { %v1176_v10 = vpop.xlane.xlu0 %1175  ;;  %v4393_v30 = vpop.eup %4392 }
 0x4c9   :  { %7617 = vst [vmem:[#allocation10_spill] sm:$0xff] %v5650_v55  ;;  %v1223_v25 = vadd.f32 1e-12, %v1176_v10  ;;  %4238 = vmatmul.mubr.bf16.gmra.mxu1 %v5650_v55  ;;  %v1283_v63 = vmul.f32 %v4393_v30, %v5503_v4 }
 0x4cb   :  { %4400 = vrsqrt.f32 %v1223_v25 }
 0x4cc   :  { %v4395_v7 = vpop.eup %4394  ;;  %v1178_v34 = vpop.xlane.xlu1 %1177 }
 0x4cd   :  { %v1224_v24 = vadd.f32 1e-12, %v1178_v34  ;;  %v1284_v1 = vmul.f32 %v4395_v7, %v5509_v32 }
 0x4cf   :  { %4402 = vrsqrt.f32 %v1224_v24  ;;  %v5655_v27 = vpack.c.bf16 %v1284_v1, %v1283_v63 }
 0x4d0   :  { %v1180_v61 = vpop.xlane.xlu0 %1179  ;;  %v4397_v20 = vpop.eup %4396 }
 0x4d1   :  { %7618 = vst [vmem:[#allocation11_spill] sm:$0xff] %v5655_v27  ;;  %v1225_v6 = vadd.f32 1e-12, %v1180_v61  ;;  %4241 = vmatprep.mubr.bf16.mxu1 %v5655_v27  ;;  %v1285_v26 = vmul.f32 %v4397_v20, %v5515_v23 }
 0x4d3   :  { %4404 = vrsqrt.f32 %v1225_v6 }
 0x4d4   :  { %v4399_v22 = vpop.eup %4398  ;;  %v1182_v59 = vpop.xlane.xlu1 %1181 }
 0x4d5   :  { %v1226_v38 = vadd.f32 1e-12, %v1182_v59  ;;  %v1286_v36 = vmul.f32 %v4399_v22, %v5521_v41 }
 0x4d7   :  { %4406 = vrsqrt.f32 %v1226_v38  ;;  %v5660_v4 = vpack.c.bf16 %v1286_v36, %v1285_v26 }
 0x4d8   :  { %v1184_v32 = vpop.xlane.xlu0 %1183  ;;  %v4401_v31 = vpop.eup %4400 }
 0x4d9   :  { %7619 = vst [vmem:[#allocation12_spill] sm:$0xff] %v5660_v4  ;;  %v1227_v28 = vadd.f32 1e-12, %v1184_v32  ;;  %4242 = vmatmul.mubr.bf16.gmra.mxu1 %v5660_v4  ;;  %v1287_v57 = vmul.f32 %v4401_v31, %v5527_v46 }
 0x4db   :  { %4408 = vrsqrt.f32 %v1227_v28 }
 0x4dc   :  { %v4403_v40 = vpop.eup %4402  ;;  %v1186_v42 = vpop.xlane.xlu1 %1185 }
 0x4dd   :  { %v1228_v43 = vadd.f32 1e-12, %v1186_v42  ;;  %v1288_v45 = vmul.f32 %v4403_v40, %v5533_v52 }
 0x4df   :  { %4410 = vrsqrt.f32 %v1228_v43  ;;  %v5665_v23 = vpack.c.bf16 %v1288_v45, %v1287_v57 }
 0x4e0   :  { %v1188_v41 = vpop.xlane.xlu0 %1187  ;;  %v4405_v48 = vpop.eup %4404 }
 0x4e1   :  { %7620 = vst [vmem:[#allocation13_spill] sm:$0xff] %v5665_v23  ;;  %v1229_v60 = vadd.f32 1e-12, %v1188_v41  ;;  %4245 = vmatprep.mubr.bf16.mxu1 %v5665_v23  ;;  %v1289_v54 = vmul.f32 %v4405_v48, %v5539_v62 }
 0x4e3   :  { %4412 = vrsqrt.f32 %v1229_v60 }
 0x4e4   :  { %v4407_v49 = vpop.eup %4406  ;;  %v1190_v50 = vpop.xlane.xlu1 %1189 }
 0x4e5   :  { %v1230_v53 = vadd.f32 1e-12, %v1190_v50  ;;  %v1290_v47 = vmul.f32 %v4407_v49, %v5545_v11 }
 0x4e7   :  { %4414 = vrsqrt.f32 %v1230_v53  ;;  %v5670_v46 = vpack.c.bf16 %v1290_v47, %v1289_v54 }
 0x4e8   :  { %v1192_v52 = vpop.xlane.xlu0 %1191  ;;  %v4409_v58 = vpop.eup %4408 }
 0x4e9   :  { %7621 = vst [vmem:[#allocation14_spill] sm:$0xff] %v5670_v46  ;;  %v1231_v56 = vadd.f32 1e-12, %v1192_v52  ;;  %4246 = vmatmul.mubr.bf16.gmra.mxu1 %v5670_v46  ;;  %v1291_v15 = vmul.f32 %v4409_v58, %v5551_v18 }
 0x4eb   :  { %4416 = vrsqrt.f32 %v1231_v56 }
 0x4ec   :  { %v4411_v8 = vpop.eup %4410  ;;  %v1194_v9 = vpop.xlane.xlu1 %1193 }
 0x4ed   :  { %v1232_v13 = vadd.f32 1e-12, %v1194_v9  ;;  %v1292_v16 = vmul.f32 %v4411_v8, %v5557_v39 }
 0x4ef   :  { %4418 = vrsqrt.f32 %v1232_v13  ;;  %v5675_v62 = vpack.c.bf16 %v1292_v16, %v1291_v15 }
 0x4f0   :  { %v1196_v11 = vpop.xlane.xlu0 %1195  ;;  %v4413_v25 = vpop.eup %4412 }
 0x4f1   :  { %7622 = vst [vmem:[#allocation15_spill] sm:$0xff] %v5675_v62  ;;  %v1233_v10 = vadd.f32 1e-12, %v1196_v11  ;;  %4249 = vmatprep.mubr.bf16.mxu1 %v5675_v62  ;;  %v1293_v24 = vmul.f32 %v4413_v25, %v5563_v21 }
 0x4f3   :  { %4420 = vrsqrt.f32 %v1233_v10 }
 0x4f4   :  { %v4415_v30 = vpop.eup %4414  ;;  %v1198_v7 = vpop.xlane.xlu1 %1197 }
 0x4f5   :  { %v1234_v34 = vadd.f32 1e-12, %v1198_v7  ;;  %v1294_v63 = vmul.f32 %v4415_v30, %v5569_v0 }
 0x4f7   :  { %4422 = vrsqrt.f32 %v1234_v34  ;;  %v5680_v18 = vpack.c.bf16 %v1294_v63, %v1293_v24 }
 0x4f8   :  { %v1200_v39 = vpop.xlane.xlu0 %1199  ;;  %v4417_v61 = vpop.eup %4416 }
 0x4f9   :  { %7623 = vst [vmem:[#allocation16_spill] sm:$0xff] %v5680_v18  ;;  %v1235_v1 = vadd.f32 1e-12, %v1200_v39  ;;  %4250 = vmatmul.mubr.bf16.gmra.mxu1 %v5680_v18  ;;  %v1295_v59 = vmul.f32 %v4417_v61, %v5575_v33 }
 0x4fb   :  { %4424 = vrsqrt.f32 %v1235_v1 }
 0x4fc   :  { %v4419_v6 = vpop.eup %4418  ;;  %v1202_v20 = vpop.xlane.xlu1 %1201 }
 0x4fd   :  { %v1236_v22 = vadd.f32 1e-12, %v1202_v20  ;;  %v1296_v38 = vmul.f32 %v4419_v6, %v5581_v44 }
 0x4ff   :  { %4426 = vrsqrt.f32 %v1236_v22  ;;  %v5685_v21 = vpack.c.bf16 %v1296_v38, %v1295_v59 }
 0x500   :  { %v1204_v0 = vpop.xlane.xlu0 %1203  ;;  %v4421_v36 = vpop.eup %4420 }
 0x501   :  { %7624 = vst [vmem:[#allocation17_spill] sm:$0xff] %v5685_v21  ;;  %v1237_v26 = vadd.f32 1e-12, %v1204_v0  ;;  %4253 = vmatprep.mubr.bf16.mxu1 %v5685_v21  ;;  %v1297_v40 = vmul.f32 %v4421_v36, %v5587_v51 }
 0x503   :  { %4428 = vrsqrt.f32 %v1237_v26 }
 0x504   :  { %v4423_v32 = vpop.eup %4422  ;;  %v1206_v28 = vpop.xlane.xlu1 %1205 }
 0x505   :  { %v1238_v31 = vadd.f32 1e-12, %v1206_v28  ;;  %v1298_v42 = vmul.f32 %v4423_v32, %v5593_v2 }
 0x507   :  { %4430 = vrsqrt.f32 %v1238_v31  ;;  %v5690_v33 = vpack.c.bf16 %v1298_v42, %v1297_v40 }
 0x508   :  { %v4425_v44 = vpop.eup %4424 }
 0x509   :  { %7625 = vst [vmem:[#allocation18_spill] sm:$0xff] %v5690_v33  ;;  %4254 = vmatmul.mubr.bf16.gmra.mxu1 %v5690_v33  ;;  %v1299_v57 = vmul.f32 %v4425_v44, %v5599_v14 }
 0x50c   :  { %v4427_v43 = vpop.eup %4426 }
 0x50d   :  { %v1300_v45 = vmul.f32 %v4427_v43, %v5605_v19 }
 0x50f   :  { %v5695_v41 = vpack.c.bf16 %v1300_v45, %v1299_v57 }
 0x510   :  { %v4429_v60 = vpop.eup %4428 }
 0x511   :  { %7626 = vst [vmem:[#allocation19_spill] sm:$0xff] %v5695_v41  ;;  %4257 = vmatprep.mubr.bf16.mxu1 %v5695_v41  ;;  %v1301_v51 = vmul.f32 %v4429_v60, %v5611_v3 }
 0x514   :  { %v4431_v48 = vpop.eup %4430 }
 0x515   :  { %v1302_v2 = vmul.f32 %v4431_v48, %v5617_v29 }
 0x517   :  { %v5700_v49 = vpack.c.bf16 %v1302_v2, %v1301_v51 }
 0x519   :  { %7627 = vst [vmem:[#allocation20_spill] sm:$0xff] %v5700_v49  ;;  %4258 = vmatmul.mubr.bf16.gmra.mxu1 %v5700_v49 }
 0x569   :  { %v5703_v50 = vpop.f32.mrf.mxu1 }
 0x56b   :  { %v5705_v53 = vpop.f32.mrf.mxu1 }
 0x56d   :  { %v5707_v14 = vpop.f32.mrf.mxu1 }
 0x56f   :  { %v5709_v19 = vpop.f32.mrf.mxu1 }
 0x579   :  { %v5711_v54 = vpop.f32.mrf.mxu1 }
 0x57b   :  { %v5713_v47 = vpop.f32.mrf.mxu1 }
 0x57d   :  { %v5715_v52 = vpop.f32.mrf.mxu1 }
 0x57f   :  { %v5717_v3 = vpop.f32.mrf.mxu1 }
 0x589   :  { %v4239_v29 = vpop.f32.mrf.mxu1 }
 0x58a   :  { %v5719_v56 = vmul.f32 5.0, %v4239_v29 }
 0x58b   :  { %v1409_v58 = vpop.f32.mrf.mxu1 }
 0x58c   :  { %v5721_v8 = vmul.f32 5.0, %v1409_v58  ;;  %v1567_v9 = vsel %vm1536_vm1, %v5719_v56, -inf }
 0x58d   :  { %1568 = vmax.xlane.f32.xlu0 %v1567_v9  ;;  %v4240_v13 = vpop.f32.mrf.mxu1 }
 0x58e   :  { %v5725_v15 = vmul.f32 5.0, %v4240_v13  ;;  %v1561_v10 = vsel %vm1536_vm1, %v5721_v8, -inf }
 0x58f   :  { %v1412_v16 = vpop.f32.mrf.mxu1 }
 0x590   :  { %v5727_v11 = vmul.f32 5.0, %v1412_v16  ;;  %v1570_v25 = vsel %vm1536_vm1, %v5725_v15, -inf }
 0x591   :  { %1562 = vmax.xlane.f32.xlu0 %v1561_v10  ;;  %1571 = vmax.xlane.f32.xlu1 %v1570_v25 }
 0x592   :  { %v1564_v30 = vsel %vm1536_vm1, %v5727_v11, -inf }
 0x595   :  { %1565 = vmax.xlane.f32.xlu1 %v1564_v30 }
 0x599   :  { %v4243_v7 = vpop.f32.mrf.mxu1 }
 0x59a   :  { %v5735_v34 = vmul.f32 5.0, %v4243_v7 }
 0x59b   :  { %v1425_v24 = vpop.f32.mrf.mxu1 }
 0x59c   :  { %v5737_v63 = vmul.f32 5.0, %v1425_v24  ;;  %v1579_v39 = vsel %vm1536_vm1, %v5735_v34, -inf }
 0x59d   :  { %1580 = vmax.xlane.f32.xlu0 %v1579_v39  ;;  %v4244_v1 = vpop.f32.mrf.mxu1 }
 0x59e   :  { %v5741_v61 = vmul.f32 5.0, %v4244_v1  ;;  %v1573_v22 = vsel %vm1536_vm1, %v5737_v63, -inf }
 0x59f   :  { %v1428_v6 = vpop.f32.mrf.mxu1 }
 0x5a0   :  { %v5743_v20 = vmul.f32 5.0, %v1428_v6  ;;  %v1582_v59 = vsel %vm1536_vm1, %v5741_v61, -inf }
 0x5a1   :  { %1574 = vmax.xlane.f32.xlu0 %v1573_v22  ;;  %1583 = vmax.xlane.f32.xlu1 %v1582_v59 }
 0x5a2   :  { %v1576_v38 = vsel %vm1536_vm1, %v5743_v20, -inf }
 0x5a5   :  { %1577 = vmax.xlane.f32.xlu1 %v1576_v38 }
 0x5a9   :  { %v4247_v0 = vpop.f32.mrf.mxu1 }
 0x5ab   :  { %v5751_v26 = vpop.f32.mrf.mxu1 }
 0x5ad   :  { %v4248_v36 = vpop.f32.mrf.mxu1 }
 0x5af   :  { %v5753_v32 = vpop.f32.mrf.mxu1 }
 0x5b9   :  { %v4251_v28 = vpop.f32.mrf.mxu1 }
 0x5ba   :  { %v5755_v31 = vmul.f32 5.0, %v4251_v28  ;;  %v5788_v28 = vmul.f32 5.0, %v5711_v54 }
 0x5bb   :  { %v1457_v40 = vpop.f32.mrf.mxu1 }
 0x5bc   :  { %v1603_v42 = vsel %vm1536_vm1, %v5755_v31, -inf }
 0x5bd   :  { %1604 = vmax.xlane.f32.xlu0 %v1603_v42  ;;  %v4252_v44 = vpop.f32.mrf.mxu1 }
 0x5be   :  { %v5759_v43 = vmul.f32 5.0, %v4252_v44 }
 0x5bf   :  { %v1460_v45 = vpop.f32.mrf.mxu1 }
 0x5c0   :  { %v1606_v57 = vsel %vm1536_vm1, %v5759_v43, -inf }
 0x5c1   :  { %1607 = vmax.xlane.f32.xlu1 %v1606_v57 }
 0x5c9   :  { %v4255_v60 = vpop.f32.mrf.mxu1 }
 0x5ca   :  { %v5763_v48 = vmul.f32 5.0, %v4255_v60  ;;  %v5797_v60 = vmul.f32 5.0, %v5715_v52 }
 0x5cb   :  { %v1473_v51 = vpop.f32.mrf.mxu1 }
 0x5cc   :  { %v5765_v2 = vmul.f32 5.0, %v1473_v51  ;;  %v1615_v29 = vsel %vm1536_vm1, %v5763_v48, -inf  ;;  %v5799_v51 = vmul.f32 5.0, %v1457_v40  ;;  %v1558_v52 = vsel %vm1536_vm1, %v5797_v60, -inf }
 0x5cd   :  { %1616 = vmax.xlane.f32.xlu0 %v1615_v29  ;;  %v4256_v58 = vpop.f32.mrf.mxu1  ;;  %v1555_v29 = vsel %vm1536_vm1, %v5788_v28, -inf  ;;  %v5815_v40 = vmul.f32 5.0, %v5717_v3 }
 0x5ce   :  { %v5769_v9 = vmul.f32 5.0, %v4256_v58  ;;  %v1609_v10 = vsel %vm1536_vm1, %v5765_v2, -inf  ;;  %v5806_v58 = vmul.f32 5.0, %v5713_v47 }
 0x5cf   :  { %v1476_v13 = vpop.f32.mrf.mxu1  ;;  %v1552_v3 = vsel %vm1536_vm1, %v5815_v40, -inf }
 0x5d0   :  { %v5771_v16 = vmul.f32 5.0, %v1476_v13  ;;  %v1618_v25 = vsel %vm1536_vm1, %v5769_v9, -inf  ;;  %v5808_v13 = vmul.f32 5.0, %v1460_v45  ;;  %v1506_v45 = vmul.f32 5.0, %v5703_v50 }
 0x5d1   :  { %1610 = vmax.xlane.f32.xlu0 %v1609_v10  ;;  %1619 = vmax.xlane.f32.xlu1 %v1618_v25  ;;  %v1597_v10 = vsel %vm1536_vm1, %v5799_v51, -inf  ;;  %v5817_v25 = vmul.f32 5.0, %v4247_v0  ;;  %v1507_v0 = vmul.f32 5.0, %v5707_v14 }
 0x5d2   :  { %v1612_v30 = vsel %vm1536_vm1, %v5771_v16, -inf  ;;  %v1600_v47 = vsel %vm1536_vm1, %v5808_v13, -inf }
 0x5d3   :  { %v1546_v14 = vsel %vm1536_vm1, %v1507_v0, -inf }
 0x5d5   :  { %1613 = vmax.xlane.f32.xlu1 %v1612_v30  ;;  %v1549_v30 = vsel %vm1536_vm1, %v5806_v58, -inf }
 0x5d9   :  { %v4259_v7 = vpop.f32.mrf.mxu1 }
 0x5da   :  { %v5779_v24 = vmul.f32 5.0, %v4259_v7  ;;  %v5824_v7 = vmul.f32 5.0, %v4248_v36  ;;  %v5838_v36 = vmul.f32 5.0, %v5705_v53 }
 0x5db   :  { %v1489_v39 = vpop.f32.mrf.mxu1 }
 0x5dc   :  { %v5781_v1 = vmul.f32 5.0, %v1489_v39  ;;  %v1627_v6 = vsel %vm1536_vm1, %v5779_v24, -inf  ;;  %v1591_v39 = vsel %vm1536_vm1, %v5817_v25, -inf  ;;  %v1594_v50 = vsel %vm1536_vm1, %v5824_v7, -inf  ;;  %7631 = vst [vmem:[#allocation24_spill] sm:$0xff] %v5838_v36 }
 0x5dd   :  { %1628 = vmax.xlane.f32.xlu0 %v1627_v6  ;;  %v4260_v22 = vpop.f32.mrf.mxu1  ;;  %v5832_v6 = vmul.f32 5.0, %v5751_v26  ;;  %v5847_v26 = vmul.f32 5.0, %v5709_v19 }
 0x5de   :  { %7628 = vst [vmem:[#allocation21_spill] sm:$0xff] %v5781_v1  ;;  %v5785_v59 = vmul.f32 5.0, %v4260_v22  ;;  %v1621_v44 = vsel %vm1536_vm1, %v5781_v1, -inf  ;;  %v1543_v22 = vsel %vm1536_vm1, %v1506_v45, -inf }
 0x5df   :  { %v1492_v38 = vpop.f32.mrf.mxu1  ;;  %7630 = vst [vmem:[#allocation23_spill] sm:$0xff] %v5832_v6  ;;  %7633 = vst [vmem:[#allocation26_spill] sm:$0xff] %v5847_v26 }
 0x5e0   :  { %v5790_v42 = vmul.f32 5.0, %v1492_v38  ;;  %v1630_v57 = vsel %vm1536_vm1, %v5785_v59, -inf  ;;  %v5841_v38 = vmul.f32 5.0, %v5753_v32  ;;  %v1540_v32 = vsel %vm1536_vm1, %v5847_v26, -inf }
 0x5e1   :  { %1622 = vmax.xlane.f32.xlu0 %v1621_v44  ;;  %1631 = vmax.xlane.f32.xlu1 %v1630_v57  ;;  %v1585_v44 = vsel %vm1536_vm1, %v5832_v6, -inf  ;;  %v1537_v57 = vsel %vm1536_vm1, %v5838_v36, -inf }
 0x5e2   :  { %7629 = vst [vmem:[#allocation22_spill] sm:$0xff] %v5790_v42  ;;  %v1624_v54 = vsel %vm1536_vm1, %v5790_v42, -inf  ;;  %7632 = vst [vmem:[#allocation25_spill] sm:$0xff] %v5841_v38  ;;  %v1588_v53 = vsel %vm1536_vm1, %v5841_v38, -inf }
 0x5e5   :  { %1556 = vmax.xlane.f32.xlu0 %v1555_v29  ;;  %1625 = vmax.xlane.f32.xlu1 %v1624_v54 }
 0x5e9   :  { %1598 = vmax.xlane.f32.xlu0 %v1597_v10  ;;  %1559 = vmax.xlane.f32.xlu1 %v1558_v52 }
 0x5ed   :  { %1550 = vmax.xlane.f32.xlu0 %v1549_v30  ;;  %1601 = vmax.xlane.f32.xlu1 %v1600_v47 }
 0x5f1   :  { %1592 = vmax.xlane.f32.xlu0 %v1591_v39  ;;  %1553 = vmax.xlane.f32.xlu1 %v1552_v3 }
 0x5f5   :  { %1544 = vmax.xlane.f32.xlu0 %v1543_v22  ;;  %1595 = vmax.xlane.f32.xlu1 %v1594_v50 }
 0x5f9   :  { %1586 = vmax.xlane.f32.xlu0 %v1585_v44  ;;  %1547 = vmax.xlane.f32.xlu1 %v1546_v14 }
 0x5fd   :  { %1538 = vmax.xlane.f32.xlu0 %v1537_v57  ;;  %1589 = vmax.xlane.f32.xlu1 %v1588_v53 }
 0x601   :  { %1541 = vmax.xlane.f32.xlu1 %v1540_v32 }
 0x616   :  { %v1569_v29 = vpop.xlane.xlu0 %1568 }
 0x617   :  { %v1643_v1 = vsub.f32 %v5719_v56, %v1569_v29 }
 0x61a   :  { %v1572_v54 = vpop.xlane.xlu1 %1571  ;;  %v1563_v10 = vpop.xlane.xlu0 %1562 }
 0x61e   :  { %v1566_v52 = vpop.xlane.xlu1 %1565 }
 0x626   :  { %v1581_v30 = vpop.xlane.xlu0 %1580 }
 0x62a   :  { %v1584_v47 = vpop.xlane.xlu1 %1583  ;;  %v5855_v19 = vpop.xlane.xlu0 %1574 }
 0x62e   :  { %v5857_v39 = vpop.xlane.xlu1 %1577 }
 0x646   :  { %v5859_v3 = vpop.xlane.xlu0 %1604 }
 0x64a   :  { %v5861_v22 = vpop.xlane.xlu1 %1607 }
 0x656   :  { %v5863_v50 = vpop.xlane.xlu0 %1616 }
 0x65a   :  { %v5865_v44 = vpop.xlane.xlu1 %1619  ;;  %v5867_v14 = vpop.xlane.xlu0 %1610 }
 0x65e   :  { %v5869_v57 = vpop.xlane.xlu1 %1613 }
 0x666   :  { %v5871_v53 = vpop.xlane.xlu0 %1628 }
 0x66a   :  { %v5873_v32 = vpop.xlane.xlu1 %1631  ;;  %v5875_v4 = vpop.xlane.xlu0 %1622 }
 0x66e   :  { %v5877_v49 = vpop.xlane.xlu1 %1625  ;;  %v1557_v27 = vpop.xlane.xlu0 %1556 }
 0x66f   :  { %7634 = vst [vmem:[#allocation27_spill] sm:$0xff] %v5877_v49  ;;  %v1639_v18 = vsub.f32 %v5788_v28, %v1557_v27 }
 0x671   :  { %v1677_v23 = vmul.f32 1.442695, %v1639_v18  ;;  %v1641_v18 = vsub.f32 %v5721_v8, %v1563_v10  ;;  %v1645_v8 = vsub.f32 %v5737_v63, %v5855_v19 }
 0x672   :  { %v1560_v41 = vpop.xlane.xlu1 %1559  ;;  %v5879_v55 = vpop.xlane.xlu0 %1598 }
 0x673   :  { %v1640_v46 = vsub.f32 %v5797_v60, %v1560_v41  ;;  %v1689_v63 = vmul.f32 1.442695, %v1645_v8 }
 0x675   :  { %v1679_v6 = vmul.f32 1.442695, %v1640_v46  ;;  %v1681_v46 = vmul.f32 1.442695, %v1641_v18 }
 0x676   :  { %v5881_v33 = vpop.xlane.xlu1 %1601  ;;  %v1551_v35 = vpop.xlane.xlu0 %1550 }
 0x677   :  { %v1637_v26 = vsub.f32 %v5806_v58, %v1551_v35 }
 0x679   :  { %v1673_v27 = vmul.f32 1.442695, %v1637_v26 }
 0x67a   :  { %v1554_v21 = vpop.xlane.xlu1 %1553  ;;  %v1593_v37 = vpop.xlane.xlu0 %1592 }
 0x67b   :  { %v1638_v42 = vsub.f32 %v5815_v40, %v1554_v21  ;;  %v1647_v21 = vsub.f32 %v5735_v34, %v1581_v30  ;;  %v1651_v58 = vsub.f32 %v5817_v25, %v1593_v37  ;;  %v1655_v37 = vsub.f32 %v5755_v31, %v5859_v3 }
 0x67c   :  { %v1653_v31 = vsub.f32 %v5799_v51, %v5879_v55  ;;  %v1659_v55 = vsub.f32 %v5763_v48, %v5863_v50  ;;  %v1657_v48 = vsub.f32 %v5765_v2, %v5867_v14  ;;  %v1663_v14 = vsub.f32 %v5779_v24, %v5871_v53  ;;  %v7635_v53 = vld [vmem:[#allocation21_spill] sm:$0xff] }
 0x67d   :  { %v1675_v41 = vmul.f32 1.442695, %v1638_v42  ;;  %v1646_v42 = vsub.f32 %v5743_v20, %v5857_v39  ;;  %v1701_v25 = vmul.f32 1.442695, %v1651_v58  ;;  %v1709_v10 = vmul.f32 1.442695, %v1655_v37 }
 0x67e   :  { %v5884_v17 = vpop.xlane.xlu1 %1595  ;;  %v1545_v62 = vpop.xlane.xlu0 %1544  ;;  %v1705_v51 = vmul.f32 1.442695, %v1653_v31  ;;  %v1713_v2 = vmul.f32 1.442695, %v1657_v48  ;;  %v1725_v24 = vmul.f32 1.442695, %v1663_v14 }
 0x67f   :  { %v1635_v12 = vsub.f32 %v1506_v45, %v1545_v62  ;;  %v1644_v62 = vsub.f32 %v5725_v15, %v1572_v54  ;;  %v1693_v15 = vmul.f32 1.442695, %v1647_v21  ;;  %v1652_v20 = vsub.f32 %v5824_v7, %v5884_v17  ;;  %v7640_v31 = vld [vmem:[#allocation24_spill] sm:$0xff] }
 0x680   :  { %v1656_v17 = vsub.f32 %v5759_v43, %v5861_v22  ;;  %v1654_v43 = vsub.f32 %v5808_v13, %v5881_v33  ;;  %v1660_v33 = vsub.f32 %v5769_v9, %v5865_v44  ;;  %v1658_v9 = vsub.f32 %v5771_v16, %v5869_v57 }
 0x681   :  { %v1669_v5 = vmul.f32 1.442695, %v1635_v12  ;;  %v1685_v12 = vmul.f32 1.442695, %v1643_v1  ;;  %v1687_v35 = vmul.f32 1.442695, %v1644_v62  ;;  %v1664_v57 = vsub.f32 %v5785_v59, %v5873_v32 }
 0x682   :  { %v1548_v36 = vpop.xlane.xlu1 %1547  ;;  %v1703_v7 = vmul.f32 1.442695, %v1652_v20  ;;  %v1707_v13 = vmul.f32 1.442695, %v1654_v43  ;;  %v1719_v18 = vmul.f32 1.442695, %v1660_v33  ;;  %v1587_v21 = vpop.xlane.xlu0 %1586 }
 0x683   :  { %v1636_v38 = vsub.f32 %v1507_v0, %v1548_v36  ;;  %4432 = vpow2.f32 %v1669_v5  ;;  %v1642_v5 = vsub.f32 %v5727_v11, %v1566_v52  ;;  %v1691_v0 = vmul.f32 1.442695, %v1646_v42  ;;  %v7636_v32 = vld [vmem:[#allocation27_spill] sm:$0xff]  ;;  %v7637_v42 = vld [vmem:[#allocation22_spill] sm:$0xff] }
 0x684   :  { %4434 = vpow2.f32 %v1677_v23  ;;  %v1715_v16 = vmul.f32 1.442695, %v1658_v9  ;;  %v1727_v59 = vmul.f32 1.442695, %v1664_v57 }
 0x685   :  { %v1671_v49 = vmul.f32 1.442695, %v1636_v38  ;;  %v1683_v23 = vmul.f32 1.442695, %v1642_v5 }
 0x686   :  { %v1539_v37 = vpop.xlane.xlu0 %1538 }
 0x687   :  { %4436 = vpow2.f32 %v1671_v49  ;;  %v1648_v49 = vsub.f32 %v5741_v61, %v1584_v47  ;;  %v1711_v47 = vmul.f32 1.442695, %v1656_v17 }
 0x688   :  { %4438 = vpow2.f32 %v1679_v6 }
 0x689   :  { %4440 = vpow2.f32 %v1673_v27  ;;  %v1695_v34 = vmul.f32 1.442695, %v1648_v49 }
 0x68a   :  { %4442 = vpow2.f32 %v1675_v41  ;;  %v1717_v41 = vmul.f32 1.442695, %v1659_v55 }
 0x68b   :  { %4444 = vpow2.f32 %v1685_v12 }
 0x68c   :  { %4446 = vpow2.f32 %v1687_v35 }
 0x68d   :  { %4448 = vpow2.f32 %v1681_v46 }
 0x68e   :  { %4450 = vpow2.f32 %v1683_v23 }
 0x68f   :  { %4452 = vpow2.f32 %v1693_v15  ;;  %v1661_v15 = vsub.f32 %v7635_v53, %v5875_v4 }
 0x690   :  { %v5894_v56 = vpop.eup %4432  ;;  %4454 = vpow2.f32 %v1695_v34  ;;  %v1590_v34 = vpop.xlane.xlu1 %1589 }
 0x691   :  { %v1735_v1 = vsel %vm1536_vm1, %v5894_v56, 0.0  ;;  %v5901_v11 = vpop.eup %4434  ;;  %4456 = vpow2.f32 %v1689_v63  ;;  %v1721_v4 = vmul.f32 1.442695, %v1661_v15 }
 0x692   :  { %1736 = vadd.xlane.f32.xlu0 %v1735_v1  ;;  %v1747_v40 = vsel %vm1536_vm1, %v5901_v11, 0.0  ;;  %4458 = vpow2.f32 %v1691_v0 }
 0x693   :  { %4460 = vpow2.f32 %v1701_v25 }
 0x694   :  { %v5903_v28 = vpop.eup %4436  ;;  %4462 = vpow2.f32 %v1703_v7 }
 0x695   :  { %v1738_v61 = vsel %vm1536_vm1, %v5903_v28, 0.0  ;;  %v5909_v60 = vpop.eup %4438  ;;  %4464 = vpow2.f32 %v1709_v10 }
 0x696   :  { %1739 = vadd.xlane.f32.xlu1 %v1738_v61  ;;  %v5914_v45 = vpop.eup %4440  ;;  %1748 = vadd.xlane.f32.xlu0 %v1747_v40  ;;  %v1750_v6 = vsel %vm1536_vm1, %v5909_v60, 0.0  ;;  %4466 = vpow2.f32 %v1711_v47  ;;  %v1662_v61 = vsub.f32 %v7637_v42, %v7636_v32  ;;  %v7638_v40 = vld [vmem:[#allocation23_spill] sm:$0xff]  ;;  %v1542_v47 = vpop.xlane.xlu1 %1541 }
 0x697   :  { %v5920_v36 = vpop.eup %4442  ;;  %v1741_v38 = vsel %vm1536_vm1, %v5914_v45, 0.0  ;;  %4468 = vpow2.f32 %v1705_v51  ;;  %v1649_v0 = vsub.f32 %v7638_v40, %v1587_v21  ;;  %v7641_v51 = vld [vmem:[#allocation26_spill] sm:$0xff]  ;;  %v7643_v40 = vld [vmem:[#allocation5_spill] sm:$0xff] }
 0x698   :  { %v5926_v26 = vpop.eup %4444  ;;  %v1744_v29 = vsel %vm1536_vm1, %v5920_v36, 0.0  ;;  %4470 = vpow2.f32 %v1707_v13  ;;  %v1723_v25 = vmul.f32 1.442695, %v1662_v61 }
 0x699   :  { %v5932_v54 = vpop.eup %4446  ;;  %v1759_v52 = vsel %vm1536_vm1, %v5926_v26, 0.0  ;;  %4472 = vpow2.f32 %v1717_v41  ;;  %v1697_v10 = vmul.f32 1.442695, %v1649_v0  ;;  %v7644_v0 = vld [vmem:[#allocation14_spill] sm:$0xff] }
 0x69a   :  { %1751 = vadd.xlane.f32.xlu1 %v1750_v6  ;;  %1742 = vadd.xlane.f32.xlu0 %v1741_v38  ;;  %v5938_v30 = vpop.eup %4448  ;;  %v1762_v19 = vsel %vm1536_vm1, %v5932_v54, 0.0  ;;  %4474 = vpow2.f32 %v1719_v18  ;;  %v7639_v38 = vld [vmem:[#allocation25_spill] sm:$0xff] }
 0x69b   :  { %v5944_v39 = vpop.eup %4450  ;;  %v1753_v3 = vsel %vm1536_vm1, %v5938_v30, 0.0  ;;  %4476 = vpow2.f32 %v1713_v2  ;;  %v1650_v17 = vsub.f32 %v7639_v38, %v1590_v34  ;;  %v7648_v38 = vld [vmem:[#allocation16_spill] sm:$0xff] }
 0x69c   :  { %v5950_v22 = vpop.eup %4452  ;;  %v1756_v27 = vsel %vm1536_vm1, %v5944_v39, 0.0  ;;  %4478 = vpow2.f32 %v1715_v16 }
 0x69d   :  { %v5956_v62 = vpop.eup %4454  ;;  %v1771_v50 = vsel %vm1536_vm1, %v5950_v22, 0.0  ;;  %4480 = vpow2.f32 %v1725_v24  ;;  %v1699_v55 = vmul.f32 1.442695, %v1650_v17  ;;  %v7649_v17 = vld [vmem:[#allocation8_spill] sm:$0xff] }
 0x69e   :  { %1745 = vadd.xlane.f32.xlu1 %v1744_v29  ;;  %1760 = vadd.xlane.f32.xlu0 %v1759_v52  ;;  %v5962_v12 = vpop.eup %4456  ;;  %v1774_v44 = vsel %vm1536_vm1, %v5956_v62, 0.0  ;;  %4482 = vpow2.f32 %v1727_v59  ;;  %v1633_v52 = vsub.f32 %v7640_v31, %v1539_v37  ;;  %v7646_v37 = vld [vmem:[#allocation15_spill] sm:$0xff]  ;;  %v7652_v31 = vld [vmem:[#allocation18_spill] sm:$0xff] }
 0x69f   :  { %v5968_v35 = vpop.eup %4458  ;;  %v1765_v5 = vsel %vm1536_vm1, %v5962_v12, 0.0  ;;  %4484 = vpow2.f32 %v1721_v4  ;;  %v7642_v4 = vld [vmem:[#allocation13_spill] sm:$0xff] }
 0x6a0   :  { %v5974_v46 = vpop.eup %4460  ;;  %v1768_v23 = vsel %vm1536_vm1, %v5968_v35, 0.0  ;;  %4486 = vpow2.f32 %v1723_v25  ;;  %v7647_v25 = vld [vmem:[#allocation7_spill] sm:$0xff] }
 0x6a1   :  { %v5980_v49 = vpop.eup %4462  ;;  %v1783_v8 = vsel %vm1536_vm1, %v5974_v46, 0.0  ;;  %4488 = vpow2.f32 %v1697_v10  ;;  %v7651_v10 = vld [vmem:[#allocation9_spill] sm:$0xff] }
 0x6a2   :  { %1763 = vadd.xlane.f32.xlu1 %v1762_v19  ;;  %1754 = vadd.xlane.f32.xlu0 %v1753_v3  ;;  %v5986_v1 = vpop.eup %4464  ;;  %v1786_v63 = vsel %vm1536_vm1, %v5980_v49, 0.0  ;;  %v1634_v3 = vsub.f32 %v7641_v51, %v1542_v47  ;;  %4490 = vpow2.f32 %v1699_v55  ;;  %v7654_v47 = vld [vmem:[#allocation19_spill] sm:$0xff]  ;;  %v7656_v55 = vld [vmem:[#allocation20_spill] sm:$0xff] }
 0x6a3   :  { %v5992_v58 = vpop.eup %4466  ;;  %v1795_v20 = vsel %vm1536_vm1, %v5986_v1, 0.0  ;;  %v7657_v51 = vld [vmem:[#allocation12_spill] sm:$0xff] }
 0x6a4   :  { %v5997_v6 = vpop.eup %4468  ;;  %v1798_v7 = vsel %vm1536_vm1, %v5992_v58, 0.0 }
 0x6a5   :  { %v6002_v29 = vpop.eup %4470  ;;  %v1789_v43 = vsel %vm1536_vm1, %v5997_v6, 0.0 }
 0x6a6   :  { %1757 = vadd.xlane.f32.xlu1 %v1756_v27  ;;  %1772 = vadd.xlane.f32.xlu0 %v1771_v50  ;;  %v6007_v19 = vpop.eup %4472  ;;  %v1792_v33 = vsel %vm1536_vm1, %v6002_v29, 0.0  ;;  %v1665_v27 = vmul.f32 1.442695, %v1633_v52  ;;  %v1667_v50 = vmul.f32 1.442695, %v1634_v3  ;;  %v7653_v52 = vld [vmem:[#allocation10_spill] sm:$0xff] }
 0x6a7   :  { %v6012_v13 = vpop.eup %4474  ;;  %v1807_v41 = vsel %vm1536_vm1, %v6007_v19, 0.0 }
 0x6a8   :  { %v6016_v48 = vpop.eup %4476  ;;  %v1810_v18 = vsel %vm1536_vm1, %v6012_v13, 0.0  ;;  %4492 = vpow2.f32 %v1665_v27 }
 0x6a9   :  { %v6020_v9 = vpop.eup %4478  ;;  %4494 = vpow2.f32 %v1667_v50 }
 0x6aa   :  { %1775 = vadd.xlane.f32.xlu1 %v1774_v44  ;;  %1766 = vadd.xlane.f32.xlu0 %v1765_v5  ;;  %v1801_v44 = vsel %vm1536_vm1, %v6016_v48, 0.0  ;;  %v6024_v2 = vpop.eup %4480  ;;  %v1804_v14 = vsel %vm1536_vm1, %v6020_v9, 0.0 }
 0x6ab   :  { %v6028_v5 = vpop.eup %4482  ;;  %v1819_v16 = vsel %vm1536_vm1, %v6024_v2, 0.0 }
 0x6ac   :  { %v6032_v57 = vpop.eup %4484  ;;  %v1822_v21 = vsel %vm1536_vm1, %v6028_v5, 0.0 }
 0x6ad   :  { %v1813_v24 = vsel %vm1536_vm1, %v6032_v57, 0.0 }
 0x6ae   :  { %1769 = vadd.xlane.f32.xlu1 %v1768_v23  ;;  %1784 = vadd.xlane.f32.xlu0 %v1783_v8  ;;  %v6036_v23 = vpop.eup %4486 }
 0x6af   :  { %v6040_v53 = vpop.eup %4488  ;;  %v1816_v15 = vsel %vm1536_vm1, %v6036_v23, 0.0 }
 0x6b0   :  { %v6044_v8 = vpop.eup %4490  ;;  %v1777_v34 = vsel %vm1536_vm1, %v6040_v53, 0.0 }
 0x6b1   :  { %v1780_v32 = vsel %vm1536_vm1, %v6044_v8, 0.0 }
 0x6b2   :  { %1787 = vadd.xlane.f32.xlu1 %v1786_v63  ;;  %1796 = vadd.xlane.f32.xlu0 %v1795_v20  ;;  %v7645_v20 = vld [vmem:[#allocation6_spill] sm:$0xff] }
 0x6b5   :  { %v6048_v59 = vpop.eup %4492 }
 0x6b6   :  { %1799 = vadd.xlane.f32.xlu1 %v1798_v7  ;;  %1790 = vadd.xlane.f32.xlu0 %v1789_v43  ;;  %v6052_v42 = vpop.eup %4494  ;;  %v1729_v61 = vsel %vm1536_vm1, %v6048_v59, 0.0  ;;  %v7650_v7 = vld [vmem:[#allocation17_spill] sm:$0xff]  ;;  %v7655_v43 = vld [vmem:[#allocation11_spill] sm:$0xff] }
 0x6b7   :  { %v1732_v63 = vsel %vm1536_vm1, %v6052_v42, 0.0 }
 0x6ba   :  { %1793 = vadd.xlane.f32.xlu1 %v1792_v33  ;;  %1808 = vadd.xlane.f32.xlu0 %v1807_v41 }
 0x6be   :  { %1811 = vadd.xlane.f32.xlu1 %v1810_v18  ;;  %1802 = vadd.xlane.f32.xlu0 %v1801_v44 }
 0x6c2   :  { %1805 = vadd.xlane.f32.xlu1 %v1804_v14  ;;  %1820 = vadd.xlane.f32.xlu0 %v1819_v16 }
 0x6c6   :  { %1823 = vadd.xlane.f32.xlu1 %v1822_v21  ;;  %1814 = vadd.xlane.f32.xlu0 %v1813_v24 }
 0x6ca   :  { %1817 = vadd.xlane.f32.xlu1 %v1816_v15  ;;  %1778 = vadd.xlane.f32.xlu0 %v1777_v34 }
 0x6ce   :  { %1781 = vadd.xlane.f32.xlu1 %v1780_v32  ;;  %1730 = vadd.xlane.f32.xlu0 %v1729_v61 }
 0x6d2   :  { %1733 = vadd.xlane.f32.xlu1 %v1732_v63 }
 0x6fb   :  { %1991 = vxpose.xlu0.c.b16.start [1/8] %v7642_v4, 128 }
 0x6ff   :  { %1975 = vxpose.xlu1.c.b16.start [1/8] %v7643_v40, 128  ;;  %1992 = vxpose.xlu0.c.b16.cont [2/8] %v7644_v0, 128 }
 0x703   :  { %1976 = vxpose.xlu1.c.b16.cont [2/8] %v7645_v20, 128  ;;  %1993 = vxpose.xlu0.c.b16.cont [3/8] %v7646_v37, 128 }
 0x707   :  { %1977 = vxpose.xlu1.c.b16.cont [3/8] %v7647_v25, 128  ;;  %1994 = vxpose.xlu0.c.b16.cont [4/8] %v7648_v38, 128 }
 0x70b   :  { %1978 = vxpose.xlu1.c.b16.cont [4/8] %v7649_v17, 128  ;;  %1995 = vxpose.xlu0.c.b16.cont [5/8] %v7650_v7, 128 }
 0x70f   :  { %1979 = vxpose.xlu1.c.b16.cont [5/8] %v7651_v10, 128  ;;  %1996 = vxpose.xlu0.c.b16.cont [6/8] %v7652_v31, 128 }
 0x713   :  { %1980 = vxpose.xlu1.c.b16.cont [6/8] %v7653_v52, 128  ;;  %1997 = vxpose.xlu0.c.b16.cont [7/8] %v7654_v47, 128 }
 0x717   :  { %1981 = vxpose.xlu1.c.b16.cont [7/8] %v7655_v43, 128  ;;  %1998 = vxpose.xlu0.c.b16.end [8/8] %v7656_v55, 128 }
 0x71b   :  { %1982 = vxpose.xlu1.c.b16.end [8/8] %v7657_v51, 128  ;;  %v1737_v3 = vpop.xlane.xlu0 %1736 }
 0x71c   :  { %4496 = vrcp.f32 %v1737_v3 }
 0x71f   :  { %v1740_v33 = vpop.xlane.xlu1 %1739  ;;  %v1749_v27 = vpop.xlane.xlu0 %1748 }
 0x720   :  { %4498 = vrcp.f32 %v1740_v33 }
 0x721   :  { %4500 = vrcp.f32 %v1749_v27 }
 0x723   :  { %v1752_v41 = vpop.xlane.xlu1 %1751  ;;  %v6074_v50 = vpop.xlane.xlu0 %1742 }
 0x724   :  { %4502 = vrcp.f32 %v1752_v41 }
 0x727   :  { %v6076_v18 = vpop.xlane.xlu1 %1745  ;;  %v1761_v44 = vpop.xlane.xlu0 %1760 }
 0x728   :  { %4504 = vrcp.f32 %v1761_v44 }
 0x729   :  { %v6082_v52 = vpop.eup %4496 }
 0x72b   :  { %v1764_v14 = vpop.xlane.xlu1 %1763  ;;  %v1755_v16 = vpop.xlane.xlu0 %1754 }
 0x72c   :  { %4506 = vrcp.f32 %v1764_v14 }
 0x72d   :  { %v6084_v3 = vpop.eup %4498 }
 0x72e   :  { %v6086_v27 = vpop.eup %4500 }
 0x72f   :  { %v1758_v21 = vpop.xlane.xlu1 %1757  ;;  %v1773_v24 = vpop.xlane.xlu0 %1772 }
 0x730   :  { %4508 = vrcp.f32 %v1773_v24 }
 0x731   :  { %v6088_v44 = vpop.eup %4502 }
 0x733   :  { %v1776_v15 = vpop.xlane.xlu1 %1775  ;;  %v1767_v34 = vpop.xlane.xlu0 %1766 }
 0x734   :  { %4510 = vrcp.f32 %v1776_v15 }
 0x735   :  { %4512 = vrcp.f32 %v1767_v34 }
 0x737   :  { %v1770_v32 = vpop.xlane.xlu1 %1769  ;;  %v6078_v61 = vpop.xlane.xlu0 %1784 }
 0x73b   :  { %v6080_v63 = vpop.xlane.xlu1 %1787  ;;  %v1797_v40 = vpop.xlane.xlu0 %1796 }
 0x73f   :  { %v1800_v55 = vpop.xlane.xlu1 %1799  ;;  %v1791_v47 = vpop.xlane.xlu0 %1790 }
 0x743   :  { %v1794_v31 = vpop.xlane.xlu1 %1793  ;;  %v1809_v7 = vpop.xlane.xlu0 %1808 }
 0x747   :  { %v1812_v38 = vpop.xlane.xlu1 %1811  ;;  %v1803_v37 = vpop.xlane.xlu0 %1802 }
 0x74b   :  { %v1806_v0 = vpop.xlane.xlu1 %1805  ;;  %v1821_v4 = vpop.xlane.xlu0 %1820 }
 0x74c   :  { %4514 = vrcp.f32 %v1821_v4  ;;  %v4505_v4 = vpop.eup %4504 }
 0x74d   :  { %4516 = vrcp.f32 %v1770_v32  ;;  %v4507_v14 = vpop.eup %4506 }
 0x74f   :  { %v1824_v51 = vpop.xlane.xlu1 %1823  ;;  %v1815_v43 = vpop.xlane.xlu0 %1814 }
 0x750   :  { %4518 = vrcp.f32 %v1824_v51 }
 0x751   :  { %4520 = vrcp.f32 %v1812_v38  ;;  %v4509_v38 = vpop.eup %4508 }
 0x752   :  { %4522 = vrcp.f32 %v1815_v43  ;;  %v4511_v43 = vpop.eup %4510 }
 0x753   :  { %4524 = vrcp.f32 %v1809_v7  ;;  %v1818_v33 = vpop.xlane.xlu1 %1817  ;;  %v1779_v41 = vpop.xlane.xlu0 %1778 }
 0x754   :  { %4526 = vrcp.f32 %v1818_v33  ;;  %v4513_v15 = vpop.eup %4512 }
 0x755   :  { %4528 = vrcp.f32 %v1755_v16 }
 0x756   :  { %4530 = vrcp.f32 %v1806_v0  ;;  %v6092_v0 = vmul.f32 %v4511_v43, %v5956_v62 }
 0x757   :  { %4532 = vrcp.f32 %v1758_v21  ;;  %v1782_v51 = vpop.xlane.xlu1 %1781  ;;  %v1731_v24 = vpop.xlane.xlu0 %1730 }
 0x758   :  { %4534 = vrcp.f32 %v1803_v37 }
 0x759   :  { %4536 = vrcp.f32 %v1731_v24  ;;  %v4515_v7 = vpop.eup %4514  ;;  %v6104_v24 = vmul.f32 %v4509_v38, %v5950_v22 }
 0x75a   :  { %4538 = vrcp.f32 %v1800_v55  ;;  %v4517_v32 = vpop.eup %4516  ;;  %v6098_v21 = vmul.f32 %v4515_v7, %v6024_v2 }
 0x75b   :  { %4540 = vrcp.f32 %v1797_v40  ;;  %v1734_v34 = vpop.xlane.xlu1 %1733  ;;  %v1966_v2 = vpack.c.bf16 %v6092_v0, %v6104_v24 }
 0x75c   :  { %4542 = vrcp.f32 %v1734_v34  ;;  %v6134_v34 = vmul.f32 %v4507_v14, %v5932_v54 }
 0x75d   :  { %v4519_v33 = vpop.eup %4518  ;;  %4544 = vrcp.f32 %v6074_v50  ;;  %v6100_v55 = vpop.trf.xlu0  ;;  %v6110_v50 = vmul.f32 %v4517_v32, %v5968_v35  ;;  %v6125_v35 = vmul.f32 %v4513_v15, %v5962_v12  ;;  %v6144_v15 = vmul.f32 %v4505_v4, %v5926_v26 }
 0x75e   :  { %v4521_v16 = vpop.eup %4520  ;;  %4546 = vrcp.f32 %v1794_v31  ;;  %v6095_v37 = vmul.f32 %v4519_v33, %v6028_v5  ;;  %2039 = vmatprep.mubr.bf16.mxu1 %v6100_v55  ;;  %v1859_v26 = vmul.f32 %v6082_v52, %v5894_v56  ;;  %v1864_v52 = vmul.f32 %v6088_v44, %v5909_v60 }
 0x75f   :  { %v4523_v40 = vpop.eup %4522  ;;  %4548 = vrcp.f32 %v6076_v18  ;;  %v6116_v22 = vmul.f32 %v4521_v16, %v6012_v13  ;;  %v1964_v16 = vpack.c.bf16 %v6134_v34, %v6144_v15 }
 0x760   :  { %v4525_v62 = vpop.eup %4524  ;;  %4550 = vrcp.f32 %v1791_v47  ;;  %v1974_v31 = vpack.c.bf16 %v6095_v37, %v6098_v21  ;;  %v6122_v47 = vmul.f32 %v4523_v40, %v6032_v57  ;;  %v1965_v57 = vpack.c.bf16 %v6110_v50, %v6125_v35 }
 0x761   :  { %v4527_v5 = vpop.eup %4526  ;;  %4552 = vrcp.f32 %v6080_v63  ;;  %v6129_v63 = vmul.f32 %v4525_v62, %v6007_v19 }
 0x762   :  { %v4529_v43 = vpop.eup %4528  ;;  %v6119_v18 = vmul.f32 %v4527_v5, %v6036_v23  ;;  %3901 = vmatprep.subr.bf16.mxu1 %v1974_v31  ;;  %4554 = vrcp.f32 %v6078_v61  ;;  %v1860_v31 = vmul.f32 %v6084_v3, %v5903_v28 }
 0x763   :  { %v4531_v38 = vpop.eup %4530  ;;  %3902 = vmatpush3.bf16.msra.mxu1 %v1966_v2  ;;  %4556 = vrcp.f32 %v1782_v51  ;;  %v1972_v19 = vpack.c.bf16 %v6116_v22, %v6129_v63  ;;  %v1865_v62 = vmul.f32 %v4529_v43, %v5938_v30  ;;  %v1892_v43 = vsel %vm1536_vm1, %v1859_v26, 0.0 }
 0x764   :  { %v4533_v7 = vpop.eup %4532  ;;  %v1973_v13 = vpack.c.bf16 %v6119_v18, %v6122_v47  ;;  %v6139_v12 = vmul.f32 %v4531_v38, %v6020_v9  ;;  %4558 = vrcp.f32 %v1779_v41  ;;  %v1894_v60 = vsel %vm1536_vm1, %v1860_v31, 0.0 }
 0x765   :  { %v4535_v23 = vpop.eup %4534  ;;  %v1866_v51 = vmul.f32 %v4533_v7, %v5944_v39  ;;  %v1863_v7 = vmul.f32 %v6086_v27, %v5901_v11 }
 0x766   :  { %v4537_v32 = vpop.eup %4536  ;;  %3903 = vmatprep.subr.bf16.mxu1 %v1973_v13  ;;  %v6150_v14 = vmul.f32 %v4535_v23, %v6016_v48 }
 0x767   :  { %v4539_v61 = vpop.eup %4538  ;;  %3904 = vmatpush3.bf16.msra.mxu1 %v1965_v57  ;;  %v6147_v54 = vmul.f32 %v4537_v32, %v6048_v59  ;;  %v1963_v30 = vpack.c.bf16 %v1866_v51, %v1865_v62  ;;  %v1962_v57 = vpack.c.bf16 %v1864_v52, %v1863_v7 }
 0x768   :  { %v4541_v33 = vpop.eup %4540  ;;  %3905 = vmatprep.subr.bf16.mxu1 %v1972_v19  ;;  %v6158_v4 = vmul.f32 %v4539_v61, %v5992_v58  ;;  %v1971_v48 = vpack.c.bf16 %v6139_v12, %v6150_v14 }
 0x769   :  { %v4543_v9 = vpop.eup %4542  ;;  %v1889_v5 = vsel %vm1536_vm1, %v6147_v54, 0.0  ;;  %v6169_v56 = vmul.f32 %v4541_v33, %v5986_v1 }
 0x76a   :  { %v4545_v40 = vpop.eup %4544  ;;  %v1858_v59 = vmul.f32 %v4543_v9, %v6052_v42 }
 0x76b   :  { %v4547_v41 = vpop.eup %4546  ;;  %3906 = vmatpush3.bf16.msra.mxu1 %v1964_v16  ;;  %v1861_v38 = vmul.f32 %v4545_v40, %v5914_v45  ;;  %v1970_v1 = vpack.c.bf16 %v6158_v4, %v6169_v56  ;;  %v1900_v40 = vsel %vm1536_vm1, %v1863_v7, 0.0 }
 0x76c   :  { %v4549_v39 = vpop.eup %4548  ;;  %v1890_v58 = vsel %vm1536_vm1, %v1858_v59, 0.0  ;;  %3907 = vmatprep.subr.bf16.mxu1 %v1971_v48  ;;  %v6177_v28 = vmul.f32 %v4547_v41, %v6002_v29 }
 0x76d   :  { %v4551_v42 = vpop.eup %4550  ;;  %v1891_v2 = vadd.f32 %v1890_v58, %v1889_v5  ;;  %v1862_v44 = vmul.f32 %v4549_v39, %v5920_v36  ;;  %v1896_v32 = vsel %vm1536_vm1, %v1861_v38, 0.0  ;;  %v1902_v39 = vsel %vm1536_vm1, %v1864_v52, 0.0 }
 0x76e   :  { %v4553_v3 = vpop.eup %4552  ;;  %v6186_v23 = vmul.f32 %v4551_v42, %v5997_v6  ;;  %v1960_v42 = vpack.c.bf16 %v1860_v31, %v1859_v26  ;;  %v1910_v26 = vsel %vm1536_vm1, %v6134_v34, 0.0 }
 0x76f   :  { %v1893_v13 = vadd.f32 %v1892_v43, %v1891_v2  ;;  %3908 = vmatpush3.bf16.msra.mxu1 %v1963_v30  ;;  %v4555_v45 = vpop.eup %4554  ;;  %v1876_v19 = vmul.f32 %v4553_v3, %v5980_v49  ;;  %v1898_v33 = vsel %vm1536_vm1, %v1862_v44, 0.0  ;;  %v1961_v16 = vpack.c.bf16 %v1862_v44, %v1861_v38 }
 0x770   :  { %3909 = vmatprep.subr.bf16.mxu1 %v1970_v1  ;;  %v1969_v11 = vpack.c.bf16 %v6177_v28, %v6186_v23  ;;  %v4557_v27 = vpop.eup %4556  ;;  %v1875_v36 = vmul.f32 %v4555_v45, %v5974_v46  ;;  %v1904_v46 = vsel %vm1536_vm1, %v1865_v62, 0.0  ;;  %v1906_v43 = vsel %vm1536_vm1, %v1866_v51, 0.0  ;;  %v6207_v62 = vpop.trf.xlu0 }
 0x771   :  { %v1895_v29 = vadd.f32 %v1894_v60, %v1893_v13  ;;  %v4559_v6 = vpop.eup %4558  ;;  %v1874_v48 = vmul.f32 %v4557_v27, %v6044_v8  ;;  %v1959_v8 = vpack.c.bf16 %v1858_v59, %v6147_v54  ;;  %v1908_v1 = vsel %vm1536_vm1, %v6144_v15, 0.0 }
 0x772   :  { %v1968_v41 = vpack.c.bf16 %v1876_v19, %v1875_v36  ;;  %v1873_v5 = vmul.f32 %v4559_v6, %v6040_v53  ;;  %v6203_v53 = vpop.trf.xlu1  ;;  %v1912_v51 = vsel %vm1536_vm1, %v6125_v35, 0.0  ;;  %v1914_v15 = vsel %vm1536_vm1, %v6110_v50, 0.0 }
 0x773   :  { %v1897_v61 = vadd.f32 %v1896_v32, %v1895_v29  ;;  %3910 = vmatpush3.bf16.msra.mxu1 %v1962_v57  ;;  %v1916_v59 = vsel %vm1536_vm1, %v6104_v24, 0.0  ;;  %v1918_v13 = vsel %vm1536_vm1, %v6092_v0, 0.0  ;;  %v1922_v50 = vsel %vm1536_vm1, %v1874_v48, 0.0 }
 0x774   :  { %3911 = vmatprep.subr.bf16.mxu1 %v1969_v11  ;;  %v1967_v2 = vpack.c.bf16 %v1874_v48, %v1873_v5  ;;  %v6221_v60 = vpop.trf.xlu0  ;;  %v1920_v44 = vsel %vm1536_vm1, %v1873_v5, 0.0  ;;  %v1924_v24 = vsel %vm1536_vm1, %v1875_v36, 0.0  ;;  %v1926_v0 = vsel %vm1536_vm1, %v1876_v19, 0.0 }
 0x775   :  { %v1899_v9 = vadd.f32 %v1898_v33, %v1897_v61  ;;  %v1928_v61 = vsel %vm1536_vm1, %v6186_v23, 0.0  ;;  %v1930_v6 = vsel %vm1536_vm1, %v6177_v28, 0.0 }
 0x776   :  { %v6217_v34 = vpop.trf.xlu1 }
 0x777   :  { %v1901_v49 = vadd.f32 %v1900_v40, %v1899_v9  ;;  %3912 = vmatpush3.bf16.msra.mxu1 %v1961_v16  ;;  %v1932_v9 = vsel %vm1536_vm1, %v6169_v56, 0.0  ;;  %v1934_v40 = vsel %vm1536_vm1, %v6158_v4, 0.0  ;;  %v1938_v56 = vsel %vm1536_vm1, %v6139_v12, 0.0 }
 0x778   :  { %3913 = vmatprep.subr.bf16.mxu1 %v1968_v41  ;;  %v6231_v11 = vpop.trf.xlu0  ;;  %v1936_v41 = vsel %vm1536_vm1, %v6150_v14, 0.0 }
 0x779   :  { %v1903_v58 = vadd.f32 %v1902_v39, %v1901_v49  ;;  %v1940_v39 = vsel %vm1536_vm1, %v6129_v63, 0.0  ;;  %v1946_v63 = vsel %vm1536_vm1, %v6119_v18, 0.0 }
 0x77a   :  { %v6228_v32 = vpop.trf.xlu1 }
 0x77b   :  { %v1905_v30 = vadd.f32 %v1904_v46, %v1903_v58  ;;  %3914 = vmatpush3.bf16.msra.mxu1 %v1960_v42  ;;  %v1942_v58 = vsel %vm1536_vm1, %v6116_v22, 0.0  ;;  %v1944_v46 = vsel %vm1536_vm1, %v6122_v47, 0.0 }
 0x77c   :  { %3915 = vmatprep.subr.bf16.mxu1 %v1967_v2  ;;  %v6245_v48 = vpop.trf.xlu0 }
 0x77d   :  { %v1907_v38 = vadd.f32 %v1906_v43, %v1905_v30  ;;  %v1948_v30 = vsel %vm1536_vm1, %v6098_v21, 0.0 }
 0x77e   :  { %v6241_v19 = vpop.trf.xlu1 }
 0x77f   :  { %v1909_v52 = vadd.f32 %v1908_v1, %v1907_v38  ;;  %3916 = vmatpush3.bf16.msra.mxu1 %v1959_v8  ;;  %v1950_v38 = vsel %vm1536_vm1, %v6095_v37, 0.0 }
 0x780   :  { %v6259_v42 = vpop.trf.xlu0 }
 0x781   :  { %v1911_v31 = vadd.f32 %v1910_v26, %v1909_v52 }
 0x782   :  { %2040 = vmatmul.mubr.bf16.vlgmr.msra.gmra.mxu1 %v6203_v53  ;;  %v6255_v4 = vpop.trf.xlu1 }
 0x783   :  { %v1913_v3 = vadd.f32 %v1912_v51, %v1911_v31  ;;  %2047 = vmatprep.mubr.bf16.mxu1 %v6207_v62 }
 0x784   :  { %v6273_v8 = vpop.trf.xlu0 }
 0x785   :  { %v1915_v54 = vadd.f32 %v1914_v15, %v1913_v3  ;;  %7659 = vst [vmem:[#allocation27_spill] sm:$0xff] %v6273_v8 }
 0x786   :  { %v6269_v22 = vpop.trf.xlu1 }
 0x787   :  { %v1917_v7 = vadd.f32 %v1916_v59, %v1915_v54  ;;  %7658 = vst [vmem:[#allocation21_spill] sm:$0xff] %v6269_v22 }
 0x788   :  { %v6279_v18 = vpop.trf.xlu0 }
 0x789   :  { %v1919_v35 = vadd.f32 %v1918_v13, %v1917_v7  ;;  %7661 = vst [vmem:[#allocation23_spill] sm:$0xff] %v6279_v18 }
 0x78a   :  { %2048 = vmatmul.mubr.bf16.gmra.mxu1 %v6217_v34  ;;  %v6277_v1 = vpop.trf.xlu1 }
 0x78b   :  { %v1921_v45 = vadd.f32 %v1920_v44, %v1919_v35  ;;  %2055 = vmatprep.mubr.bf16.mxu1 %v6221_v60  ;;  %7660 = vst [vmem:[#allocation22_spill] sm:$0xff] %v6277_v1 }
 0x78d   :  { %v1923_v29 = vadd.f32 %v1922_v50, %v1921_v45 }
 0x78e   :  { %v6283_v21 = vpop.trf.xlu1 }
 0x78f   :  { %v1925_v57 = vadd.f32 %v1924_v24, %v1923_v29  ;;  %7662 = vst [vmem:[#allocation25_spill] sm:$0xff] %v6283_v21 }
 0x791   :  { %v1927_v27 = vadd.f32 %v1926_v0, %v1925_v57 }
 0x792   :  { %2056 = vmatmul.mubr.bf16.gmra.mxu1 %v6228_v32 }
 0x793   :  { %v1929_v33 = vadd.f32 %v1928_v61, %v1927_v27  ;;  %2063 = vmatprep.mubr.bf16.mxu1 %v6231_v11 }
 0x795   :  { %v1931_v36 = vadd.f32 %v1930_v6, %v1929_v33 }
 0x797   :  { %v1933_v16 = vadd.f32 %v1932_v9, %v1931_v36 }
 0x799   :  { %v1935_v23 = vadd.f32 %v1934_v40, %v1933_v16 }
 0x79a   :  { %2064 = vmatmul.mubr.bf16.gmra.mxu1 %v6241_v19 }
 0x79b   :  { %v1937_v49 = vadd.f32 %v1936_v41, %v1935_v23  ;;  %2071 = vmatprep.mubr.bf16.mxu1 %v6245_v48 }
 0x79d   :  { %v1939_v28 = vadd.f32 %v1938_v56, %v1937_v49 }
 0x79f   :  { %v1941_v5 = vadd.f32 %v1940_v39, %v1939_v28 }
 0x7a1   :  { %v1943_v14 = vadd.f32 %v1942_v58, %v1941_v5 }
 0x7a2   :  { %2072 = vmatmul.mubr.bf16.gmra.mxu1 %v6255_v4 }
 0x7a3   :  { %v1945_v2 = vadd.f32 %v1944_v46, %v1943_v14  ;;  %2079 = vmatprep.mubr.bf16.mxu1 %v6259_v42 }
 0x7a5   :  { %v1947_v12 = vadd.f32 %v1946_v63, %v1945_v2 }
 0x7a7   :  { %v1949_v43 = vadd.f32 %v1948_v30, %v1947_v12 }
 0x7a9   :  { %v1951_v47 = vadd.f32 %v1950_v38, %v1949_v43 }
 0x7aa   :  { %2080 = vmatmul.mubr.bf16.gmra.mxu1 %v6269_v22 }
 0x7ab   :  { %2087 = vmatprep.mubr.bf16.mxu1 %v6273_v8  ;;  %v1952_v37 = vrot.slane %v1951_v47, 4 }
 0x7ad   :  { %v1953_v52 = vadd.f32 %v1952_v37, %v1951_v47 }
 0x7af   :  { %v1954_v26 = vrot.slane %v1953_v52, 2 }
 0x7b1   :  { %v1955_v31 = vadd.f32 %v1954_v26, %v1953_v52 }
 0x7b2   :  { %2088 = vmatmul.mubr.bf16.gmra.mxu1 %v6277_v1 }
 0x7b3   :  { %2095 = vmatprep.mubr.bf16.mxu1 %v6279_v18  ;;  %v1956_v51 = vrot.slane %v1955_v31, 1 }
 0x7b5   :  { %v1957_v3 = vadd.f32 %v1956_v51, %v1955_v31 }
 0x7b7   :  { %v1958_v15 = vadd.f32 1e-08, %v1957_v3 }
 0x7b9   :  { %4560 = vrcp.f32 %v1958_v15 }
 0x7ba   :  { %2096 = vmatmul.mubr.bf16.gmra.mxu1 %v6283_v21 }
 0x7bb   :  { %2792 = vmatprep.mubr.bf16.mxu1 %v6100_v55 }
 0x7c6   :  { %v6287_v13 = vpop.eup %4560 }
 0x842   :  { %v3917_v54 = vpop.f32.mrf.mxu1 }
 0x844   :  { %v3918_v59 = vpop.f32.mrf.mxu1 }
 0x845   :  { %v3919_v7 = vadd.f32 %v3918_v59, %v3917_v54 }
 0x846   :  { %v3920_v35 = vpop.f32.mrf.mxu1 }
 0x847   :  { %v2105_v44 = vmul.f32 %v6287_v13, %v3919_v7 }
 0x848   :  { %v3921_v45 = vpop.f32.mrf.mxu1 }
 0x849   :  { %v3922_v50 = vadd.f32 %v3921_v45, %v3920_v35 }
 0x84a   :  { %v3923_v29 = vpop.f32.mrf.mxu1 }
 0x84b   :  { %v2106_v55 = vmul.f32 %v6287_v13, %v3922_v50 }
 0x84c   :  { %v3924_v24 = vpop.f32.mrf.mxu1 }
 0x84d   :  { %v3925_v57 = vadd.f32 %v3924_v24, %v3923_v29  ;;  %v6291_v0 = vpack.c.bf16 %v2106_v55, %v2105_v44 }
 0x84e   :  { %v3926_v27 = vpop.f32.mrf.mxu1 }
 0x84f   :  { %v2107_v61 = vmul.f32 %v6287_v13, %v3925_v57 }
 0x850   :  { %v3927_v33 = vpop.f32.mrf.mxu1 }
 0x851   :  { %v3928_v6 = vadd.f32 %v3927_v33, %v3926_v27 }
 0x852   :  { %v3929_v36 = vpop.f32.mrf.mxu1 }
 0x853   :  { %v2108_v9 = vmul.f32 %v6287_v13, %v3928_v6 }
 0x854   :  { %v3930_v16 = vpop.f32.mrf.mxu1 }
 0x855   :  { %v3931_v40 = vadd.f32 %v3930_v16, %v3929_v36  ;;  %v6295_v23 = vpack.c.bf16 %v2108_v9, %v2107_v61 }
 0x856   :  { %v3932_v41 = vpop.f32.mrf.mxu1 }
 0x857   :  { %v2109_v49 = vmul.f32 %v6287_v13, %v3931_v40 }
 0x858   :  { %v3933_v56 = vpop.f32.mrf.mxu1 }
 0x859   :  { %v3934_v28 = vadd.f32 %v3933_v56, %v3932_v41 }
 0x85a   :  { %v3935_v39 = vpop.f32.mrf.mxu1 }
 0x85b   :  { %v2110_v5 = vmul.f32 %v6287_v13, %v3934_v28 }
 0x85c   :  { %v3936_v58 = vpop.f32.mrf.mxu1 }
 0x85d   :  { %v2123_v14 = vpack.c.bf16 %v2110_v5, %v2109_v49  ;;  %v3937_v28 = vadd.f32 %v3936_v58, %v3935_v39  ;;  %v7664_v39 = vld [vmem:[#allocation11_spill] sm:$0xff]  ;;  %v7665_v58 = vld [vmem:[#allocation12_spill] sm:$0xff] }
 0x85e   :  { %v3938_v46 = vpop.f32.mrf.mxu1 }
 0x860   :  { %v3939_v2 = vpop.f32.mrf.mxu1 }
 0x861   :  { %v3940_v41 = vadd.f32 %v3939_v2, %v3938_v46  ;;  %v7668_v46 = vld [vmem:[#allocation15_spill] sm:$0xff]  ;;  %v7670_v2 = vld [vmem:[#allocation17_spill] sm:$0xff] }
 0x862   :  { %v3941_v63 = vpop.f32.mrf.mxu1 }
 0x864   :  { %v3942_v12 = vpop.f32.mrf.mxu1 }
 0x865   :  { %v3943_v16 = vadd.f32 %v3942_v12, %v3941_v63  ;;  %v7671_v12 = vld [vmem:[#allocation18_spill] sm:$0xff] }
 0x866   :  { %v3944_v30 = vpop.f32.mrf.mxu1 }
 0x867   :  { %v2113_v5 = vmul.f32 %v6287_v13, %v3943_v16 }
 0x868   :  { %v3945_v43 = vpop.f32.mrf.mxu1 }
 0x869   :  { %v3946_v6 = vadd.f32 %v3945_v43, %v3944_v30  ;;  %v2112_v30 = vmul.f32 %v6287_v13, %v3940_v41 }
 0x86a   :  { %v3947_v38 = vpop.f32.mrf.mxu1 }
 0x86b   :  { %v2114_v49 = vmul.f32 %v6287_v13, %v3946_v6 }
 0x86c   :  { %v3948_v47 = vpop.f32.mrf.mxu1 }
 0x86d   :  { %v3949_v27 = vadd.f32 %v3948_v47, %v3947_v38  ;;  %v2125_v43 = vpack.c.bf16 %v2114_v49, %v2113_v5  ;;  %v2111_v38 = vmul.f32 %v6287_v13, %v3937_v28  ;;  %v7672_v47 = vld [vmem:[#allocation19_spill] sm:$0xff] }
 0x86e   :  { %v3950_v37 = vpop.f32.mrf.mxu1 }
 0x86f   :  { %v2115_v40 = vmul.f32 %v6287_v13, %v3949_v27  ;;  %v2124_v63 = vpack.c.bf16 %v2112_v30, %v2111_v38 }
 0x870   :  { %v3951_v52 = vpop.f32.mrf.mxu1 }
 0x871   :  { %v3952_v29 = vadd.f32 %v3951_v52, %v3950_v37  ;;  %v7673_v37 = vld [vmem:[#allocation20_spill] sm:$0xff]  ;;  %v7674_v52 = vld [vmem:[#allocation5_spill] sm:$0xff] }
 0x872   :  { %v3953_v26 = vpop.f32.mrf.mxu1 }
 0x873   :  { %v2116_v36 = vmul.f32 %v6287_v13, %v3952_v29 }
 0x874   :  { %v3954_v31 = vpop.f32.mrf.mxu1 }
 0x875   :  { %v3955_v45 = vadd.f32 %v3954_v31, %v3953_v26  ;;  %v2126_v56 = vpack.c.bf16 %v2116_v36, %v2115_v40 }
 0x876   :  { %v3956_v51 = vpop.f32.mrf.mxu1 }
 0x877   :  { %v2117_v61 = vmul.f32 %v6287_v13, %v3955_v45 }
 0x878   :  { %v3957_v3 = vpop.f32.mrf.mxu1 }
 0x879   :  { %v3958_v7 = vadd.f32 %v3957_v3, %v3956_v51 }
 0x87a   :  { %v3959_v15 = vpop.f32.mrf.mxu1 }
 0x87b   :  { %v2118_v55 = vmul.f32 %v6287_v13, %v3958_v7 }
 0x87c   :  { %v3960_v54 = vpop.f32.mrf.mxu1 }
 0x87d   :  { %v3961_v35 = vadd.f32 %v3960_v54, %v3959_v15  ;;  %v2127_v9 = vpack.c.bf16 %v2118_v55, %v2117_v61 }
 0x87e   :  { %v3962_v59 = vpop.f32.mrf.mxu1 }
 0x87f   :  { %v2119_v24 = vmul.f32 %v6287_v13, %v3961_v35 }
 0x880   :  { %v3963_v44 = vpop.f32.mrf.mxu1 }
 0x881   :  { %v3964_v50 = vadd.f32 %v3963_v44, %v3962_v59 }
 0x883   :  { %v2120_v57 = vmul.f32 %v6287_v13, %v3964_v50  ;;  %v7663_v13 = vld [vmem:[#allocation10_spill] sm:$0xff] }
 0x885   :  { %v2128_v33 = vpack.c.bf16 %v2120_v57, %v2119_v24 }
 0x887   :  { %4261 = vmatprep.subr.bf16.mxu0 %v2128_v33 }
 0x888   :  { %4262 = vmatpush3.bf16.msra.mxu0 %v2128_v33 }
 0x889   :  { %4263 = vmatprep.subr.bf16.mxu0 %v2127_v9 }
 0x88c   :  { %4264 = vmatpush3.bf16.msra.mxu0 %v2127_v9 }
 0x88d   :  { %4265 = vmatprep.subr.bf16.mxu0 %v2126_v56 }
 0x890   :  { %4266 = vmatpush3.bf16.msra.mxu0 %v2126_v56 }
 0x891   :  { %4267 = vmatprep.subr.bf16.mxu0 %v2125_v43 }
 0x894   :  { %4268 = vmatpush3.bf16.msra.mxu0 %v2125_v43 }
 0x895   :  { %4269 = vmatprep.subr.bf16.mxu0 %v2124_v63 }
 0x898   :  { %4270 = vmatpush3.bf16.msra.mxu0 %v2124_v63 }
 0x899   :  { %4271 = vmatprep.subr.bf16.mxu0 %v2123_v14 }
 0x89c   :  { %4272 = vmatpush3.bf16.msra.mxu0 %v2123_v14  ;;  %v7666_v14 = vld [vmem:[#allocation13_spill] sm:$0xff] }
 0x89d   :  { %4273 = vmatprep.subr.bf16.mxu0 %v6295_v23 }
 0x8a0   :  { %4274 = vmatpush3.bf16.msra.mxu0 %v6295_v23  ;;  %v7667_v23 = vld [vmem:[#allocation14_spill] sm:$0xff] }
 0x8a1   :  { %4275 = vmatprep.subr.bf16.mxu0 %v6291_v0 }
 0x8a4   :  { %4276 = vmatpush3.bf16.msra.mxu0 %v6291_v0  ;;  %v7669_v0 = vld [vmem:[#allocation16_spill] sm:$0xff] }
 0x8a7   :  { %4278 = vmatmul.mubr.bf16.vlgmr.msra.gmra.mxu0 %v7645_v20 }
 0x8a8   :  { %4281 = vmatprep.mubr.bf16.mxu0 %v7647_v25 }
 0x8af   :  { %4282 = vmatmul.mubr.bf16.gmra.mxu0 %v7649_v17 }
 0x8b0   :  { %4285 = vmatprep.mubr.bf16.mxu0 %v7651_v10 }
 0x8b7   :  { %4286 = vmatmul.mubr.bf16.gmra.mxu0 %v7663_v13 }
 0x8b8   :  { %4289 = vmatprep.mubr.bf16.mxu0 %v7664_v39 }
 0x8bf   :  { %4290 = vmatmul.mubr.bf16.gmra.mxu0 %v7665_v58 }
 0x8c0   :  { %4293 = vmatprep.mubr.bf16.mxu0 %v7666_v14 }
 0x8c7   :  { %4294 = vmatmul.mubr.bf16.gmra.mxu0 %v7667_v23 }
 0x8c8   :  { %4297 = vmatprep.mubr.bf16.mxu0 %v7668_v46 }
 0x8cf   :  { %4298 = vmatmul.mubr.bf16.gmra.mxu0 %v7669_v0 }
 0x8d0   :  { %4301 = vmatprep.mubr.bf16.mxu0 %v7670_v2 }
 0x8d7   :  { %4302 = vmatmul.mubr.bf16.gmra.mxu0 %v7671_v12 }
 0x8d8   :  { %4305 = vmatprep.mubr.bf16.mxu0 %v7672_v47 }
 0x8df   :  { %4306 = vmatmul.mubr.bf16.gmra.mxu0 %v7673_v37 }
 0x8e0   :  { %4325 = vmatprep.mubr.bf16.mxu0 %v7674_v52 }
 0x967   :  { %v6329_v26 = vpop.f32.mrf.mxu0 }
 0x969   :  { %v6331_v31 = vpop.f32.mrf.mxu0 }
 0x96b   :  { %v6333_v51 = vpop.f32.mrf.mxu0 }
 0x96d   :  { %v6335_v3 = vpop.f32.mrf.mxu0 }
 0x96f   :  { %v6337_v15 = vpop.f32.mrf.mxu0 }
 0x971   :  { %v6339_v54 = vpop.f32.mrf.mxu0 }
 0x973   :  { %v6341_v59 = vpop.f32.mrf.mxu0 }
 0x975   :  { %v6343_v7 = vpop.f32.mrf.mxu0 }
 0x977   :  { %v4287_v35 = vpop.f32.mrf.mxu0 }
 0x978   :  { %v6345_v44 = vmul.f32 5.0, %v4287_v35 }
 0x979   :  { %v2195_v45 = vpop.f32.mrf.mxu0 }
 0x97a   :  { %v6347_v50 = vmul.f32 5.0, %v2195_v45  ;;  %v2352_v29 = vsel %vm1536_vm1, %v6345_v44, -inf }
 0x97b   :  { %2353 = vmax.xlane.f32.xlu0 %v2352_v29  ;;  %v4288_v55 = vpop.f32.mrf.mxu0 }
 0x97c   :  { %v6351_v24 = vmul.f32 5.0, %v4288_v55  ;;  %v2346_v61 = vsel %vm1536_vm1, %v6347_v50, -inf }
 0x97d   :  { %v2198_v57 = vpop.f32.mrf.mxu0 }
 0x97e   :  { %v6353_v27 = vmul.f32 5.0, %v2198_v57  ;;  %v2355_v33 = vsel %vm1536_vm1, %v6351_v24, -inf }
 0x97f   :  { %2347 = vmax.xlane.f32.xlu0 %v2346_v61  ;;  %2356 = vmax.xlane.f32.xlu1 %v2355_v33  ;;  %v4291_v6 = vpop.f32.mrf.mxu0 }
 0x980   :  { %v6359_v36 = vmul.f32 5.0, %v4291_v6  ;;  %v2349_v40 = vsel %vm1536_vm1, %v6353_v27, -inf }
 0x981   :  { %v2211_v9 = vpop.f32.mrf.mxu0 }
 0x982   :  { %v6361_v16 = vmul.f32 5.0, %v2211_v9  ;;  %v2364_v41 = vsel %vm1536_vm1, %v6359_v36, -inf }
 0x983   :  { %2350 = vmax.xlane.f32.xlu1 %v2349_v40  ;;  %2365 = vmax.xlane.f32.xlu0 %v2364_v41  ;;  %v4292_v49 = vpop.f32.mrf.mxu0 }
 0x984   :  { %v6367_v56 = vmul.f32 5.0, %v4292_v49  ;;  %v2358_v30 = vsel %vm1536_vm1, %v6361_v16, -inf }
 0x985   :  { %v2214_v28 = vpop.f32.mrf.mxu0 }
 0x986   :  { %v6369_v5 = vmul.f32 5.0, %v2214_v28  ;;  %v2367_v43 = vsel %vm1536_vm1, %v6367_v56, -inf }
 0x987   :  { %2359 = vmax.xlane.f32.xlu0 %v2358_v30  ;;  %2368 = vmax.xlane.f32.xlu1 %v2367_v43  ;;  %v4295_v38 = vpop.f32.mrf.mxu0 }
 0x988   :  { %v2361_v52 = vsel %vm1536_vm1, %v6369_v5, -inf }
 0x989   :  { %v6375_v63 = vpop.f32.mrf.mxu0 }
 0x98b   :  { %2362 = vmax.xlane.f32.xlu1 %v2361_v52  ;;  %v4296_v35 = vpop.f32.mrf.mxu0 }
 0x98d   :  { %v6379_v45 = vpop.f32.mrf.mxu0 }
 0x98f   :  { %v4299_v29 = vpop.f32.mrf.mxu0 }
 0x990   :  { %v6381_v55 = vmul.f32 5.0, %v4299_v29 }
 0x991   :  { %v2243_v57 = vpop.f32.mrf.mxu0 }
 0x992   :  { %v2388_v61 = vsel %vm1536_vm1, %v6381_v55, -inf }
 0x993   :  { %2389 = vmax.xlane.f32.xlu0 %v2388_v61  ;;  %v4300_v33 = vpop.f32.mrf.mxu0 }
 0x994   :  { %v6385_v6 = vmul.f32 5.0, %v4300_v33 }
 0x995   :  { %v2246_v9 = vpop.f32.mrf.mxu0 }
 0x996   :  { %v2391_v40 = vsel %vm1536_vm1, %v6385_v6, -inf  ;;  %v6434_v46 = vmul.f32 5.0, %v2246_v9  ;;  %v6450_v9 = vmul.f32 5.0, %v6329_v26 }
 0x997   :  { %2392 = vmax.xlane.f32.xlu1 %v2391_v40  ;;  %v4303_v41 = vpop.f32.mrf.mxu0 }
 0x998   :  { %v6389_v49 = vmul.f32 5.0, %v4303_v41  ;;  %v2328_v26 = vsel %vm1536_vm1, %v6450_v9, -inf }
 0x999   :  { %v2259_v28 = vpop.f32.mrf.mxu0 }
 0x99a   :  { %v6391_v30 = vmul.f32 5.0, %v2259_v28  ;;  %v2400_v43 = vsel %vm1536_vm1, %v6389_v49, -inf }
 0x99b   :  { %2401 = vmax.xlane.f32.xlu0 %v2400_v43  ;;  %v4304_v52 = vpop.f32.mrf.mxu0 }
 0x99c   :  { %v6395_v29 = vmul.f32 5.0, %v4304_v52  ;;  %v2394_v37 = vsel %vm1536_vm1, %v6391_v30, -inf }
 0x99d   :  { %v2262_v61 = vpop.f32.mrf.mxu0 }
 0x99e   :  { %v6397_v33 = vmul.f32 5.0, %v2262_v61  ;;  %v2403_v40 = vsel %vm1536_vm1, %v6395_v29, -inf }
 0x99f   :  { %2395 = vmax.xlane.f32.xlu0 %v2394_v37  ;;  %2404 = vmax.xlane.f32.xlu1 %v2403_v40  ;;  %v4307_v41 = vpop.f32.mrf.mxu0  ;;  %v6414_v37 = vmul.f32 5.0, %v6337_v15  ;;  %v6432_v15 = vmul.f32 5.0, %v6339_v54  ;;  %v2385_v54 = vsel %vm1536_vm1, %v6434_v46, -inf }
 0x9a0   :  { %v6403_v28 = vmul.f32 5.0, %v4307_v41  ;;  %v2397_v43 = vsel %vm1536_vm1, %v6397_v33, -inf }
 0x9a1   :  { %v2275_v47 = vpop.f32.mrf.mxu0 }
 0x9a2   :  { %v6405_v12 = vmul.f32 5.0, %v2275_v47  ;;  %v2412_v52 = vsel %vm1536_vm1, %v6403_v28, -inf }
 0x9a3   :  { %2398 = vmax.xlane.f32.xlu1 %v2397_v43  ;;  %2413 = vmax.xlane.f32.xlu0 %v2412_v52  ;;  %v4308_v61 = vpop.f32.mrf.mxu0  ;;  %v6423_v43 = vmul.f32 5.0, %v6341_v59  ;;  %v6425_v52 = vmul.f32 5.0, %v2243_v57  ;;  %v6441_v57 = vmul.f32 5.0, %v6343_v7 }
 0x9a4   :  { %v6411_v2 = vmul.f32 5.0, %v4308_v61  ;;  %v2406_v47 = vsel %vm1536_vm1, %v6405_v12, -inf  ;;  %v2340_v61 = vsel %vm1536_vm1, %v6414_v37, -inf }
 0x9a5   :  { %v2278_v0 = vpop.f32.mrf.mxu0  ;;  %v2343_v59 = vsel %vm1536_vm1, %v6423_v43, -inf  ;;  %v2337_v7 = vsel %vm1536_vm1, %v6441_v57, -inf }
 0x9a6   :  { %v6416_v40 = vmul.f32 5.0, %v2278_v0  ;;  %v2415_v41 = vsel %vm1536_vm1, %v6411_v2, -inf }
 0x9a7   :  { %2407 = vmax.xlane.f32.xlu0 %v2406_v47  ;;  %2416 = vmax.xlane.f32.xlu1 %v2415_v41  ;;  %v2382_v47 = vsel %vm1536_vm1, %v6425_v52, -inf  ;;  %v6443_v41 = vmul.f32 5.0, %v4295_v38  ;;  %v6459_v38 = vmul.f32 5.0, %v6333_v51 }
 0x9a8   :  { %v2409_v0 = vsel %vm1536_vm1, %v6416_v40, -inf }
 0x9ab   :  { %2341 = vmax.xlane.f32.xlu0 %v2340_v61  ;;  %2410 = vmax.xlane.f32.xlu1 %v2409_v0  ;;  %v2334_v61 = vsel %vm1536_vm1, %v6432_v15, -inf  ;;  %v6452_v0 = vmul.f32 5.0, %v4296_v35 }
 0x9ad   :  { %v2379_v35 = vsel %vm1536_vm1, %v6452_v0, -inf }
 0x9af   :  { %2383 = vmax.xlane.f32.xlu0 %v2382_v47  ;;  %2344 = vmax.xlane.f32.xlu1 %v2343_v59  ;;  %v2376_v47 = vsel %vm1536_vm1, %v6443_v41, -inf  ;;  %v6462_v59 = vmul.f32 5.0, %v6375_v63  ;;  %v2331_v63 = vsel %vm1536_vm1, %v6459_v38, -inf }
 0x9b1   :  { %v2370_v51 = vsel %vm1536_vm1, %v6462_v59, -inf }
 0x9b3   :  { %2335 = vmax.xlane.f32.xlu0 %v2334_v61  ;;  %2386 = vmax.xlane.f32.xlu1 %v2385_v54  ;;  %v6469_v61 = vmul.f32 5.0, %v6331_v31  ;;  %v6472_v54 = vmul.f32 5.0, %v6379_v45 }
 0x9b5   :  { %v2373_v31 = vsel %vm1536_vm1, %v6472_v54, -inf }
 0x9b7   :  { %2377 = vmax.xlane.f32.xlu0 %v2376_v47  ;;  %2338 = vmax.xlane.f32.xlu1 %v2337_v7  ;;  %v6479_v47 = vmul.f32 5.0, %v6335_v3  ;;  %v2322_v7 = vsel %vm1536_vm1, %v6469_v61, -inf }
 0x9b9   :  { %v2325_v45 = vsel %vm1536_vm1, %v6479_v47, -inf }
 0x9bb   :  { %2329 = vmax.xlane.f32.xlu0 %v2328_v26  ;;  %2380 = vmax.xlane.f32.xlu1 %v2379_v35 }
 0x9bf   :  { %2371 = vmax.xlane.f32.xlu0 %v2370_v51  ;;  %2332 = vmax.xlane.f32.xlu1 %v2331_v63 }
 0x9c3   :  { %2323 = vmax.xlane.f32.xlu0 %v2322_v7  ;;  %2374 = vmax.xlane.f32.xlu1 %v2373_v31 }
 0x9c7   :  { %2326 = vmax.xlane.f32.xlu1 %v2325_v45 }
 0xa04   :  { %v2354_v26 = vpop.xlane.xlu0 %2353 }
 0xa05   :  { %v2428_v35 = vsub.f32 %v6345_v44, %v2354_v26 }
 0xa07   :  { %v2470_v51 = vmul.f32 1.442695, %v2428_v35 }
 0xa08   :  { %v2348_v63 = vpop.xlane.xlu0 %2347  ;;  %v2357_v23 = vpop.xlane.xlu1 %2356 }
 0xa09   :  { %4562 = vpow2.f32 %v2470_v51  ;;  %v2426_v3 = vsub.f32 %v6347_v50, %v2348_v63  ;;  %v2429_v14 = vsub.f32 %v6351_v24, %v2357_v23 }
 0xa0b   :  { %v2466_v58 = vmul.f32 1.442695, %v2426_v3  ;;  %v2472_v39 = vmul.f32 1.442695, %v2429_v14 }
 0xa0c   :  { %v2351_v13 = vpop.xlane.xlu1 %2350  ;;  %v2366_v7 = vpop.xlane.xlu0 %2365 }
 0xa0d   :  { %4564 = vpow2.f32 %v2466_v58  ;;  %v2427_v31 = vsub.f32 %v6353_v27, %v2351_v13  ;;  %v2432_v45 = vsub.f32 %v6359_v36, %v2366_v7 }
 0xa0e   :  { %4566 = vpow2.f32 %v2472_v39 }
 0xa0f   :  { %v2468_v10 = vmul.f32 1.442695, %v2427_v31  ;;  %v2478_v44 = vmul.f32 1.442695, %v2432_v45 }
 0xa10   :  { %v2360_v26 = vpop.xlane.xlu0 %2359  ;;  %v2369_v35 = vpop.xlane.xlu1 %2368 }
 0xa11   :  { %4568 = vpow2.f32 %v2468_v10  ;;  %v2430_v51 = vsub.f32 %v6361_v16, %v2360_v26  ;;  %v2433_v50 = vsub.f32 %v6367_v56, %v2369_v35 }
 0xa12   :  { %4570 = vpow2.f32 %v2478_v44 }
 0xa13   :  { %v2474_v23 = vmul.f32 1.442695, %v2430_v51  ;;  %v2480_v14 = vmul.f32 1.442695, %v2433_v50 }
 0xa14   :  { %v2363_v24 = vpop.xlane.xlu1 %2362 }
 0xa15   :  { %4572 = vpow2.f32 %v2474_v23  ;;  %v2431_v58 = vsub.f32 %v6369_v5, %v2363_v24 }
 0xa16   :  { %v6495_v13 = vpop.eup %4562  ;;  %4574 = vpow2.f32 %v2480_v14 }
 0xa17   :  { %v2476_v39 = vmul.f32 1.442695, %v2431_v58  ;;  %v2544_v27 = vsel %vm1536_vm1, %v6495_v13, 0.0 }
 0xa18   :  { %2545 = vadd.xlane.f32.xlu0 %v2544_v27 }
 0xa19   :  { %4576 = vpow2.f32 %v2476_v39 }
 0xa1a   :  { %v6499_v10 = vpop.eup %4564 }
 0xa1b   :  { %v6501_v36 = vpop.eup %4566  ;;  %v2538_v16 = vsel %vm1536_vm1, %v6499_v10, 0.0 }
 0xa1c   :  { %v2390_v56 = vpop.xlane.xlu0 %2389  ;;  %2539 = vadd.xlane.f32.xlu0 %v2538_v16  ;;  %v2547_v5 = vsel %vm1536_vm1, %v6501_v36, 0.0 }
 0xa1d   :  { %v2440_v63 = vsub.f32 %v6381_v55, %v2390_v56  ;;  %2548 = vadd.xlane.f32.xlu1 %v2547_v5 }
 0xa1e   :  { %v6508_v3 = vpop.eup %4568 }
 0xa1f   :  { %v6510_v7 = vpop.eup %4570  ;;  %v2494_v31 = vmul.f32 1.442695, %v2440_v63  ;;  %v2541_v45 = vsel %vm1536_vm1, %v6508_v3, 0.0 }
 0xa20   :  { %v2393_v44 = vpop.xlane.xlu1 %2392  ;;  %v2556_v26 = vsel %vm1536_vm1, %v6510_v7, 0.0 }
 0xa21   :  { %4578 = vpow2.f32 %v2494_v31  ;;  %v2441_v35 = vsub.f32 %v6385_v6, %v2393_v44  ;;  %2557 = vadd.xlane.f32.xlu0 %v2556_v26  ;;  %2542 = vadd.xlane.f32.xlu1 %v2541_v45 }
 0xa22   :  { %v6517_v51 = vpop.eup %4572 }
 0xa23   :  { %v6519_v55 = vpop.eup %4574  ;;  %v2496_v50 = vmul.f32 1.442695, %v2441_v35  ;;  %v2550_v23 = vsel %vm1536_vm1, %v6517_v51, 0.0 }
 0xa24   :  { %v2402_v14 = vpop.xlane.xlu0 %2401  ;;  %v2559_v24 = vsel %vm1536_vm1, %v6519_v55, 0.0 }
 0xa25   :  { %4580 = vpow2.f32 %v2496_v50  ;;  %v2444_v58 = vsub.f32 %v6389_v49, %v2402_v14  ;;  %2551 = vadd.xlane.f32.xlu0 %v2550_v23  ;;  %2560 = vadd.xlane.f32.xlu1 %v2559_v24 }
 0xa26   :  { %v6526_v6 = vpop.eup %4576 }
 0xa27   :  { %v2502_v39 = vmul.f32 1.442695, %v2444_v58  ;;  %v2553_v27 = vsel %vm1536_vm1, %v6526_v6, 0.0 }
 0xa28   :  { %v2396_v16 = vpop.xlane.xlu0 %2395  ;;  %v2405_v56 = vpop.xlane.xlu1 %2404 }
 0xa29   :  { %4582 = vpow2.f32 %v2502_v39  ;;  %v2442_v5 = vsub.f32 %v6391_v30, %v2396_v16  ;;  %v2445_v63 = vsub.f32 %v6395_v29, %v2405_v56  ;;  %2554 = vadd.xlane.f32.xlu1 %v2553_v27 }
 0xa2b   :  { %v2498_v31 = vmul.f32 1.442695, %v2442_v5  ;;  %v2504_v45 = vmul.f32 1.442695, %v2445_v63 }
 0xa2c   :  { %v2399_v44 = vpop.xlane.xlu1 %2398  ;;  %v2414_v49 = vpop.xlane.xlu0 %2413 }
 0xa2d   :  { %4584 = vpow2.f32 %v2498_v31  ;;  %v2443_v26 = vsub.f32 %v6397_v33, %v2399_v44  ;;  %v2448_v35 = vsub.f32 %v6403_v28, %v2414_v49 }
 0xa2e   :  { %v6534_v50 = vpop.eup %4578  ;;  %4586 = vpow2.f32 %v2504_v45 }
 0xa2f   :  { %v2500_v23 = vmul.f32 1.442695, %v2443_v26  ;;  %v2510_v14 = vmul.f32 1.442695, %v2448_v35  ;;  %v2580_v30 = vsel %vm1536_vm1, %v6534_v50, 0.0 }
 0xa30   :  { %2581 = vadd.xlane.f32.xlu0 %v2580_v30  ;;  %v2408_v29 = vpop.xlane.xlu0 %2407  ;;  %v2417_v24 = vpop.xlane.xlu1 %2416 }
 0xa31   :  { %4588 = vpow2.f32 %v2500_v23  ;;  %v2446_v58 = vsub.f32 %v6405_v12, %v2408_v29  ;;  %v2449_v39 = vsub.f32 %v6411_v2, %v2417_v24 }
 0xa32   :  { %v6540_v27 = vpop.eup %4580  ;;  %4590 = vpow2.f32 %v2510_v14 }
 0xa33   :  { %v2506_v33 = vmul.f32 1.442695, %v2446_v58  ;;  %v2512_v28 = vmul.f32 1.442695, %v2449_v39  ;;  %v2583_v16 = vsel %vm1536_vm1, %v6540_v27, 0.0 }
 0xa34   :  { %v2342_v56 = vpop.xlane.xlu0 %2341  ;;  %2584 = vadd.xlane.f32.xlu1 %v2583_v16  ;;  %v2411_v5 = vpop.xlane.xlu1 %2410 }
 0xa35   :  { %4592 = vpow2.f32 %v2506_v33  ;;  %v2424_v63 = vsub.f32 %v6414_v37, %v2342_v56  ;;  %v2447_v31 = vsub.f32 %v6416_v40, %v2411_v5 }
 0xa36   :  { %v6546_v45 = vpop.eup %4582  ;;  %4594 = vpow2.f32 %v2512_v28 }
 0xa37   :  { %v2462_v2 = vmul.f32 1.442695, %v2424_v63  ;;  %v2508_v12 = vmul.f32 1.442695, %v2447_v31  ;;  %v2592_v44 = vsel %vm1536_vm1, %v6546_v45, 0.0 }
 0xa38   :  { %2593 = vadd.xlane.f32.xlu0 %v2592_v44  ;;  %v2384_v49 = vpop.xlane.xlu0 %2383  ;;  %v2345_v26 = vpop.xlane.xlu1 %2344 }
 0xa39   :  { %4596 = vpow2.f32 %v2462_v2  ;;  %v2438_v35 = vsub.f32 %v6425_v52, %v2384_v49  ;;  %v2425_v23 = vsub.f32 %v6423_v43, %v2345_v26 }
 0xa3a   :  { %v6552_v14 = vpop.eup %4584  ;;  %4598 = vpow2.f32 %v2508_v12 }
 0xa3b   :  { %v6554_v37 = vpop.eup %4586  ;;  %v2490_v40 = vmul.f32 1.442695, %v2438_v35  ;;  %v2464_v30 = vmul.f32 1.442695, %v2425_v23  ;;  %v2586_v29 = vsel %vm1536_vm1, %v6552_v14, 0.0 }
 0xa3c   :  { %2587 = vadd.xlane.f32.xlu0 %v2586_v29  ;;  %v2336_v24 = vpop.xlane.xlu0 %2335  ;;  %v2595_v58 = vsel %vm1536_vm1, %v6554_v37, 0.0  ;;  %v2387_v39 = vpop.xlane.xlu1 %2386 }
 0xa3d   :  { %4600 = vpow2.f32 %v2490_v40  ;;  %v2422_v52 = vsub.f32 %v6432_v15, %v2336_v24  ;;  %2596 = vadd.xlane.f32.xlu1 %v2595_v58  ;;  %v2439_v43 = vsub.f32 %v6434_v46, %v2387_v39 }
 0xa3e   :  { %v6562_v33 = vpop.eup %4588  ;;  %4602 = vpow2.f32 %v2464_v30 }
 0xa3f   :  { %v6564_v28 = vpop.eup %4590  ;;  %v2458_v16 = vmul.f32 1.442695, %v2422_v52  ;;  %v2492_v56 = vmul.f32 1.442695, %v2439_v43  ;;  %v2589_v5 = vsel %vm1536_vm1, %v6562_v33, 0.0 }
 0xa40   :  { %v2604_v63 = vsel %vm1536_vm1, %v6564_v28, 0.0  ;;  %v2378_v31 = vpop.xlane.xlu0 %2377  ;;  %v2339_v2 = vpop.xlane.xlu1 %2338 }
 0xa41   :  { %4604 = vpow2.f32 %v2458_v16  ;;  %2605 = vadd.xlane.f32.xlu0 %v2604_v63  ;;  %v2436_v15 = vsub.f32 %v6443_v41, %v2378_v31  ;;  %2590 = vadd.xlane.f32.xlu1 %v2589_v5  ;;  %v2423_v46 = vsub.f32 %v6441_v57, %v2339_v2 }
 0xa42   :  { %v6572_v12 = vpop.eup %4592  ;;  %4606 = vpow2.f32 %v2492_v56 }
 0xa43   :  { %v6574_v44 = vpop.eup %4594  ;;  %v2486_v49 = vmul.f32 1.442695, %v2436_v15  ;;  %v2460_v26 = vmul.f32 1.442695, %v2423_v46  ;;  %v2598_v35 = vsel %vm1536_vm1, %v6572_v12, 0.0 }
 0xa44   :  { %v2330_v23 = vpop.xlane.xlu0 %2329  ;;  %v2607_v40 = vsel %vm1536_vm1, %v6574_v44, 0.0  ;;  %v2381_v30 = vpop.xlane.xlu1 %2380 }
 0xa45   :  { %4608 = vpow2.f32 %v2486_v49  ;;  %2599 = vadd.xlane.f32.xlu0 %v2598_v35  ;;  %v2420_v41 = vsub.f32 %v6450_v9, %v2330_v23  ;;  %2608 = vadd.xlane.f32.xlu1 %v2607_v40  ;;  %v2437_v57 = vsub.f32 %v6452_v0, %v2381_v30 }
 0xa46   :  { %v6582_v29 = vpop.eup %4596  ;;  %4610 = vpow2.f32 %v2460_v26 }
 0xa47   :  { %v6584_v24 = vpop.eup %4598  ;;  %v2454_v58 = vmul.f32 1.442695, %v2420_v41  ;;  %v2488_v39 = vmul.f32 1.442695, %v2437_v57  ;;  %v2532_v52 = vsel %vm1536_vm1, %v6582_v29, 0.0 }
 0xa48   :  { %v2372_v43 = vpop.xlane.xlu0 %2371  ;;  %v2601_v16 = vsel %vm1536_vm1, %v6584_v24, 0.0  ;;  %v2333_v56 = vpop.xlane.xlu1 %2332 }
 0xa49   :  { %4612 = vpow2.f32 %v2454_v58  ;;  %2533 = vadd.xlane.f32.xlu0 %v2532_v52  ;;  %v2434_v9 = vsub.f32 %v6462_v59, %v2372_v43  ;;  %2602 = vadd.xlane.f32.xlu1 %v2601_v16  ;;  %v2421_v0 = vsub.f32 %v6459_v38, %v2333_v56 }
 0xa4a   :  { %v6592_v5 = vpop.eup %4600  ;;  %4614 = vpow2.f32 %v2488_v39 }
 0xa4b   :  { %v6594_v63 = vpop.eup %4602  ;;  %v2482_v31 = vmul.f32 1.442695, %v2434_v9  ;;  %v2456_v2 = vmul.f32 1.442695, %v2421_v0  ;;  %v2574_v15 = vsel %vm1536_vm1, %v6592_v5, 0.0 }
 0xa4c   :  { %v2324_v46 = vpop.xlane.xlu0 %2323  ;;  %v2535_v49 = vsel %vm1536_vm1, %v6594_v63, 0.0  ;;  %v2375_v26 = vpop.xlane.xlu1 %2374 }
 0xa4d   :  { %4616 = vpow2.f32 %v2482_v31  ;;  %2575 = vadd.xlane.f32.xlu0 %v2574_v15  ;;  %v2418_v59 = vsub.f32 %v6469_v61, %v2324_v46  ;;  %2536 = vadd.xlane.f32.xlu1 %v2535_v49  ;;  %v2435_v38 = vsub.f32 %v6472_v54, %v2375_v26 }
 0xa4e   :  { %v6602_v35 = vpop.eup %4604  ;;  %4618 = vpow2.f32 %v2456_v2 }
 0xa4f   :  { %v6604_v23 = vpop.eup %4606  ;;  %v2450_v40 = vmul.f32 1.442695, %v2418_v59  ;;  %v2484_v30 = vmul.f32 1.442695, %v2435_v38  ;;  %v2526_v41 = vsel %vm1536_vm1, %v6602_v35, 0.0 }
 0xa50   :  { %v2577_v57 = vsel %vm1536_vm1, %v6604_v23, 0.0  ;;  %v2327_v58 = vpop.xlane.xlu1 %2326 }
 0xa51   :  { %4620 = vpow2.f32 %v2450_v40  ;;  %2527 = vadd.xlane.f32.xlu0 %v2526_v41  ;;  %2578 = vadd.xlane.f32.xlu1 %v2577_v57  ;;  %v2419_v61 = vsub.f32 %v6479_v47, %v2327_v58 }
 0xa52   :  { %v6611_v54 = vpop.eup %4608  ;;  %4622 = vpow2.f32 %v2484_v30 }
 0xa53   :  { %v6613_v39 = vpop.eup %4610  ;;  %v2452_v52 = vmul.f32 1.442695, %v2419_v61  ;;  %v2568_v43 = vsel %vm1536_vm1, %v6611_v54, 0.0 }
 0xa54   :  { %v2529_v16 = vsel %vm1536_vm1, %v6613_v39, 0.0 }
 0xa55   :  { %4624 = vpow2.f32 %v2452_v52  ;;  %2569 = vadd.xlane.f32.xlu0 %v2568_v43  ;;  %2530 = vadd.xlane.f32.xlu1 %v2529_v16 }
 0xa56   :  { %v6619_v56 = vpop.eup %4612 }
 0xa57   :  { %v6621_v9 = vpop.eup %4614  ;;  %v2520_v47 = vsel %vm1536_vm1, %v6619_v56, 0.0 }
 0xa58   :  { %v2571_v0 = vsel %vm1536_vm1, %v6621_v9, 0.0 }
 0xa59   :  { %2521 = vadd.xlane.f32.xlu0 %v2520_v47  ;;  %2572 = vadd.xlane.f32.xlu1 %v2571_v0 }
 0xa5a   :  { %v6627_v31 = vpop.eup %4616 }
 0xa5b   :  { %v6629_v2 = vpop.eup %4618  ;;  %v2562_v15 = vsel %vm1536_vm1, %v6627_v31, 0.0 }
 0xa5c   :  { %v2523_v46 = vsel %vm1536_vm1, %v6629_v2, 0.0 }
 0xa5d   :  { %2563 = vadd.xlane.f32.xlu0 %v2562_v15  ;;  %2524 = vadd.xlane.f32.xlu1 %v2523_v46 }
 0xa5e   :  { %v6635_v49 = vpop.eup %4620 }
 0xa5f   :  { %v6637_v26 = vpop.eup %4622  ;;  %v2514_v59 = vsel %vm1536_vm1, %v6635_v49, 0.0 }
 0xa60   :  { %v2565_v38 = vsel %vm1536_vm1, %v6637_v26, 0.0 }
 0xa61   :  { %2515 = vadd.xlane.f32.xlu0 %v2514_v59  ;;  %2566 = vadd.xlane.f32.xlu1 %v2565_v38 }
 0xa62   :  { %v6643_v40 = vpop.eup %4624 }
 0xa63   :  { %v2517_v30 = vsel %vm1536_vm1, %v6643_v40, 0.0 }
 0xa65   :  { %2518 = vadd.xlane.f32.xlu1 %v2517_v30 }
 0xaa1   :  { %v2546_v41 = vpop.xlane.xlu0 %2545 }
 0xaa5   :  { %v2540_v58 = vpop.xlane.xlu0 %2539 }
 0xaa6   :  { %v2549_v57 = vpop.xlane.xlu1 %2548 }
 0xaaa   :  { %v2543_v61 = vpop.xlane.xlu1 %2542  ;;  %v2558_v52 = vpop.xlane.xlu0 %2557 }
 0xaab   :  { %4626 = vrcp.f32 %v2558_v52 }
 0xaae   :  { %v2561_v43 = vpop.xlane.xlu1 %2560  ;;  %v2552_v16 = vpop.xlane.xlu0 %2551 }
 0xaaf   :  { %4628 = vrcp.f32 %v2552_v16 }
 0xab0   :  { %4630 = vrcp.f32 %v2561_v43 }
 0xab2   :  { %v2555_v0 = vpop.xlane.xlu1 %2554 }
 0xab8   :  { %v4627_v22 = vpop.eup %4626 }
 0xab9   :  { %v2582_v47 = vpop.xlane.xlu0 %2581 }
 0xabc   :  { %v4629_v52 = vpop.eup %4628 }
 0xabd   :  { %v2585_v46 = vpop.xlane.xlu1 %2584  ;;  %v4631_v43 = vpop.eup %4630 }
 0xac1   :  { %v2594_v15 = vpop.xlane.xlu0 %2593 }
 0xac5   :  { %v2588_v17 = vpop.xlane.xlu0 %2587 }
 0xac6   :  { %v2597_v59 = vpop.xlane.xlu1 %2596 }
 0xaca   :  { %v2606_v38 = vpop.xlane.xlu0 %2605  ;;  %v2591_v25 = vpop.xlane.xlu1 %2590 }
 0xacb   :  { %4632 = vrcp.f32 %v2606_v38 }
 0xacc   :  { %4634 = vrcp.f32 %v2555_v0 }
 0xace   :  { %v2600_v30 = vpop.xlane.xlu0 %2599  ;;  %v2609_v20 = vpop.xlane.xlu1 %2608 }
 0xacf   :  { %4636 = vrcp.f32 %v2609_v20 }
 0xad0   :  { %4638 = vrcp.f32 %v2597_v59 }
 0xad1   :  { %4640 = vrcp.f32 %v2600_v30 }
 0xad2   :  { %v2534_v21 = vpop.xlane.xlu0 %2533  ;;  %v2603_v18 = vpop.xlane.xlu1 %2602  ;;  %4642 = vrcp.f32 %v2594_v15 }
 0xad3   :  { %4644 = vrcp.f32 %v2603_v18  ;;  %v6648_v18 = vmul.f32 %v4631_v43, %v6519_v55 }
 0xad4   :  { %4646 = vrcp.f32 %v2549_v57 }
 0xad5   :  { %4648 = vrcp.f32 %v2591_v25 }
 0xad6   :  { %v2576_v1 = vpop.xlane.xlu0 %2575  ;;  %v2537_v8 = vpop.xlane.xlu1 %2536  ;;  %4650 = vrcp.f32 %v2546_v41 }
 0xad7   :  { %4652 = vrcp.f32 %v2588_v17 }
 0xad8   :  { %4654 = vrcp.f32 %v2543_v61  ;;  %v4633_v20 = vpop.eup %4632 }
 0xad9   :  { %4656 = vrcp.f32 %v2585_v46  ;;  %v4635_v59 = vpop.eup %4634  ;;  %v6651_v17 = vmul.f32 %v4633_v20, %v6564_v28 }
 0xada   :  { %v2528_v16 = vpop.xlane.xlu0 %2527  ;;  %v2579_v0 = vpop.xlane.xlu1 %2578  ;;  %4658 = vrcp.f32 %v2540_v58  ;;  %v6657_v58 = vmul.f32 %v4627_v22, %v6510_v7  ;;  %v6664_v28 = vmul.f32 %v4635_v59, %v6526_v6  ;;  %v6676_v6 = vmul.f32 %v4629_v52, %v6517_v51 }
 0xadb   :  { %4660 = vrcp.f32 %v2582_v47 }
 0xadc   :  { %v4637_v38 = vpop.eup %4636  ;;  %4662 = vrcp.f32 %v2537_v8  ;;  %v2751_v46 = vpack.c.bf16 %v6648_v18, %v6657_v58 }
 0xadd   :  { %v4639_v25 = vpop.eup %4638  ;;  %4664 = vrcp.f32 %v2579_v0  ;;  %v6654_v61 = vmul.f32 %v4637_v38, %v6574_v44 }
 0xade   :  { %v2570_v41 = vpop.xlane.xlu0 %2569  ;;  %v2531_v57 = vpop.xlane.xlu1 %2530  ;;  %4666 = vrcp.f32 %v2534_v21  ;;  %v6673_v7 = vmul.f32 %v4639_v25, %v6554_v37 }
 0xadf   :  { %v4641_v15 = vpop.eup %4640  ;;  %4668 = vrcp.f32 %v2576_v1  ;;  %v2759_v8 = vpack.c.bf16 %v6654_v61, %v6651_v17 }
 0xae0   :  { %v4643_v47 = vpop.eup %4642  ;;  %4670 = vrcp.f32 %v2531_v57  ;;  %v6667_v22 = vmul.f32 %v4641_v15, %v6572_v12 }
 0xae1   :  { %v4645_v55 = vpop.eup %4644  ;;  %4672 = vrcp.f32 %v2528_v16  ;;  %3989 = vmatprep.subr.bf16.mxu1 %v2759_v8  ;;  %v6681_v12 = vmul.f32 %v4643_v47, %v6546_v45 }
 0xae2   :  { %v4647_v44 = vpop.eup %4646  ;;  %v2522_v21 = vpop.xlane.xlu0 %2521  ;;  %v6670_v1 = vmul.f32 %v4645_v55, %v6584_v24  ;;  %4674 = vrcp.f32 %v2570_v41  ;;  %3990 = vmatpush3.bf16.msra.mxu1 %v2751_v46  ;;  %v2750_v24 = vpack.c.bf16 %v6664_v28, %v6676_v6 }
 0xae3   :  { %v2573_v30 = vpop.xlane.xlu1 %2572  ;;  %v4649_v43 = vpop.eup %4648  ;;  %v6686_v37 = vmul.f32 %v4647_v44, %v6501_v36  ;;  %v2757_v38 = vpack.c.bf16 %v6673_v7, %v6681_v12 }
 0xae4   :  { %v4651_v0 = vpop.eup %4650  ;;  %4676 = vrcp.f32 %v2573_v30  ;;  %v2758_v16 = vpack.c.bf16 %v6670_v1, %v6667_v22  ;;  %v6691_v25 = vmul.f32 %v4649_v43, %v6562_v33 }
 0xae5   :  { %v4653_v20 = vpop.eup %4652  ;;  %4678 = vrcp.f32 %v2522_v21  ;;  %v6694_v41 = vmul.f32 %v4651_v0, %v6495_v13 }
 0xae6   :  { %v4655_v59 = vpop.eup %4654  ;;  %3991 = vmatprep.subr.bf16.mxu1 %v2758_v16  ;;  %v2564_v51 = vpop.xlane.xlu0 %2563  ;;  %v6697_v36 = vmul.f32 %v4653_v20, %v6552_v14 }
 0xae7   :  { %v2525_v52 = vpop.xlane.xlu1 %2524  ;;  %v4657_v45 = vpop.eup %4656  ;;  %3992 = vmatpush3.bf16.msra.mxu1 %v2750_v24  ;;  %v2749_v47 = vpack.c.bf16 %v6686_v37, %v6694_v41  ;;  %v6702_v8 = vmul.f32 %v4655_v59, %v6508_v3 }
 0xae8   :  { %v4659_v57 = vpop.eup %4658  ;;  %4680 = vrcp.f32 %v2525_v52  ;;  %3993 = vmatprep.subr.bf16.mxu1 %v2757_v38  ;;  %v2756_v13 = vpack.c.bf16 %v6691_v25, %v6697_v36  ;;  %v6707_v44 = vmul.f32 %v4657_v45, %v6540_v27 }
 0xae9   :  { %v4661_v15 = vpop.eup %4660  ;;  %4682 = vrcp.f32 %v2564_v51  ;;  %v6710_v14 = vmul.f32 %v4659_v57, %v6499_v10 }
 0xaea   :  { %v4663_v33 = vpop.eup %4662  ;;  %v2516_v55 = vpop.xlane.xlu0 %2515  ;;  %v6713_v3 = vmul.f32 %v4661_v15, %v6534_v50 }
 0xaeb   :  { %v2567_v46 = vpop.xlane.xlu1 %2566  ;;  %v4665_v21 = vpop.eup %4664  ;;  %4684 = vrcp.f32 %v2516_v55  ;;  %3994 = vmatpush3.bf16.msra.mxu1 %v2749_v47  ;;  %v2748_v0 = vpack.c.bf16 %v6702_v8, %v6710_v14  ;;  %v2649_v16 = vmul.f32 %v4663_v33, %v6594_v63 }
 0xaec   :  { %v4667_v30 = vpop.eup %4666  ;;  %4686 = vrcp.f32 %v2567_v46  ;;  %3995 = vmatprep.subr.bf16.mxu1 %v2756_v13  ;;  %v6719_v20 = vmul.f32 %v4665_v21, %v6604_v23  ;;  %v2755_v10 = vpack.c.bf16 %v6707_v44, %v6713_v3 }
 0xaed   :  { %v4669_v43 = vpop.eup %4668  ;;  %v2648_v51 = vmul.f32 %v4667_v30, %v6582_v29 }
 0xaee   :  { %v4671_v27 = vpop.eup %4670  ;;  %v6725_v52 = vmul.f32 %v4669_v43, %v6592_v5 }
 0xaef   :  { %v2519_v24 = vpop.xlane.xlu1 %2518  ;;  %v4673_v59 = vpop.eup %4672  ;;  %3996 = vmatpush3.bf16.msra.mxu1 %v2748_v0  ;;  %v2647_v63 = vmul.f32 %v4671_v27, %v6613_v39  ;;  %v2747_v45 = vpack.c.bf16 %v2649_v16, %v2648_v51 }
 0xaf0   :  { %4688 = vrcp.f32 %v2519_v24  ;;  %v4675_v50 = vpop.eup %4674  ;;  %3997 = vmatprep.subr.bf16.mxu1 %v2755_v10  ;;  %v2754_v57 = vpack.c.bf16 %v6719_v20, %v6725_v52  ;;  %v2646_v47 = vmul.f32 %v4673_v59, %v6602_v35 }
 0xaf1   :  { %v4677_v38 = vpop.eup %4676  ;;  %v6735_v29 = vmul.f32 %v4675_v50, %v6611_v54 }
 0xaf2   :  { %v6729_v23 = vmul.f32 %v4677_v38, %v6621_v9  ;;  %v4679_v15 = vpop.eup %4678  ;;  %v2746_v33 = vpack.c.bf16 %v2647_v63, %v2646_v47 }
 0xaf3   :  { %3998 = vmatpush3.bf16.msra.mxu1 %v2747_v45  ;;  %v2644_v55 = vmul.f32 %v4679_v15, %v6619_v56  ;;  %v2683_v45 = vsel %vm1536_vm1, %v2647_v63, 0.0  ;;  %v2685_v15 = vsel %vm1536_vm1, %v2648_v51, 0.0  ;;  %v2693_v63 = vsel %vm1536_vm1, %v6694_v41, 0.0 }
 0xaf4   :  { %3999 = vmatprep.subr.bf16.mxu1 %v2754_v57  ;;  %v2753_v9 = vpack.c.bf16 %v6729_v23, %v6735_v29  ;;  %v2701_v41 = vsel %vm1536_vm1, %v6657_v58, 0.0  ;;  %v2711_v58 = vsel %vm1536_vm1, %v6729_v23, 0.0  ;;  %v2719_v23 = vsel %vm1536_vm1, %v6707_v44, 0.0 }
 0xaf5   :  { %v4681_v5 = vpop.eup %4680  ;;  %v2677_v50 = vsel %vm1536_vm1, %v2644_v55, 0.0  ;;  %v2727_v44 = vsel %vm1536_vm1, %v6673_v7, 0.0  ;;  %v2735_v7 = vsel %vm1536_vm1, %v6654_v61, 0.0 }
 0xaf6   :  { %v2645_v39 = vmul.f32 %v4681_v5, %v6629_v2  ;;  %v4683_v46 = vpop.eup %4682 }
 0xaf7   :  { %4000 = vmatpush3.bf16.msra.mxu1 %v2746_v33  ;;  %v2658_v30 = vmul.f32 %v4683_v46, %v6627_v31  ;;  %v2687_v33 = vsel %vm1536_vm1, %v2649_v16, 0.0  ;;  %v2695_v16 = vsel %vm1536_vm1, %v6686_v37, 0.0  ;;  %v2703_v37 = vsel %vm1536_vm1, %v6648_v18, 0.0 }
 0xaf8   :  { %v4685_v13 = vpop.eup %4684  ;;  %4001 = vmatprep.subr.bf16.mxu1 %v2753_v9  ;;  %v2745_v21 = vpack.c.bf16 %v2645_v39, %v2644_v55  ;;  %v2715_v18 = vsel %vm1536_vm1, %v6719_v20, 0.0  ;;  %v2723_v20 = vsel %vm1536_vm1, %v6691_v25, 0.0  ;;  %v2731_v25 = vsel %vm1536_vm1, %v6670_v1, 0.0 }
 0xaf9   :  { %v4687_v35 = vpop.eup %4686  ;;  %v2642_v43 = vmul.f32 %v4685_v13, %v6635_v49  ;;  %v2681_v49 = vsel %vm1536_vm1, %v2646_v47, 0.0 }
 0xafa   :  { %v2659_v54 = vmul.f32 %v4687_v35, %v6637_v26  ;;  %v2679_v26 = vsel %vm1536_vm1, %v2645_v39, 0.0  ;;  %v2689_v39 = vsel %vm1536_vm1, %v6710_v14, 0.0 }
 0xafb   :  { %4002 = vmatpush3.bf16.msra.mxu1 %v2745_v21  ;;  %v2674_v27 = vsel %vm1536_vm1, %v2642_v43, 0.0 }
 0xafc   :  { %v2752_v56 = vpack.c.bf16 %v2659_v54, %v2658_v30 }
 0xafd   :  { %v4689_v0 = vpop.eup %4688 }
 0xafe   :  { %v2643_v2 = vmul.f32 %v4689_v0, %v6643_v40  ;;  %4003 = vmatprep.subr.bf16.mxu1 %v2752_v56  ;;  %v7675_v56 = vld [vmem:[#allocation21_spill] sm:$0xff] }
 0xb00   :  { %v2675_v24 = vsel %vm1536_vm1, %v2643_v2, 0.0  ;;  %v2744_v10 = vpack.c.bf16 %v2643_v2, %v2642_v43 }
 0xb01   :  { %v2676_v59 = vadd.f32 %v2675_v24, %v2674_v27 }
 0xb02   :  { %4004 = vmatpush3.bf16.msra.mxu1 %v2744_v10  ;;  %v7677_v10 = vld [vmem:[#allocation22_spill] sm:$0xff] }
 0xb03   :  { %v2678_v31 = vadd.f32 %v2677_v50, %v2676_v59  ;;  %v7678_v59 = vld [vmem:[#allocation23_spill] sm:$0xff] }
 0xb05   :  { %v2680_v38 = vadd.f32 %v2679_v26, %v2678_v31  ;;  %2793 = vmatmul.mubr.bf16.vlgmr.msra.gmra.mxu1 %v6203_v53 }
 0xb06   :  { %2800 = vmatprep.mubr.bf16.mxu1 %v6207_v62  ;;  %v2691_v62 = vsel %vm1536_vm1, %v6702_v8, 0.0  ;;  %v2699_v8 = vsel %vm1536_vm1, %v6664_v28, 0.0  ;;  %v2709_v28 = vsel %vm1536_vm1, %v6735_v29, 0.0  ;;  %v2717_v29 = vsel %vm1536_vm1, %v6713_v3, 0.0 }
 0xb07   :  { %v2682_v40 = vadd.f32 %v2681_v49, %v2680_v38  ;;  %v2725_v3 = vsel %vm1536_vm1, %v6681_v12, 0.0  ;;  %v2733_v12 = vsel %vm1536_vm1, %v6651_v17, 0.0  ;;  %v7679_v49 = vld [vmem:[#allocation25_spill] sm:$0xff] }
 0xb09   :  { %v2684_v57 = vadd.f32 %v2683_v45, %v2682_v40 }
 0xb0b   :  { %v2686_v5 = vadd.f32 %v2685_v15, %v2684_v57 }
 0xb0d   :  { %v2688_v55 = vadd.f32 %v2687_v33, %v2686_v5  ;;  %2801 = vmatmul.mubr.bf16.gmra.mxu1 %v6217_v34  ;;  %v2697_v34 = vsel %vm1536_vm1, %v6676_v6, 0.0  ;;  %v2707_v6 = vsel %vm1536_vm1, %v2659_v54, 0.0 }
 0xb0e   :  { %2808 = vmatprep.mubr.bf16.mxu1 %v6221_v60 }
 0xb0f   :  { %v2690_v53 = vadd.f32 %v2689_v39, %v2688_v55 }
 0xb11   :  { %v2692_v47 = vadd.f32 %v2691_v62, %v2690_v53 }
 0xb13   :  { %v2694_v51 = vadd.f32 %v2693_v63, %v2692_v47 }
 0xb15   :  { %v2696_v9 = vadd.f32 %v2695_v16, %v2694_v51  ;;  %2809 = vmatmul.mubr.bf16.gmra.mxu1 %v6228_v32  ;;  %v2705_v32 = vsel %vm1536_vm1, %v2658_v30, 0.0 }
 0xb16   :  { %2816 = vmatprep.mubr.bf16.mxu1 %v6231_v11 }
 0xb17   :  { %v2698_v60 = vadd.f32 %v2697_v34, %v2696_v9 }
 0xb19   :  { %v2700_v14 = vadd.f32 %v2699_v8, %v2698_v60 }
 0xb1b   :  { %v2702_v46 = vadd.f32 %v2701_v41, %v2700_v14 }
 0xb1d   :  { %v2704_v13 = vadd.f32 %v2703_v37, %v2702_v46  ;;  %2817 = vmatmul.mubr.bf16.gmra.mxu1 %v6241_v19  ;;  %v2713_v19 = vsel %vm1536_vm1, %v6725_v52, 0.0  ;;  %v7676_v52 = vld [vmem:[#allocation27_spill] sm:$0xff] }
 0xb1e   :  { %2824 = vmatprep.mubr.bf16.mxu1 %v6245_v48 }
 0xb1f   :  { %v2706_v11 = vadd.f32 %v2705_v32, %v2704_v13 }
 0xb21   :  { %v2708_v21 = vadd.f32 %v2707_v6, %v2706_v11 }
 0xb23   :  { %v2710_v35 = vadd.f32 %v2709_v28, %v2708_v21 }
 0xb25   :  { %v2712_v43 = vadd.f32 %v2711_v58, %v2710_v35  ;;  %2825 = vmatmul.mubr.bf16.gmra.mxu1 %v6255_v4  ;;  %v2721_v4 = vsel %vm1536_vm1, %v6697_v36, 0.0  ;;  %v2729_v36 = vsel %vm1536_vm1, %v6667_v22, 0.0 }
 0xb26   :  { %2832 = vmatprep.mubr.bf16.mxu1 %v6259_v42 }
 0xb27   :  { %v2714_v48 = vadd.f32 %v2713_v19, %v2712_v43 }
 0xb29   :  { %v2716_v30 = vadd.f32 %v2715_v18, %v2714_v48 }
 0xb2b   :  { %v2718_v54 = vadd.f32 %v2717_v29, %v2716_v30 }
 0xb2d   :  { %v2720_v0 = vadd.f32 %v2719_v23, %v2718_v54  ;;  %2833 = vmatmul.mubr.bf16.gmra.mxu1 %v7675_v56 }
 0xb2e   :  { %2840 = vmatprep.mubr.bf16.mxu1 %v7676_v52 }
 0xb2f   :  { %v2722_v42 = vadd.f32 %v2721_v4, %v2720_v0 }
 0xb31   :  { %v2724_v2 = vadd.f32 %v2723_v20, %v2722_v42 }
 0xb33   :  { %v2726_v27 = vadd.f32 %v2725_v3, %v2724_v2 }
 0xb35   :  { %v2728_v24 = vadd.f32 %v2727_v44, %v2726_v27  ;;  %2841 = vmatmul.mubr.bf16.gmra.mxu1 %v7677_v10 }
 0xb36   :  { %2848 = vmatprep.mubr.bf16.mxu1 %v7678_v59 }
 0xb37   :  { %v2730_v50 = vadd.f32 %v2729_v36, %v2728_v24 }
 0xb39   :  { %v2732_v31 = vadd.f32 %v2731_v25, %v2730_v50 }
 0xb3b   :  { %v2734_v26 = vadd.f32 %v2733_v12, %v2732_v31 }
 0xb3d   :  { %v2736_v38 = vadd.f32 %v2735_v7, %v2734_v26  ;;  %2849 = vmatmul.mubr.bf16.gmra.mxu1 %v7679_v49 }
 0xb3f   :  { %v2737_v40 = vrot.slane %v2736_v38, 4 }
 0xb41   :  { %v2738_v45 = vadd.f32 %v2737_v40, %v2736_v38 }
 0xb43   :  { %v2739_v22 = vrot.slane %v2738_v45, 2 }
 0xb45   :  { %v2740_v57 = vadd.f32 %v2739_v22, %v2738_v45 }
 0xb47   :  { %v2741_v15 = vrot.slane %v2740_v57, 1 }
 0xb49   :  { %v2742_v5 = vadd.f32 %v2741_v15, %v2740_v57 }
 0xb4b   :  { %v2743_v33 = vadd.f32 1e-08, %v2742_v5 }
 0xb4d   :  { %4690 = vrcp.f32 %v2743_v33 }
 0xb5a   :  { %v6814_v53 = vpop.eup %4690 }
 0xbc5   :  { %v4005_v1 = vpop.f32.mrf.mxu1 }
 0xbc7   :  { %v4006_v55 = vpop.f32.mrf.mxu1 }
 0xbc8   :  { %v4007_v39 = vadd.f32 %v4006_v55, %v4005_v1 }
 0xbc9   :  { %v4008_v17 = vpop.f32.mrf.mxu1 }
 0xbca   :  { %v2858_v62 = vmul.f32 %v6814_v53, %v4007_v39 }
 0xbcb   :  { %v4009_v61 = vpop.f32.mrf.mxu1 }
 0xbcc   :  { %3427 = vst.msk [vmem:[%s7513_s7] sm:$0xff] %vm1536_vm1, %v2858_v62  ;;  %v4010_v47 = vadd.f32 %v4009_v61, %v4008_v17 }
 0xbcd   :  { %v4011_v63 = vpop.f32.mrf.mxu1 }
 0xbce   :  { %v2859_v51 = vmul.f32 %v6814_v53, %v4010_v47 }
 0xbcf   :  { %v4012_v16 = vpop.f32.mrf.mxu1 }
 0xbd0   :  { %3428 = vst.msk [vmem:[%s7513_s7 + $0x8] sm:$0xff] %vm1536_vm1, %v2859_v51  ;;  %v4013_v9 = vadd.f32 %v4012_v16, %v4011_v63  ;;  %v6826_v34 = vpack.c.bf16 %v2859_v51, %v2858_v62  ;;  %v7680_v51 = vld [vmem:[#allocation6_spill] sm:$0xff]  ;;  %v7681_v16 = vld [vmem:[#allocation7_spill] sm:$0xff] }
 0xbd1   :  { %v4014_v60 = vpop.f32.mrf.mxu1 }
 0xbd2   :  { %v2860_v8 = vmul.f32 %v6814_v53, %v4013_v9  ;;  %v7682_v9 = vld [vmem:[#allocation8_spill] sm:$0xff] }
 0xbd3   :  { %v4015_v14 = vpop.f32.mrf.mxu1 }
 0xbd4   :  { %3429 = vst.msk [vmem:[%s7513_s7 + $0x10] sm:$0xff] %vm1536_vm1, %v2860_v8  ;;  %v4016_v41 = vadd.f32 %v4015_v14, %v4014_v60  ;;  %v7683_v60 = vld [vmem:[#allocation9_spill] sm:$0xff]  ;;  %v7685_v14 = vld [vmem:[#allocation11_spill] sm:$0xff] }
 0xbd5   :  { %v4017_v46 = vpop.f32.mrf.mxu1 }
 0xbd6   :  { %v2861_v37 = vmul.f32 %v6814_v53, %v4016_v41  ;;  %v7686_v41 = vld [vmem:[#allocation12_spill] sm:$0xff] }
 0xbd7   :  { %v4018_v13 = vpop.f32.mrf.mxu1 }
 0xbd8   :  { %3430 = vst.msk [vmem:[%s7513_s7 + $0x18] sm:$0xff] %vm1536_vm1, %v2861_v37  ;;  %v4019_v32 = vadd.f32 %v4018_v13, %v4017_v46  ;;  %v6838_v11 = vpack.c.bf16 %v2861_v37, %v2860_v8  ;;  %v7684_v8 = vld [vmem:[#allocation10_spill] sm:$0xff]  ;;  %v7687_v46 = vld [vmem:[#allocation13_spill] sm:$0xff]  ;;  %v7689_v13 = vld [vmem:[#allocation15_spill] sm:$0xff] }
 0xbd9   :  { %v4020_v6 = vpop.f32.mrf.mxu1  ;;  %v7688_v37 = vld [vmem:[#allocation14_spill] sm:$0xff] }
 0xbda   :  { %v6841_v21 = vmul.f32 %v6814_v53, %v4019_v32  ;;  %v7691_v32 = vld [vmem:[#allocation17_spill] sm:$0xff] }
 0xbdb   :  { %v4021_v28 = vpop.f32.mrf.mxu1 }
 0xbdc   :  { %3431 = vst.msk [vmem:[%s7513_s7 + $0x20] sm:$0xff] %vm1536_vm1, %v6841_v21  ;;  %v4022_v35 = vadd.f32 %v4021_v28, %v4020_v6  ;;  %v7693_v6 = vld [vmem:[#allocation19_spill] sm:$0xff] }
 0xbdd   :  { %v4023_v58 = vpop.f32.mrf.mxu1 }
 0xbde   :  { %v6849_v43 = vmul.f32 %v6814_v53, %v4022_v35 }
 0xbdf   :  { %v4024_v19 = vpop.f32.mrf.mxu1 }
 0xbe0   :  { %3432 = vst.msk [vmem:[%s7513_s7 + $0x28] sm:$0xff] %vm1536_vm1, %v6849_v43  ;;  %v4025_v48 = vadd.f32 %v4024_v19, %v4023_v58 }
 0xbe1   :  { %v4026_v18 = vpop.f32.mrf.mxu1 }
 0xbe2   :  { %v2864_v30 = vmul.f32 %v6814_v53, %v4025_v48 }
 0xbe3   :  { %v4027_v29 = vpop.f32.mrf.mxu1 }
 0xbe4   :  { %3433 = vst.msk [vmem:[%s7513_s7 + $0x30] sm:$0xff] %vm1536_vm1, %v2864_v30  ;;  %v4028_v54 = vadd.f32 %v4027_v29, %v4026_v18 }
 0xbe5   :  { %v4029_v23 = vpop.f32.mrf.mxu1 }
 0xbe6   :  { %v2865_v0 = vmul.f32 %v6814_v53, %v4028_v54 }
 0xbe7   :  { %v4030_v56 = vpop.f32.mrf.mxu1 }
 0xbe8   :  { %3434 = vst.msk [vmem:[%s7513_s7 + $0x38] sm:$0xff] %vm1536_vm1, %v2865_v0  ;;  %v4031_v4 = vadd.f32 %v4030_v56, %v4029_v23  ;;  %v2877_v63 = vpack.c.bf16 %v2865_v0, %v2864_v30 }
 0xbe9   :  { %v4032_v52 = vpop.f32.mrf.mxu1 }
 0xbea   :  { %v2866_v42 = vmul.f32 %v6814_v53, %v4031_v4 }
 0xbeb   :  { %v4033_v20 = vpop.f32.mrf.mxu1 }
 0xbec   :  { %3435 = vst.msk [vmem:[%s7513_s7 + $0x40] sm:$0xff] %vm1536_vm1, %v2866_v42  ;;  %v4034_v2 = vadd.f32 %v4033_v20, %v4032_v52 }
 0xbed   :  { %v4035_v3 = vpop.f32.mrf.mxu1 }
 0xbee   :  { %v2867_v27 = vmul.f32 %v6814_v53, %v4034_v2 }
 0xbef   :  { %v4036_v44 = vpop.f32.mrf.mxu1 }
 0xbf0   :  { %3436 = vst.msk [vmem:[%s7513_s7 + $0x48] sm:$0xff] %vm1536_vm1, %v2867_v27  ;;  %v4037_v24 = vadd.f32 %v4036_v44, %v4035_v3  ;;  %v2878_v47 = vpack.c.bf16 %v2867_v27, %v2866_v42 }
 0xbf1   :  { %v4038_v10 = vpop.f32.mrf.mxu1 }
 0xbf2   :  { %v2868_v36 = vmul.f32 %v6814_v53, %v4037_v24 }
 0xbf3   :  { %v4039_v59 = vpop.f32.mrf.mxu1 }
 0xbf4   :  { %3437 = vst.msk [vmem:[%s7513_s7 + $0x50] sm:$0xff] %vm1536_vm1, %v2868_v36  ;;  %v4040_v50 = vadd.f32 %v4039_v59, %v4038_v10 }
 0xbf5   :  { %v4041_v25 = vpop.f32.mrf.mxu1 }
 0xbf6   :  { %v2869_v31 = vmul.f32 %v6814_v53, %v4040_v50 }
 0xbf7   :  { %v4042_v12 = vpop.f32.mrf.mxu1 }
 0xbf8   :  { %3438 = vst.msk [vmem:[%s7513_s7 + $0x58] sm:$0xff] %vm1536_vm1, %v2869_v31  ;;  %v4043_v26 = vadd.f32 %v4042_v12, %v4041_v25  ;;  %v2879_v61 = vpack.c.bf16 %v2869_v31, %v2868_v36 }
 0xbf9   :  { %v4044_v7 = vpop.f32.mrf.mxu1 }
 0xbfa   :  { %v2870_v38 = vmul.f32 %v6814_v53, %v4043_v26 }
 0xbfb   :  { %v4045_v49 = vpop.f32.mrf.mxu1 }
 0xbfc   :  { %3439 = vst.msk [vmem:[%s7513_s7 + $0x60] sm:$0xff] %vm1536_vm1, %v2870_v38  ;;  %v4046_v40 = vadd.f32 %v4045_v49, %v4044_v7 }
 0xbfd   :  { %v4047_v45 = vpop.f32.mrf.mxu1 }
 0xbfe   :  { %v2871_v22 = vmul.f32 %v6814_v53, %v4046_v40 }
 0xbff   :  { %v4048_v57 = vpop.f32.mrf.mxu1 }
 0xc00   :  { %3440 = vst.msk [vmem:[%s7513_s7 + $0x68] sm:$0xff] %vm1536_vm1, %v2871_v22  ;;  %v4049_v15 = vadd.f32 %v4048_v57, %v4047_v45  ;;  %v2880_v5 = vpack.c.bf16 %v2871_v22, %v2870_v38 }
 0xc01   :  { %v4050_v33 = vpop.f32.mrf.mxu1 }
 0xc02   :  { %v2872_v1 = vmul.f32 %v6814_v53, %v4049_v15 }
 0xc03   :  { %v4051_v55 = vpop.f32.mrf.mxu1 }
 0xc04   :  { %3441 = vst.msk [vmem:[%s7513_s7 + $0x70] sm:$0xff] %vm1536_vm1, %v2872_v1  ;;  %v4052_v39 = vadd.f32 %v4051_v55, %v4050_v33 }
 0xc06   :  { %v2873_v17 = vmul.f32 %v6814_v53, %v4052_v39  ;;  %v2876_v53 = vpack.c.bf16 %v6849_v43, %v6841_v21  ;;  %v7694_v21 = vld [vmem:[#allocation20_spill] sm:$0xff] }
 0xc08   :  { %3442 = vst.msk [vmem:[%s7513_s7 + $0x78] sm:$0xff] %vm1536_vm1, %v2873_v17  ;;  %v2881_v62 = vpack.c.bf16 %v2873_v17, %v2872_v1 }
 0xc0a   :  { %4309 = vmatprep.subr.bf16.mxu0 %v2881_v62 }
 0xc0b   :  { %4310 = vmatpush3.bf16.msra.mxu0 %v2881_v62 }
 0xc0c   :  { %4311 = vmatprep.subr.bf16.mxu0 %v2880_v5 }
 0xc0f   :  { %4312 = vmatpush3.bf16.msra.mxu0 %v2880_v5 }
 0xc10   :  { %4313 = vmatprep.subr.bf16.mxu0 %v2879_v61 }
 0xc13   :  { %4314 = vmatpush3.bf16.msra.mxu0 %v2879_v61 }
 0xc14   :  { %4315 = vmatprep.subr.bf16.mxu0 %v2878_v47 }
 0xc17   :  { %4316 = vmatpush3.bf16.msra.mxu0 %v2878_v47 }
 0xc18   :  { %4317 = vmatprep.subr.bf16.mxu0 %v2877_v63 }
 0xc1b   :  { %4318 = vmatpush3.bf16.msra.mxu0 %v2877_v63 }
 0xc1c   :  { %4319 = vmatprep.subr.bf16.mxu0 %v2876_v53 }
 0xc1f   :  { %4320 = vmatpush3.bf16.msra.mxu0 %v2876_v53 }
 0xc20   :  { %4321 = vmatprep.subr.bf16.mxu0 %v6838_v11 }
 0xc23   :  { %4322 = vmatpush3.bf16.msra.mxu0 %v6838_v11  ;;  %v7692_v11 = vld [vmem:[#allocation18_spill] sm:$0xff] }
 0xc24   :  { %4323 = vmatprep.subr.bf16.mxu0 %v6826_v34 }
 0xc27   :  { %4324 = vmatpush3.bf16.msra.mxu0 %v6826_v34  ;;  %v7690_v34 = vld [vmem:[#allocation16_spill] sm:$0xff] }
 0xc2a   :  { %4326 = vmatmul.mubr.bf16.vlgmr.msra.gmra.mxu0 %v7680_v51 }
 0xc2b   :  { %4329 = vmatprep.mubr.bf16.mxu0 %v7681_v16 }
 0xc32   :  { %4330 = vmatmul.mubr.bf16.gmra.mxu0 %v7682_v9 }
 0xc33   :  { %4333 = vmatprep.mubr.bf16.mxu0 %v7683_v60 }
 0xc3a   :  { %4334 = vmatmul.mubr.bf16.gmra.mxu0 %v7684_v8 }
 0xc3b   :  { %4337 = vmatprep.mubr.bf16.mxu0 %v7685_v14 }
 0xc42   :  { %4338 = vmatmul.mubr.bf16.gmra.mxu0 %v7686_v41 }
 0xc43   :  { %4341 = vmatprep.mubr.bf16.mxu0 %v7687_v46 }
 0xc4a   :  { %4342 = vmatmul.mubr.bf16.gmra.mxu0 %v7688_v37 }
 0xc4b   :  { %4345 = vmatprep.mubr.bf16.mxu0 %v7689_v13 }
 0xc52   :  { %4346 = vmatmul.mubr.bf16.gmra.mxu0 %v7690_v34 }
 0xc53   :  { %4349 = vmatprep.mubr.bf16.mxu0 %v7691_v32 }
 0xc5a   :  { %4350 = vmatmul.mubr.bf16.gmra.mxu0 %v7692_v11 }
 0xc5b   :  { %4353 = vmatprep.mubr.bf16.mxu0 %v7693_v6 }
 0xc62   :  { %4354 = vmatmul.mubr.bf16.gmra.mxu0 %v7694_v21 }
 0xcea   :  { %v4327_v28 = vpop.f32.mrf.mxu0 }
 0xceb   :  { %v6927_v35 = vmul.f32 5.0, %v4327_v28  ;;  %3477 = vst.msk [vmem:[%s7516_s10 + $0x10] sm:$0xff] %vm1536_vm1, %v4327_v28 }
 0xcec   :  { %v2916_v58 = vpop.f32.mrf.mxu0 }
 0xced   :  { %v6933_v43 = vmul.f32 5.0, %v2916_v58  ;;  %3475 = vst.msk [vmem:[%s7516_s10] sm:$0xff] %vm1536_vm1, %v2916_v58  ;;  %v3081_v19 = vsel %vm1536_vm1, %v6927_v35, -inf }
 0xcee   :  { %3082 = vmax.xlane.f32.xlu0 %v3081_v19  ;;  %v4328_v48 = vpop.f32.mrf.mxu0 }
 0xcef   :  { %v6941_v18 = vmul.f32 5.0, %v4328_v48  ;;  %3478 = vst.msk [vmem:[%s7516_s10 + $0x18] sm:$0xff] %vm1536_vm1, %v4328_v48  ;;  %v3075_v54 = vsel %vm1536_vm1, %v6933_v43, -inf }
 0xcf0   :  { %v2919_v30 = vpop.f32.mrf.mxu0 }
 0xcf1   :  { %v6947_v29 = vmul.f32 5.0, %v2919_v30  ;;  %3476 = vst.msk [vmem:[%s7516_s10 + $0x8] sm:$0xff] %vm1536_vm1, %v2919_v30  ;;  %v3084_v23 = vsel %vm1536_vm1, %v6941_v18, -inf }
 0xcf2   :  { %3076 = vmax.xlane.f32.xlu0 %v3075_v54  ;;  %3085 = vmax.xlane.f32.xlu1 %v3084_v23  ;;  %v4331_v0 = vpop.f32.mrf.mxu0 }
 0xcf3   :  { %v6957_v56 = vmul.f32 5.0, %v4331_v0  ;;  %3481 = vst.msk [vmem:[%s7516_s10 + $0x30] sm:$0xff] %vm1536_vm1, %v4331_v0  ;;  %v3078_v42 = vsel %vm1536_vm1, %v6947_v29, -inf }
 0xcf4   :  { %v2932_v4 = vpop.f32.mrf.mxu0 }
 0xcf5   :  { %v6963_v52 = vmul.f32 5.0, %v2932_v4  ;;  %3479 = vst.msk [vmem:[%s7516_s10 + $0x20] sm:$0xff] %vm1536_vm1, %v2932_v4  ;;  %v3093_v20 = vsel %vm1536_vm1, %v6957_v56, -inf }
 0xcf6   :  { %3079 = vmax.xlane.f32.xlu1 %v3078_v42  ;;  %3094 = vmax.xlane.f32.xlu0 %v3093_v20  ;;  %v4332_v2 = vpop.f32.mrf.mxu0 }
 0xcf7   :  { %v6973_v3 = vmul.f32 5.0, %v4332_v2  ;;  %3482 = vst.msk [vmem:[%s7516_s10 + $0x38] sm:$0xff] %vm1536_vm1, %v4332_v2  ;;  %v3087_v24 = vsel %vm1536_vm1, %v6963_v52, -inf }
 0xcf8   :  { %v2935_v27 = vpop.f32.mrf.mxu0 }
 0xcf9   :  { %v6979_v44 = vmul.f32 5.0, %v2935_v27  ;;  %3480 = vst.msk [vmem:[%s7516_s10 + $0x28] sm:$0xff] %vm1536_vm1, %v2935_v27  ;;  %v3096_v10 = vsel %vm1536_vm1, %v6973_v3, -inf }
 0xcfa   :  { %3088 = vmax.xlane.f32.xlu0 %v3087_v24  ;;  %3097 = vmax.xlane.f32.xlu1 %v3096_v10  ;;  %v4335_v36 = vpop.f32.mrf.mxu0 }
 0xcfb   :  { %v6989_v59 = vmul.f32 5.0, %v4335_v36  ;;  %3485 = vst.msk [vmem:[%s7516_s10 + $0x50] sm:$0xff] %vm1536_vm1, %v4335_v36  ;;  %v3090_v31 = vsel %vm1536_vm1, %v6979_v44, -inf }
 0xcfc   :  { %v2948_v50 = vpop.f32.mrf.mxu0 }
 0xcfd   :  { %v6995_v25 = vmul.f32 5.0, %v2948_v50  ;;  %3483 = vst.msk [vmem:[%s7516_s10 + $0x40] sm:$0xff] %vm1536_vm1, %v2948_v50  ;;  %v3105_v12 = vsel %vm1536_vm1, %v6989_v59, -inf }
 0xcfe   :  { %3091 = vmax.xlane.f32.xlu1 %v3090_v31  ;;  %3106 = vmax.xlane.f32.xlu0 %v3105_v12  ;;  %v4336_v26 = vpop.f32.mrf.mxu0 }
 0xcff   :  { %v7005_v7 = vmul.f32 5.0, %v4336_v26  ;;  %3486 = vst.msk [vmem:[%s7516_s10 + $0x58] sm:$0xff] %vm1536_vm1, %v4336_v26  ;;  %v3099_v40 = vsel %vm1536_vm1, %v6995_v25, -inf }
 0xd00   :  { %v2951_v38 = vpop.f32.mrf.mxu0 }
 0xd01   :  { %v7011_v49 = vmul.f32 5.0, %v2951_v38  ;;  %3484 = vst.msk [vmem:[%s7516_s10 + $0x48] sm:$0xff] %vm1536_vm1, %v2951_v38  ;;  %v3108_v45 = vsel %vm1536_vm1, %v7005_v7, -inf }
 0xd02   :  { %3100 = vmax.xlane.f32.xlu0 %v3099_v40  ;;  %3109 = vmax.xlane.f32.xlu1 %v3108_v45  ;;  %v4339_v22 = vpop.f32.mrf.mxu0 }
 0xd03   :  { %v7021_v57 = vmul.f32 5.0, %v4339_v22  ;;  %3489 = vst.msk [vmem:[%s7516_s10 + $0x70] sm:$0xff] %vm1536_vm1, %v4339_v22  ;;  %v3102_v33 = vsel %vm1536_vm1, %v7011_v49, -inf }
 0xd04   :  { %v2964_v15 = vpop.f32.mrf.mxu0 }
 0xd05   :  { %v7027_v5 = vmul.f32 5.0, %v2964_v15  ;;  %3487 = vst.msk [vmem:[%s7516_s10 + $0x60] sm:$0xff] %vm1536_vm1, %v2964_v15  ;;  %v3117_v1 = vsel %vm1536_vm1, %v7021_v57, -inf }
 0xd06   :  { %3103 = vmax.xlane.f32.xlu1 %v3102_v33  ;;  %3118 = vmax.xlane.f32.xlu0 %v3117_v1  ;;  %v4340_v55 = vpop.f32.mrf.mxu0 }
 0xd07   :  { %v7037_v39 = vmul.f32 5.0, %v4340_v55  ;;  %3490 = vst.msk [vmem:[%s7516_s10 + $0x78] sm:$0xff] %vm1536_vm1, %v4340_v55  ;;  %v3111_v61 = vsel %vm1536_vm1, %v7027_v5, -inf }
 0xd08   :  { %v2967_v17 = vpop.f32.mrf.mxu0 }
 0xd09   :  { %v7043_v62 = vmul.f32 5.0, %v2967_v17  ;;  %3488 = vst.msk [vmem:[%s7516_s10 + $0x68] sm:$0xff] %vm1536_vm1, %v2967_v17  ;;  %v3120_v47 = vsel %vm1536_vm1, %v7037_v39, -inf }
 0xd0a   :  { %3112 = vmax.xlane.f32.xlu0 %v3111_v61  ;;  %3121 = vmax.xlane.f32.xlu1 %v3120_v47  ;;  %v4343_v63 = vpop.f32.mrf.mxu0 }
 0xd0b   :  { %v7053_v53 = vmul.f32 5.0, %v4343_v63  ;;  %3493 = vst.msk [vmem:[%s7516_s10 + $0x90] sm:$0xff] %vm1536_vm1, %v4343_v63  ;;  %v3114_v9 = vsel %vm1536_vm1, %v7043_v62, -inf }
 0xd0c   :  { %v2980_v51 = vpop.f32.mrf.mxu0 }
 0xd0d   :  { %v7059_v16 = vmul.f32 5.0, %v2980_v51  ;;  %3491 = vst.msk [vmem:[%s7516_s10 + $0x80] sm:$0xff] %vm1536_vm1, %v2980_v51  ;;  %v3129_v60 = vsel %vm1536_vm1, %v7053_v53, -inf }
 0xd0e   :  { %3115 = vmax.xlane.f32.xlu1 %v3114_v9  ;;  %3130 = vmax.xlane.f32.xlu0 %v3129_v60  ;;  %v4344_v8 = vpop.f32.mrf.mxu0 }
 0xd0f   :  { %v7069_v14 = vmul.f32 5.0, %v4344_v8  ;;  %3494 = vst.msk [vmem:[%s7516_s10 + $0x98] sm:$0xff] %vm1536_vm1, %v4344_v8  ;;  %v3123_v37 = vsel %vm1536_vm1, %v7059_v16, -inf }
 0xd10   :  { %v2983_v41 = vpop.f32.mrf.mxu0 }
 0xd11   :  { %v7075_v46 = vmul.f32 5.0, %v2983_v41  ;;  %3492 = vst.msk [vmem:[%s7516_s10 + $0x88] sm:$0xff] %vm1536_vm1, %v2983_v41  ;;  %v3132_v13 = vsel %vm1536_vm1, %v7069_v14, -inf }
 0xd12   :  { %3124 = vmax.xlane.f32.xlu0 %v3123_v37  ;;  %3133 = vmax.xlane.f32.xlu1 %v3132_v13  ;;  %v4347_v34 = vpop.f32.mrf.mxu0 }
 0xd13   :  { %v7085_v32 = vmul.f32 5.0, %v4347_v34  ;;  %3497 = vst.msk [vmem:[%s7516_s10 + $0xb0] sm:$0xff] %vm1536_vm1, %v4347_v34  ;;  %v3126_v21 = vsel %vm1536_vm1, %v7075_v46, -inf }
 0xd14   :  { %v2996_v11 = vpop.f32.mrf.mxu0 }
 0xd15   :  { %v7091_v6 = vmul.f32 5.0, %v2996_v11  ;;  %3495 = vst.msk [vmem:[%s7516_s10 + $0xa0] sm:$0xff] %vm1536_vm1, %v2996_v11  ;;  %v3141_v28 = vsel %vm1536_vm1, %v7085_v32, -inf }
 0xd16   :  { %3127 = vmax.xlane.f32.xlu1 %v3126_v21  ;;  %3142 = vmax.xlane.f32.xlu0 %v3141_v28  ;;  %v4348_v58 = vpop.f32.mrf.mxu0 }
 0xd17   :  { %v7101_v19 = vmul.f32 5.0, %v4348_v58  ;;  %3498 = vst.msk [vmem:[%s7516_s10 + $0xb8] sm:$0xff] %vm1536_vm1, %v4348_v58  ;;  %v3135_v54 = vsel %vm1536_vm1, %v7091_v6, -inf }
 0xd18   :  { %v2999_v48 = vpop.f32.mrf.mxu0 }
 0xd19   :  { %v7107_v30 = vmul.f32 5.0, %v2999_v48  ;;  %3496 = vst.msk [vmem:[%s7516_s10 + $0xa8] sm:$0xff] %vm1536_vm1, %v2999_v48  ;;  %v3144_v23 = vsel %vm1536_vm1, %v7101_v19, -inf }
 0xd1a   :  { %3136 = vmax.xlane.f32.xlu0 %v3135_v54  ;;  %3145 = vmax.xlane.f32.xlu1 %v3144_v23  ;;  %v4351_v0 = vpop.f32.mrf.mxu0 }
 0xd1b   :  { %v7117_v4 = vmul.f32 5.0, %v4351_v0  ;;  %3501 = vst.msk [vmem:[%s7516_s10 + $0xd0] sm:$0xff] %vm1536_vm1, %v4351_v0  ;;  %v3138_v2 = vsel %vm1536_vm1, %v7107_v30, -inf }
 0xd1c   :  { %v3012_v42 = vpop.f32.mrf.mxu0 }
 0xd1d   :  { %v7123_v20 = vmul.f32 5.0, %v3012_v42  ;;  %3499 = vst.msk [vmem:[%s7516_s10 + $0xc0] sm:$0xff] %vm1536_vm1, %v3012_v42  ;;  %v3153_v27 = vsel %vm1536_vm1, %v7117_v4, -inf }
 0xd1e   :  { %3139 = vmax.xlane.f32.xlu1 %v3138_v2  ;;  %3154 = vmax.xlane.f32.xlu0 %v3153_v27  ;;  %v4352_v24 = vpop.f32.mrf.mxu0 }
 0xd1f   :  { %v7133_v10 = vmul.f32 5.0, %v4352_v24  ;;  %3502 = vst.msk [vmem:[%s7516_s10 + $0xd8] sm:$0xff] %vm1536_vm1, %v4352_v24  ;;  %v3147_v31 = vsel %vm1536_vm1, %v7123_v20, -inf }
 0xd20   :  { %v3015_v36 = vpop.f32.mrf.mxu0 }
 0xd21   :  { %v7139_v50 = vmul.f32 5.0, %v3015_v36  ;;  %3500 = vst.msk [vmem:[%s7516_s10 + $0xc8] sm:$0xff] %vm1536_vm1, %v3015_v36  ;;  %v3156_v12 = vsel %vm1536_vm1, %v7133_v10, -inf }
 0xd22   :  { %3148 = vmax.xlane.f32.xlu0 %v3147_v31  ;;  %3157 = vmax.xlane.f32.xlu1 %v3156_v12  ;;  %v4355_v26 = vpop.f32.mrf.mxu0 }
 0xd23   :  { %3505 = vst.msk [vmem:[%s7516_s10 + $0xf0] sm:$0xff] %vm1536_vm1, %v4355_v26  ;;  %v3150_v45 = vsel %vm1536_vm1, %v7139_v50, -inf  ;;  %v7161_v15 = vmul.f32 5.0, %v4355_v26 }
 0xd24   :  { %v3028_v38 = vpop.f32.mrf.mxu0 }
 0xd25   :  { %v7153_v40 = vmul.f32 5.0, %v3028_v38  ;;  %3503 = vst.msk [vmem:[%s7516_s10 + $0xe0] sm:$0xff] %vm1536_vm1, %v3028_v38  ;;  %v3165_v61 = vsel %vm1536_vm1, %v7161_v15, -inf }
 0xd26   :  { %3151 = vmax.xlane.f32.xlu1 %v3150_v45  ;;  %v4356_v22 = vpop.f32.mrf.mxu0 }
 0xd27   :  { %3506 = vst.msk [vmem:[%s7516_s10 + $0xf8] sm:$0xff] %vm1536_vm1, %v4356_v22  ;;  %v3159_v33 = vsel %vm1536_vm1, %v7153_v40, -inf  ;;  %v7175_v17 = vmul.f32 5.0, %v4356_v22 }
 0xd28   :  { %3160 = vmax.xlane.f32.xlu0 %v3159_v33  ;;  %v3031_v1 = vpop.f32.mrf.mxu0 }
 0xd29   :  { %v7169_v55 = vmul.f32 5.0, %v3031_v1  ;;  %3504 = vst.msk [vmem:[%s7516_s10 + $0xe8] sm:$0xff] %vm1536_vm1, %v3031_v1  ;;  %v3168_v63 = vsel %vm1536_vm1, %v7175_v17, -inf  ;;  %s4842_s10 = smov [#allocation2]  }
 0xd2a   :  { %s3516_s14 = sshll.u32 %s4842_s10, 4  ;;  %s3517_s14 = int_to_ptr.vmem [resolvable:$true] %s3516_s14 }
 0xd2b   :  { %v3162_v47 = vsel %vm1536_vm1, %v7169_v55, -inf  ;;  %s4820_s15 = scalar_lea.vmem %s3517_s14, 4096  ;;  %p4825_p1 = scmp.lt.s32.totalorder %s3517_s14, %s3517_s14 }
 0xd2c   :  { %3166 = vmax.xlane.f32.xlu0 %v3165_v61  ;;  %3163 = vmax.xlane.f32.xlu1 %v3162_v47  ;;  %p4821_p0 = scmp.ne.s32.totalorder %s3517_s14, %s4820_s15  ;;  %p4826_p2 = scmp.lt.s32.totalorder %s4820_s15, %s4820_s15 }
 0xd2e   :  { %p4827_p3 = por %p4826_p2, %p4825_p1 }
 0xd30   :  { %3169 = vmax.xlane.f32.xlu1 %v3168_v63  ;;  %p4828_p4 = pnand %p4827_p3, %p4821_p0 }
 0xd77   :  { %v3083_v51 = vpop.xlane.xlu0 %3082 }
 0xd78   :  { %v3173_v9 = vsub.f32 %v6927_v35, %v3083_v51 }
 0xd7a   :  { %v3207_v60 = vmul.f32 1.442695, %v3173_v9 }
 0xd7b   :  { %v3077_v8 = vpop.xlane.xlu0 %3076  ;;  %v3086_v41 = vpop.xlane.xlu1 %3085 }
 0xd7c   :  { %4692 = vpow2.f32 %v3207_v60  ;;  %v3171_v37 = vsub.f32 %v6933_v43, %v3077_v8  ;;  %v3174_v13 = vsub.f32 %v6941_v18, %v3086_v41 }
 0xd7e   :  { %v3203_v34 = vmul.f32 1.442695, %v3171_v37  ;;  %v3209_v11 = vmul.f32 1.442695, %v3174_v13 }
 0xd7f   :  { %v3080_v21 = vpop.xlane.xlu1 %3079  ;;  %v3095_v28 = vpop.xlane.xlu0 %3094 }
 0xd80   :  { %4694 = vpow2.f32 %v3203_v34  ;;  %v3172_v58 = vsub.f32 %v6947_v29, %v3080_v21  ;;  %v3177_v48 = vsub.f32 %v6957_v56, %v3095_v28 }
 0xd81   :  { %4696 = vpow2.f32 %v3209_v11 }
 0xd82   :  { %v3205_v54 = vmul.f32 1.442695, %v3172_v58  ;;  %v3215_v35 = vmul.f32 1.442695, %v3177_v48 }
 0xd83   :  { %v3089_v23 = vpop.xlane.xlu0 %3088  ;;  %v3098_v0 = vpop.xlane.xlu1 %3097 }
 0xd84   :  { %4698 = vpow2.f32 %v3205_v54  ;;  %v3175_v42 = vsub.f32 %v6963_v52, %v3089_v23  ;;  %v3178_v43 = vsub.f32 %v6973_v3, %v3098_v0 }
 0xd85   :  { %4700 = vpow2.f32 %v3215_v35 }
 0xd86   :  { %v3211_v18 = vmul.f32 1.442695, %v3175_v42  ;;  %v3217_v2 = vmul.f32 1.442695, %v3178_v43 }
 0xd87   :  { %v3092_v27 = vpop.xlane.xlu1 %3091  ;;  %v3107_v24 = vpop.xlane.xlu0 %3106 }
 0xd88   :  { %4702 = vpow2.f32 %v3211_v18  ;;  %v3176_v29 = vsub.f32 %v6979_v44, %v3092_v27  ;;  %v3181_v56 = vsub.f32 %v6989_v59, %v3107_v24 }
 0xd89   :  { %v7192_v36 = vpop.eup %4692  ;;  %4704 = vpow2.f32 %v3217_v2 }
 0xd8a   :  { %v3213_v31 = vmul.f32 1.442695, %v3176_v29  ;;  %v3223_v12 = vmul.f32 1.442695, %v3181_v56  ;;  %v3273_v52 = vsel %vm1536_vm1, %v7192_v36, 0.0 }
 0xd8b   :  { %v3101_v26 = vpop.xlane.xlu0 %3100  ;;  %v3110_v3 = vpop.xlane.xlu1 %3109  ;;  %3274 = vadd.xlane.f32.xlu0 %v3273_v52 }
 0xd8c   :  { %4706 = vpow2.f32 %v3213_v31  ;;  %v3179_v38 = vsub.f32 %v6995_v25, %v3101_v26  ;;  %v3182_v45 = vsub.f32 %v7005_v7, %v3110_v3 }
 0xd8d   :  { %v7198_v22 = vpop.eup %4694  ;;  %4708 = vpow2.f32 %v3223_v12 }
 0xd8e   :  { %v7200_v44 = vpop.eup %4696  ;;  %v3219_v59 = vmul.f32 1.442695, %v3179_v38  ;;  %v3225_v33 = vmul.f32 1.442695, %v3182_v45  ;;  %v3267_v1 = vsel %vm1536_vm1, %v7198_v22, 0.0 }
 0xd8f   :  { %v3104_v61 = vpop.xlane.xlu1 %3103  ;;  %v3119_v47 = vpop.xlane.xlu0 %3118  ;;  %3268 = vadd.xlane.f32.xlu0 %v3267_v1  ;;  %v3276_v63 = vsel %vm1536_vm1, %v7200_v44, 0.0 }
 0xd90   :  { %4710 = vpow2.f32 %v3219_v59  ;;  %v3180_v25 = vsub.f32 %v7011_v49, %v3104_v61  ;;  %v3185_v7 = vsub.f32 %v7021_v57, %v3119_v47  ;;  %3277 = vadd.xlane.f32.xlu1 %v3276_v63 }
 0xd91   :  { %v7208_v51 = vpop.eup %4698  ;;  %4712 = vpow2.f32 %v3225_v33 }
 0xd92   :  { %v7210_v9 = vpop.eup %4700  ;;  %v3221_v60 = vmul.f32 1.442695, %v3180_v25  ;;  %v3231_v8 = vmul.f32 1.442695, %v3185_v7  ;;  %v3270_v41 = vsel %vm1536_vm1, %v7208_v51, 0.0 }
 0xd93   :  { %v3113_v37 = vpop.xlane.xlu0 %3112  ;;  %v3122_v13 = vpop.xlane.xlu1 %3121  ;;  %v3285_v34 = vsel %vm1536_vm1, %v7210_v9, 0.0 }
 0xd94   :  { %4714 = vpow2.f32 %v3221_v60  ;;  %v3183_v49 = vsub.f32 %v7027_v5, %v3113_v37  ;;  %v3186_v57 = vsub.f32 %v7037_v39, %v3122_v13  ;;  %3286 = vadd.xlane.f32.xlu0 %v3285_v34  ;;  %3271 = vadd.xlane.f32.xlu1 %v3270_v41 }
 0xd95   :  { %v7218_v11 = vpop.eup %4702  ;;  %4716 = vpow2.f32 %v3231_v8 }
 0xd96   :  { %v7220_v21 = vpop.eup %4704  ;;  %v3227_v28 = vmul.f32 1.442695, %v3183_v49  ;;  %v3233_v58 = vmul.f32 1.442695, %v3186_v57  ;;  %v3279_v48 = vsel %vm1536_vm1, %v7218_v11, 0.0 }
 0xd97   :  { %v3116_v54 = vpop.xlane.xlu1 %3115  ;;  %v3131_v35 = vpop.xlane.xlu0 %3130  ;;  %v3288_v23 = vsel %vm1536_vm1, %v7220_v21, 0.0 }
 0xd98   :  { %4718 = vpow2.f32 %v3227_v28  ;;  %v3184_v5 = vsub.f32 %v7043_v62, %v3116_v54  ;;  %v3189_v39 = vsub.f32 %v7053_v53, %v3131_v35  ;;  %3280 = vadd.xlane.f32.xlu0 %v3279_v48  ;;  %3289 = vadd.xlane.f32.xlu1 %v3288_v23 }
 0xd99   :  { %v7228_v0 = vpop.eup %4706  ;;  %4720 = vpow2.f32 %v3233_v58 }
 0xd9a   :  { %v7230_v42 = vpop.eup %4708  ;;  %v3229_v43 = vmul.f32 1.442695, %v3184_v5  ;;  %v3239_v18 = vmul.f32 1.442695, %v3189_v39  ;;  %v3282_v2 = vsel %vm1536_vm1, %v7228_v0, 0.0 }
 0xd9b   :  { %v3125_v27 = vpop.xlane.xlu0 %3124  ;;  %v3134_v24 = vpop.xlane.xlu1 %3133  ;;  %v3297_v29 = vsel %vm1536_vm1, %v7230_v42, 0.0 }
 0xd9c   :  { %4722 = vpow2.f32 %v3229_v43  ;;  %v3187_v62 = vsub.f32 %v7059_v16, %v3125_v27  ;;  %v3190_v53 = vsub.f32 %v7069_v14, %v3134_v24  ;;  %3298 = vadd.xlane.f32.xlu0 %v3297_v29  ;;  %3283 = vadd.xlane.f32.xlu1 %v3282_v2 }
 0xd9d   :  { %v7238_v56 = vpop.eup %4710  ;;  %4724 = vpow2.f32 %v3239_v18 }
 0xd9e   :  { %v7240_v31 = vpop.eup %4712  ;;  %v3235_v12 = vmul.f32 1.442695, %v3187_v62  ;;  %v3241_v52 = vmul.f32 1.442695, %v3190_v53  ;;  %v3291_v26 = vsel %vm1536_vm1, %v7238_v56, 0.0 }
 0xd9f   :  { %v3128_v3 = vpop.xlane.xlu1 %3127  ;;  %v3143_v38 = vpop.xlane.xlu0 %3142  ;;  %v3300_v45 = vsel %vm1536_vm1, %v7240_v31, 0.0 }
 0xda0   :  { %4726 = vpow2.f32 %v3235_v12  ;;  %v3188_v16 = vsub.f32 %v7075_v46, %v3128_v3  ;;  %v3193_v14 = vsub.f32 %v7085_v32, %v3143_v38  ;;  %3292 = vadd.xlane.f32.xlu0 %v3291_v26  ;;  %3301 = vadd.xlane.f32.xlu1 %v3300_v45 }
 0xda1   :  { %v7248_v59 = vpop.eup %4714  ;;  %4728 = vpow2.f32 %v3241_v52 }
 0xda2   :  { %v7250_v33 = vpop.eup %4716  ;;  %v3237_v1 = vmul.f32 1.442695, %v3188_v16  ;;  %v3247_v61 = vmul.f32 1.442695, %v3193_v14  ;;  %v3294_v47 = vsel %vm1536_vm1, %v7248_v59, 0.0 }
 0xda3   :  { %v3137_v63 = vpop.xlane.xlu0 %3136  ;;  %v3146_v25 = vpop.xlane.xlu1 %3145  ;;  %v3309_v7 = vsel %vm1536_vm1, %v7250_v33, 0.0 }
 0xda4   :  { %4730 = vpow2.f32 %v3237_v1  ;;  %v3191_v46 = vsub.f32 %v7091_v6, %v3137_v63  ;;  %v3194_v32 = vsub.f32 %v7101_v19, %v3146_v25  ;;  %3310 = vadd.xlane.f32.xlu0 %v3309_v7  ;;  %3295 = vadd.xlane.f32.xlu1 %v3294_v47 }
 0xda5   :  { %v7258_v60 = vpop.eup %4718  ;;  %4732 = vpow2.f32 %v3247_v61 }
 0xda6   :  { %v7260_v8 = vpop.eup %4720  ;;  %v3243_v41 = vmul.f32 1.442695, %v3191_v46  ;;  %v3249_v37 = vmul.f32 1.442695, %v3194_v32  ;;  %v3303_v13 = vsel %vm1536_vm1, %v7258_v60, 0.0 }
 0xda7   :  { %v3140_v34 = vpop.xlane.xlu1 %3139  ;;  %v3155_v49 = vpop.xlane.xlu0 %3154  ;;  %v3312_v57 = vsel %vm1536_vm1, %v7260_v8, 0.0 }
 0xda8   :  { %4734 = vpow2.f32 %v3243_v41  ;;  %v3192_v6 = vsub.f32 %v7107_v30, %v3140_v34  ;;  %v3197_v19 = vsub.f32 %v7117_v4, %v3155_v49  ;;  %3304 = vadd.xlane.f32.xlu0 %v3303_v13  ;;  %3313 = vadd.xlane.f32.xlu1 %v3312_v57 }
 0xda9   :  { %v7268_v28 = vpop.eup %4722  ;;  %4736 = vpow2.f32 %v3249_v37 }
 0xdaa   :  { %v7270_v58 = vpop.eup %4724  ;;  %v3245_v48 = vmul.f32 1.442695, %v3192_v6  ;;  %v3255_v54 = vmul.f32 1.442695, %v3197_v19  ;;  %v3306_v35 = vsel %vm1536_vm1, %v7268_v28, 0.0 }
 0xdab   :  { %v3149_v23 = vpop.xlane.xlu0 %3148  ;;  %v3158_v5 = vpop.xlane.xlu1 %3157  ;;  %v3321_v39 = vsel %vm1536_vm1, %v7270_v58, 0.0 }
 0xdac   :  { %4738 = vpow2.f32 %v3245_v48  ;;  %v3195_v30 = vsub.f32 %v7123_v20, %v3149_v23  ;;  %v3198_v4 = vsub.f32 %v7133_v10, %v3158_v5  ;;  %3322 = vadd.xlane.f32.xlu0 %v3321_v39  ;;  %3307 = vadd.xlane.f32.xlu1 %v3306_v35 }
 0xdad   :  { %v7278_v43 = vpop.eup %4726  ;;  %4740 = vpow2.f32 %v3255_v54 }
 0xdae   :  { %v7280_v18 = vpop.eup %4728  ;;  %v3251_v2 = vmul.f32 1.442695, %v3195_v30  ;;  %v3257_v27 = vmul.f32 1.442695, %v3198_v4  ;;  %v3315_v24 = vsel %vm1536_vm1, %v7278_v43, 0.0 }
 0xdaf   :  { %v3152_v29 = vpop.xlane.xlu1 %3151  ;;  %v3324_v62 = vsel %vm1536_vm1, %v7280_v18, 0.0 }
 0xdb0   :  { %4742 = vpow2.f32 %v3251_v2  ;;  %v3196_v20 = vsub.f32 %v7139_v50, %v3152_v29  ;;  %3316 = vadd.xlane.f32.xlu0 %v3315_v24  ;;  %3325 = vadd.xlane.f32.xlu1 %v3324_v62 }
 0xdb1   :  { %v7287_v10 = vpop.eup %4730  ;;  %4744 = vpow2.f32 %v3257_v27  ;;  %v3161_v53 = vpop.xlane.xlu0 %3160 }
 0xdb2   :  { %v7289_v12 = vpop.eup %4732  ;;  %v3253_v52 = vmul.f32 1.442695, %v3196_v20  ;;  %v3199_v26 = vsub.f32 %v7153_v40, %v3161_v53  ;;  %v3318_v3 = vsel %vm1536_vm1, %v7287_v10, 0.0 }
 0xdb3   :  { %v3333_v38 = vsel %vm1536_vm1, %v7289_v12, 0.0 }
 0xdb4   :  { %4746 = vpow2.f32 %v3253_v52  ;;  %v3259_v45 = vmul.f32 1.442695, %v3199_v26  ;;  %3334 = vadd.xlane.f32.xlu0 %v3333_v38  ;;  %3319 = vadd.xlane.f32.xlu1 %v3318_v3 }
 0xdb5   :  { %v7296_v50 = vpop.eup %4734  ;;  %v3167_v16 = vpop.xlane.xlu0 %3166 }
 0xdb6   :  { %v3164_v14 = vpop.xlane.xlu1 %3163  ;;  %v7298_v1 = vpop.eup %4736  ;;  %4748 = vpow2.f32 %v3259_v45  ;;  %v3201_v61 = vsub.f32 %v7161_v15, %v3167_v16  ;;  %v3327_v47 = vsel %vm1536_vm1, %v7296_v50, 0.0 }
 0xdb7   :  { %v3200_v40 = vsub.f32 %v7169_v55, %v3164_v14  ;;  %v3336_v63 = vsel %vm1536_vm1, %v7298_v1, 0.0 }
 0xdb8   :  { %v3263_v25 = vmul.f32 1.442695, %v3201_v61  ;;  %3328 = vadd.xlane.f32.xlu0 %v3327_v47  ;;  %3337 = vadd.xlane.f32.xlu1 %v3336_v63 }
 0xdb9   :  { %v3261_v7 = vmul.f32 1.442695, %v3200_v40  ;;  %v7306_v46 = vpop.eup %4738 }
 0xdba   :  { %v3170_v32 = vpop.xlane.xlu1 %3169  ;;  %v7308_v41 = vpop.eup %4740  ;;  %4750 = vpow2.f32 %v3263_v25  ;;  %v3330_v55 = vsel %vm1536_vm1, %v7306_v46, 0.0 }
 0xdbb   :  { %v3202_v15 = vsub.f32 %v7175_v17, %v3170_v32  ;;  %4752 = vpow2.f32 %v3261_v7  ;;  %v3345_v37 = vsel %vm1536_vm1, %v7308_v41, 0.0 }
 0xdbc   :  { %3346 = vadd.xlane.f32.xlu0 %v3345_v37  ;;  %3331 = vadd.xlane.f32.xlu1 %v3330_v55 }
 0xdbd   :  { %v3265_v13 = vmul.f32 1.442695, %v3202_v15  ;;  %v7315_v34 = vpop.eup %4742 }
 0xdbe   :  { %v7317_v49 = vpop.eup %4744  ;;  %v3339_v57 = vsel %vm1536_vm1, %v7315_v34, 0.0 }
 0xdbf   :  { %4754 = vpow2.f32 %v3265_v13  ;;  %v3348_v17 = vsel %vm1536_vm1, %v7317_v49, 0.0 }
 0xdc0   :  { %3340 = vadd.xlane.f32.xlu0 %v3339_v57  ;;  %3349 = vadd.xlane.f32.xlu1 %v3348_v17 }
 0xdc1   :  { %v7323_v6 = vpop.eup %4746 }
 0xdc2   :  { %v3342_v19 = vsel %vm1536_vm1, %v7323_v6, 0.0 }
 0xdc3   :  { %v7327_v48 = vpop.eup %4748 }
 0xdc4   :  { %3343 = vadd.xlane.f32.xlu1 %v3342_v19  ;;  %v3351_v54 = vsel %vm1536_vm1, %v7327_v48, 0.0 }
 0xdc5   :  { %3352 = vadd.xlane.f32.xlu0 %v3351_v54 }
 0xdc7   :  { %v7331_v35 = vpop.eup %4750 }
 0xdc8   :  { %v7333_v23 = vpop.eup %4752  ;;  %v3357_v5 = vsel %vm1536_vm1, %v7331_v35, 0.0 }
 0xdc9   :  { %3358 = vadd.xlane.f32.xlu0 %v3357_v5  ;;  %v3354_v39 = vsel %vm1536_vm1, %v7333_v23, 0.0 }
 0xdca   :  { %3355 = vadd.xlane.f32.xlu1 %v3354_v39 }
 0xdcc   :  { %v7339_v30 = vpop.eup %4754 }
 0xdcd   :  { %v3360_v4 = vsel %vm1536_vm1, %v7339_v30, 0.0 }
 0xdce   :  { %3361 = vadd.xlane.f32.xlu1 %v3360_v4 }
 0xdcf   :  { %4831 = shalt.err (!%p4828_p4)
}
 0xdd0   :  { %s4843_s16 = smov 128   ;;  %s4844_s17 = smov 8  }
 0xdd1   :  { %3522 = dma.vmem_to_hbm [thread:$0]  %s3517_s14, 4096, %s7515_s9, [#allocation3], %s4843_s16, %s4843_s16, %s4844_s17  }
 0xe14   :  { %v3275_v2 = vpop.xlane.xlu0 %3274 }
 0xe15   :  { %4756 = vrcp.f32 %v3275_v2 }
 0xe18   :  { %v3269_v27 = vpop.xlane.xlu0 %3268 }
 0xe19   :  { %4758 = vrcp.f32 %v3269_v27  ;;  %v3278_v24 = vpop.xlane.xlu1 %3277 }
 0xe1a   :  { %4760 = vrcp.f32 %v3278_v24 }
 0xe1d   :  { %v3287_v29 = vpop.xlane.xlu0 %3286  ;;  %v3272_v62 = vpop.xlane.xlu1 %3271 }
 0xe1e   :  { %4762 = vrcp.f32 %v3287_v29 }
 0xe1f   :  { %4764 = vrcp.f32 %v3272_v62 }
 0xe21   :  { %v3281_v20 = vpop.xlane.xlu0 %3280  ;;  %v3290_v53 = vpop.xlane.xlu1 %3289 }
 0xe22   :  { %v4757_v52 = vpop.eup %4756  ;;  %4766 = vrcp.f32 %v3281_v20 }
 0xe23   :  { %v3397_v26 = vmul.f32 %v4757_v52, %v7192_v36  ;;  %4768 = vrcp.f32 %v3290_v53 }
 0xe25   :  { %3445 = vst.msk [vmem:[%s7514_s8 + $0x10] sm:$0xff] %vm1536_vm1, %v3397_v26  ;;  %v3299_v3 = vpop.xlane.xlu0 %3298  ;;  %v3284_v38 = vpop.xlane.xlu1 %3283 }
 0xe26   :  { %v4759_v45 = vpop.eup %4758  ;;  %4770 = vrcp.f32 %v3299_v3 }
 0xe27   :  { %v4761_v16 = vpop.eup %4760  ;;  %v3395_v14 = vmul.f32 %v4759_v45, %v7198_v22  ;;  %4772 = vrcp.f32 %v3284_v38 }
 0xe28   :  { %v3398_v61 = vmul.f32 %v4761_v16, %v7200_v44 }
 0xe29   :  { %3443 = vst.msk [vmem:[%s7514_s8] sm:$0xff] %vm1536_vm1, %v3395_v14  ;;  %v3293_v36 = vpop.xlane.xlu0 %3292  ;;  %v3302_v40 = vpop.xlane.xlu1 %3301 }
 0xe2a   :  { %3446 = vst.msk [vmem:[%s7514_s8 + $0x18] sm:$0xff] %vm1536_vm1, %v3398_v61  ;;  %4774 = vrcp.f32 %v3293_v36 }
 0xe2b   :  { %v4763_v47 = vpop.eup %4762  ;;  %4776 = vrcp.f32 %v3302_v40 }
 0xe2c   :  { %v4765_v63 = vpop.eup %4764  ;;  %v3401_v22 = vmul.f32 %v4763_v47, %v7210_v9 }
 0xe2d   :  { %v3396_v44 = vmul.f32 %v4765_v63, %v7208_v51  ;;  %v3311_v25 = vpop.xlane.xlu0 %3310  ;;  %v3296_v7 = vpop.xlane.xlu1 %3295 }
 0xe2e   :  { %3449 = vst.msk [vmem:[%s7514_s8 + $0x30] sm:$0xff] %vm1536_vm1, %v3401_v22  ;;  %4778 = vrcp.f32 %v3311_v25 }
 0xe2f   :  { %v4767_v32 = vpop.eup %4766  ;;  %3444 = vst.msk [vmem:[%s7514_s8 + $0x8] sm:$0xff] %vm1536_vm1, %v3396_v44  ;;  %4780 = vrcp.f32 %v3296_v7 }
 0xe30   :  { %v4769_v15 = vpop.eup %4768  ;;  %v3399_v9 = vmul.f32 %v4767_v32, %v7218_v11 }
 0xe31   :  { %v3402_v51 = vmul.f32 %v4769_v15, %v7220_v21  ;;  %v3305_v55 = vpop.xlane.xlu0 %3304  ;;  %v3314_v37 = vpop.xlane.xlu1 %3313 }
 0xe32   :  { %3447 = vst.msk [vmem:[%s7514_s8 + $0x20] sm:$0xff] %vm1536_vm1, %v3399_v9  ;;  %4782 = vrcp.f32 %v3305_v55 }
 0xe33   :  { %v4771_v13 = vpop.eup %4770  ;;  %3450 = vst.msk [vmem:[%s7514_s8 + $0x38] sm:$0xff] %vm1536_vm1, %v3402_v51  ;;  %4784 = vrcp.f32 %v3314_v37 }
 0xe34   :  { %v4773_v57 = vpop.eup %4772  ;;  %v3405_v11 = vmul.f32 %v4771_v13, %v7230_v42 }
 0xe35   :  { %v3400_v21 = vmul.f32 %v4773_v57, %v7228_v0  ;;  %v3323_v17 = vpop.xlane.xlu0 %3322  ;;  %v3308_v19 = vpop.xlane.xlu1 %3307 }
 0xe36   :  { %3453 = vst.msk [vmem:[%s7514_s8 + $0x50] sm:$0xff] %vm1536_vm1, %v3405_v11  ;;  %4786 = vrcp.f32 %v3323_v17 }
 0xe37   :  { %v4775_v54 = vpop.eup %4774  ;;  %3448 = vst.msk [vmem:[%s7514_s8 + $0x28] sm:$0xff] %vm1536_vm1, %v3400_v21  ;;  %4788 = vrcp.f32 %v3308_v19 }
 0xe38   :  { %v4777_v5 = vpop.eup %4776  ;;  %v3403_v42 = vmul.f32 %v4775_v54, %v7238_v56 }
 0xe39   :  { %v3406_v0 = vmul.f32 %v4777_v5, %v7240_v31  ;;  %v3317_v39 = vpop.xlane.xlu0 %3316  ;;  %v3326_v4 = vpop.xlane.xlu1 %3325 }
 0xe3a   :  { %3451 = vst.msk [vmem:[%s7514_s8 + $0x40] sm:$0xff] %vm1536_vm1, %v3403_v42  ;;  %4790 = vrcp.f32 %v3317_v39 }
 0xe3b   :  { %v4779_v2 = vpop.eup %4778  ;;  %3454 = vst.msk [vmem:[%s7514_s8 + $0x58] sm:$0xff] %vm1536_vm1, %v3406_v0  ;;  %4792 = vrcp.f32 %v3326_v4 }
 0xe3c   :  { %v4781_v27 = vpop.eup %4780  ;;  %v3409_v56 = vmul.f32 %v4779_v2, %v7250_v33 }
 0xe3d   :  { %v3404_v31 = vmul.f32 %v4781_v27, %v7248_v59  ;;  %v3335_v24 = vpop.xlane.xlu0 %3334  ;;  %v3320_v29 = vpop.xlane.xlu1 %3319 }
 0xe3e   :  { %3457 = vst.msk [vmem:[%s7514_s8 + $0x70] sm:$0xff] %vm1536_vm1, %v3409_v56  ;;  %4794 = vrcp.f32 %v3335_v24 }
 0xe3f   :  { %v4783_v62 = vpop.eup %4782  ;;  %3452 = vst.msk [vmem:[%s7514_s8 + $0x48] sm:$0xff] %vm1536_vm1, %v3404_v31  ;;  %4796 = vrcp.f32 %v3320_v29 }
 0xe40   :  { %v4785_v20 = vpop.eup %4784  ;;  %v3407_v33 = vmul.f32 %v4783_v62, %v7258_v60 }
 0xe41   :  { %v3410_v59 = vmul.f32 %v4785_v20, %v7260_v8  ;;  %v3329_v53 = vpop.xlane.xlu0 %3328  ;;  %v3338_v52 = vpop.xlane.xlu1 %3337 }
 0xe42   :  { %3455 = vst.msk [vmem:[%s7514_s8 + $0x60] sm:$0xff] %vm1536_vm1, %v3407_v33  ;;  %4798 = vrcp.f32 %v3329_v53 }
 0xe43   :  { %v4787_v26 = vpop.eup %4786  ;;  %3458 = vst.msk [vmem:[%s7514_s8 + $0x78] sm:$0xff] %vm1536_vm1, %v3410_v59  ;;  %4800 = vrcp.f32 %v3338_v52 }
 0xe44   :  { %v4789_v3 = vpop.eup %4788  ;;  %v3413_v60 = vmul.f32 %v4787_v26, %v7270_v58 }
 0xe45   :  { %v3408_v8 = vmul.f32 %v4789_v3, %v7268_v28  ;;  %v3347_v38 = vpop.xlane.xlu0 %3346  ;;  %v3332_v45 = vpop.xlane.xlu1 %3331 }
 0xe46   :  { %3461 = vst.msk [vmem:[%s7514_s8 + $0x90] sm:$0xff] %vm1536_vm1, %v3413_v60  ;;  %4802 = vrcp.f32 %v3347_v38 }
 0xe47   :  { %v4791_v16 = vpop.eup %4790  ;;  %3456 = vst.msk [vmem:[%s7514_s8 + $0x68] sm:$0xff] %vm1536_vm1, %v3408_v8  ;;  %4804 = vrcp.f32 %v3332_v45 }
 0xe48   :  { %v4793_v14 = vpop.eup %4792  ;;  %v3411_v58 = vmul.f32 %v4791_v16, %v7278_v43 }
 0xe49   :  { %v3414_v28 = vmul.f32 %v4793_v14, %v7280_v18  ;;  %v3341_v61 = vpop.xlane.xlu0 %3340  ;;  %v3350_v36 = vpop.xlane.xlu1 %3349 }
 0xe4a   :  { %3459 = vst.msk [vmem:[%s7514_s8 + $0x80] sm:$0xff] %vm1536_vm1, %v3411_v58  ;;  %4806 = vrcp.f32 %v3341_v61 }
 0xe4b   :  { %v4795_v40 = vpop.eup %4794  ;;  %3462 = vst.msk [vmem:[%s7514_s8 + $0x98] sm:$0xff] %vm1536_vm1, %v3414_v28  ;;  %4808 = vrcp.f32 %v3350_v36 }
 0xe4c   :  { %v4797_v47 = vpop.eup %4796  ;;  %v3417_v43 = vmul.f32 %v4795_v40, %v7289_v12 }
 0xe4d   :  { %v3412_v18 = vmul.f32 %v4797_v47, %v7287_v10  ;;  %v3344_v63 = vpop.xlane.xlu1 %3343 }
 0xe4e   :  { %3465 = vst.msk [vmem:[%s7514_s8 + $0xb0] sm:$0xff] %vm1536_vm1, %v3417_v43  ;;  %4810 = vrcp.f32 %v3344_v63  ;;  %v3353_v22 = vpop.xlane.xlu0 %3352 }
 0xe4f   :  { %v4799_v44 = vpop.eup %4798  ;;  %3460 = vst.msk [vmem:[%s7514_s8 + $0x88] sm:$0xff] %vm1536_vm1, %v3412_v18  ;;  %4812 = vrcp.f32 %v3353_v22 }
 0xe50   :  { %v4801_v25 = vpop.eup %4800  ;;  %v3415_v12 = vmul.f32 %v4799_v44, %v7296_v50 }
 0xe51   :  { %v3418_v10 = vmul.f32 %v4801_v25, %v7298_v1 }
 0xe52   :  { %3463 = vst.msk [vmem:[%s7514_s8 + $0xa0] sm:$0xff] %vm1536_vm1, %v3415_v12  ;;  %v3359_v7 = vpop.xlane.xlu0 %3358 }
 0xe53   :  { %v4803_v32 = vpop.eup %4802  ;;  %3466 = vst.msk [vmem:[%s7514_s8 + $0xb8] sm:$0xff] %vm1536_vm1, %v3418_v10  ;;  %4814 = vrcp.f32 %v3359_v7  ;;  %v3356_v15 = vpop.xlane.xlu1 %3355 }
 0xe54   :  { %v4805_v9 = vpop.eup %4804  ;;  %v3421_v51 = vmul.f32 %v4803_v32, %v7308_v41  ;;  %4816 = vrcp.f32 %v3356_v15 }
 0xe55   :  { %v3416_v50 = vmul.f32 %v4805_v9, %v7306_v46 }
 0xe56   :  { %3469 = vst.msk [vmem:[%s7514_s8 + $0xd0] sm:$0xff] %vm1536_vm1, %v3421_v51 }
 0xe57   :  { %v4807_v1 = vpop.eup %4806  ;;  %3464 = vst.msk [vmem:[%s7514_s8 + $0xa8] sm:$0xff] %vm1536_vm1, %v3416_v50  ;;  %v3362_v55 = vpop.xlane.xlu1 %3361 }
 0xe58   :  { %v4809_v37 = vpop.eup %4808  ;;  %v3419_v13 = vmul.f32 %v4807_v1, %v7315_v34  ;;  %4818 = vrcp.f32 %v3362_v55 }
 0xe59   :  { %v3422_v41 = vmul.f32 %v4809_v37, %v7317_v49 }
 0xe5a   :  { %3467 = vst.msk [vmem:[%s7514_s8 + $0xc0] sm:$0xff] %vm1536_vm1, %v3419_v13 }
 0xe5b   :  { %v4811_v46 = vpop.eup %4810  ;;  %3470 = vst.msk [vmem:[%s7514_s8 + $0xd8] sm:$0xff] %vm1536_vm1, %v3422_v41 }
 0xe5c   :  { %v4813_v57 = vpop.eup %4812  ;;  %v3420_v11 = vmul.f32 %v4811_v46, %v7323_v6 }
 0xe5d   :  { %v3423_v21 = vmul.f32 %v4813_v57, %v7327_v48 }
 0xe5e   :  { %3468 = vst.msk [vmem:[%s7514_s8 + $0xc8] sm:$0xff] %vm1536_vm1, %v3420_v11 }
 0xe5f   :  { %3471 = vst.msk [vmem:[%s7514_s8 + $0xe0] sm:$0xff] %vm1536_vm1, %v3423_v21 }
 0xe60   :  { %v4815_v34 = vpop.eup %4814 }
 0xe61   :  { %v4817_v49 = vpop.eup %4816  ;;  %v3425_v17 = vmul.f32 %v4815_v34, %v7331_v35 }
 0xe62   :  { %v3424_v19 = vmul.f32 %v4817_v49, %v7333_v23 }
 0xe63   :  { %3473 = vst.msk [vmem:[%s7514_s8 + $0xf0] sm:$0xff] %vm1536_vm1, %v3425_v17 }
 0xe64   :  { %3472 = vst.msk [vmem:[%s7514_s8 + $0xe8] sm:$0xff] %vm1536_vm1, %v3424_v19 }
 0xe65   :  { %v4819_v6 = vpop.eup %4818 }
 0xe66   :  { %v3426_v48 = vmul.f32 %v4819_v6, %v7339_v30 }
 0xe68   :  { %3474 = vst.msk [vmem:[%s7514_s8 + $0xf8] sm:$0xff] %vm1536_vm1, %v3426_v48 }
 0xe69   :  { %4840 = dma.done.wait [#allocation3], 4096  }
 0xe6a   :  { %4841 = vsyncadd [#allocation3], 4294963200 }
 0xe6b   :  { %3534 = vsyncpa [#allocation3], 1 }

</bundles_post_ra>
